<compile_context>
chip_gen: v7x
topology: tpu7x:2x2x1
jax: 0.10.0
libtpu: 0.0.40
codegen_flags: <defaults>
</compile_context>

<pallas_src>
import math

import numpy as np

import jax
import jax.numpy as jnp
from jax.experimental import pallas as pl
from jax.experimental.pallas import tpu as pltpu


# ---------------------------------------------------------------------------
# Index computation (mirrors ATen nearest_idx / compute_scales_value, fp32).
# ---------------------------------------------------------------------------
def _nearest_src_indices(in_size, out_size, scale_opt):
    if out_size == in_size:
        return np.arange(out_size, dtype=np.int64)
    if out_size == 2 * in_size:
        return np.arange(out_size, dtype=np.int64) // 2
    if scale_opt is not None and scale_opt > 0.0:
        scale = np.float32(1.0) / np.float32(scale_opt)
    else:
        scale = np.float32(in_size) / np.float32(out_size)
    idx = np.floor(
        np.arange(out_size, dtype=np.float32) * scale
    ).astype(np.int64)
    return np.minimum(idx, in_size - 1)


def _round_up(a, b):
    return (a + b - 1) // b * b


# ---------------------------------------------------------------------------
# Plain XLA gather (exact for every dtype) -- used for tiny problems and as
# the fallback when the fused selection matrix would be too large.
# ---------------------------------------------------------------------------
def _xla_upsample(x, src_h, src_w):
    return x[..., src_h, :][..., src_w]


# ---------------------------------------------------------------------------
# Pallas kernel: one fused selection matmul per packed-row block.
# ---------------------------------------------------------------------------
def _upsample_sel_matmul_kernel(x_ref, sel_ref, o_ref):
    # x_ref:   (blk, G*H*W)           lane-dense (multiple of 128)
    # sel_ref: (G*H*W, G*Hout*Wout)   block-diagonal one-hot selection matrix
    # o_ref:   (blk, G*Hout*Wout)     lane-dense (multiple of 128)
    # One-hot matmul at HIGHEST precision == bit-exact gather/copy.
    o_ref[...] = jnp.dot(
        x_ref[...],
        sel_ref[...],
        preferred_element_type=jnp.float32,
        precision=jax.lax.Precision.HIGHEST,
    ).astype(o_ref.dtype)


def upsample_nearest2d(
    x,
    output_size=(6, 10),
    scales_h=2.3,
    scales_w=4.7,
    *,
    min_pallas_out_bytes=64 * 1024,
    max_sel_bytes=8 * 1024 * 1024,
):
    n, c, h, w = x.shape
    h_out, w_out = int(output_size[0]), int(output_size[1])

    src_h = _nearest_src_indices(h, h_out, scales_h)
    src_w = _nearest_src_indices(w, w_out, scales_w)

    hw = h * w
    howo = h_out * w_out
    nc = n * c
    itemsize = np.dtype(x.dtype).itemsize
    out_bytes = nc * howo * itemsize

    # Lane-dense group size: smallest G (power of two <= 128) such that both
    # G*hw and G*howo are multiples of 128.
    g1 = 128 // math.gcd(hw, 128)
    g2 = 128 // math.gcd(howo, 128)
    G = (g1 * g2) // math.gcd(g1, g2)
    k_dim = G * hw
    n_dim = G * howo
    sel_bytes = k_dim * n_dim * itemsize

    use_pallas = (
        jnp.issubdtype(x.dtype, jnp.floating)
        and out_bytes >= min_pallas_out_bytes
        and sel_bytes <= max_sel_bytes
    )
    if not use_pallas:
        # Tiny problems are pure launch/per-step overhead; non-float dtypes
        # must not go through the MXU; huge spatial sizes would not fit the
        # fused selection matrix in VMEM.
        # TODO(synk): separable (W-gather then H-gather) Pallas path for very
        # large spatial sizes instead of falling back to XLA.
        return _xla_upsample(x, src_h, src_w)

    # One-hot selection matrix S (hw, howo): column (i, j) selects input pixel
    # (src_h[i], src_w[j]); then block-diagonal kron(I_G, S) for G-packing.
    src_flat = (src_h[:, None] * w + src_w[None, :]).reshape(-1)  # (howo,)
    sel_small = np.zeros((hw, howo), dtype=np.float32)
    sel_small[src_flat, np.arange(howo)] = 1.0
    sel_big = np.kron(np.eye(G, dtype=np.float32), sel_small)
    sel = jnp.asarray(sel_big, dtype=x.dtype)

    # Free row-major reshape to a 2D slab, pad rows up to a multiple of G,
    # then pack G rows per block row (still row-major, no transpose).
    x2d = x.reshape(nc, hw)
    nc_pad = _round_up(nc, G)
    if nc_pad != nc:
        x2d = jnp.pad(x2d, ((0, nc_pad - nc), (0, 0)))
    rows = nc_pad // G
    xg = x2d.reshape(rows, k_dim)

    # Block size: keep the double-buffered working set under ~16 MiB, but make
    # the grid at least 2 (near-)balanced steps so v7x's 2 TensorCores (and
    # megacore) can both work.
    vmem_budget = 16 * 1024 * 1024
    blk_cap = max(8, (vmem_budget // (2 * itemsize * (k_dim + n_dim))) // 8 * 8)
    if rows <= 8:
        blk = rows
    elif rows <= 2 * blk_cap:
        blk = min(blk_cap, _round_up((rows + 1) // 2, 8))
    else:
        blk = blk_cap
    grid = (pl.cdiv(rows, blk),)

    out_g = pl.pallas_call(
        _upsample_sel_matmul_kernel,
        out_shape=jax.ShapeDtypeStruct((rows, n_dim), x.dtype),
        grid_spec=pltpu.PrefetchScalarGridSpec(
            num_scalar_prefetch=0,
            grid=grid,
            in_specs=[
                pl.BlockSpec((blk, k_dim), lambda i: (i, 0)),
                pl.BlockSpec((k_dim, n_dim), lambda i: (0, 0)),
            ],
            out_specs=pl.BlockSpec((blk, n_dim), lambda i: (i, 0)),
        ),
        compiler_params=pltpu.CompilerParams(
            dimension_semantics=("parallel",),
            vmem_limit_bytes=32 * 1024 * 1024,
        ),
    )(xg, sel)

    out2d = out_g.reshape(nc_pad, howo)[:nc]
    return out2d.reshape(n, c, h_out, w_out)


# ---------------------------------------------------------------------------
# Pure-JAX reference (same ATen index semantics).
# ---------------------------------------------------------------------------
def upsample_nearest2d_ref(x, output_size=(6, 10), scales_h=2.3, scales_w=4.7):
    h, w = x.shape[-2], x.shape[-1]
    src_h = _nearest_src_indices(h, output_size[0], scales_h)
    src_w = _nearest_src_indices(w, output_size[1], scales_w)
    return x[..., src_h, :][..., src_w]


if __name__ == "__main__":
    key = jax.random.PRNGKey(0)
    k1, k2, k3, k4 = jax.random.split(key, 4)

    # 1) Canonical torch-mlir e2e shape (2,3,2,2) -> (2,3,6,10).
    #    Tiny problem: exercises the XLA short-circuit path.
    x1 = jax.random.normal(k1, (2, 3, 2, 2), dtype=jnp.float32)
    out1 = jax.block_until_ready(upsample_nearest2d(x1))
    assert out1.shape == (2, 3, 6, 10)
    assert jnp.allclose(out1, upsample_nearest2d_ref(x1), atol=1e-6, rtol=0.0)

    # 2) Pallas path: lane-dense G=32 packing (K=128, N=1920), 2-step grid.
    x2 = jax.random.normal(k2, (2, 256, 2, 2), dtype=jnp.float32)
    out2 = jax.block_until_ready(upsample_nearest2d(x2))
    assert out2.shape == (2, 256, 6, 10)
    assert jnp.allclose(out2, upsample_nearest2d_ref(x2), atol=1e-6, rtol=0.0)

    # 3) Pallas path: non-square spatial input, general-scale index path.
    x3 = jax.random.normal(k3, (4, 128, 4, 7), dtype=jnp.float32)
    out3 = jax.block_until_ready(upsample_nearest2d(x3))
    assert out3.shape == (4, 128, 6, 10)
    assert jnp.allclose(out3, upsample_nearest2d_ref(x3), atol=1e-6, rtol=0.0)

    # 4) Pallas path: N*C not a multiple of G, partial last grid block,
    #    balanced 2-step grid (40/25 packed rows).
    x4 = jax.random.normal(k4, (2, 1027, 2, 2), dtype=jnp.float32)
    out4 = jax.block_until_ready(upsample_nearest2d(x4))
    assert out4.shape == (2, 1027, 6, 10)
    assert jnp.allclose(out4, upsample_nearest2d_ref(x4), atol=1e-6, rtol=0.0)

    print("KERNEL_OK")
</pallas_src>

<mosaic_0001>
module attributes {stable_mosaic.version = 11 : i64} {
  func.func @_upsample_sel_matmul_kernel(%arg0: i32, %arg1: memref<8x128xf32, #tpu.memory_space<vmem>>, %arg2: memref<128x1920xf32, #tpu.memory_space<vmem>>, %arg3: memref<8x1920xf32, #tpu.memory_space<vmem>>) attributes {dimension_semantics = [#tpu.dimension_semantics<parallel>], iteration_bounds = array<i64: 2>, scalar_prefetch = 0 : i64, scratch_operands = 0 : i64, tpu.core_type = #tpu.core_type<tc>, window_params = [{transform_indices = @transform_0, window_bounds = array<i64: 8, 128>}, {pipeline_mode = #tpu.pipeline_mode<synchronous>, transform_indices = @transform_1, window_bounds = array<i64: 128, 1920>}, {transform_indices = @transform_2, window_bounds = array<i64: 8, 1920>}]} {
    %c0 = arith.constant 0 : index
    %c0_0 = arith.constant 0 : index
    %0 = vector.load %arg1[%c0, %c0_0] : memref<8x128xf32, #tpu.memory_space<vmem>>, vector<8x128xf32>
    %c0_1 = arith.constant 0 : index
    %c0_2 = arith.constant 0 : index
    %1 = vector.load %arg2[%c0_1, %c0_2] : memref<128x1920xf32, #tpu.memory_space<vmem>>, vector<128x1920xf32>
    %cst = arith.constant dense<0.000000e+00> : vector<8x1920xf32>
    %2 = tpu.matmul %0, %1, %cst {dimension_numbers = #tpu.dot_dimension_numbers<[1], [0], [0], [1], [0, 0, 1, 1], [], []>, precision = #tpu.contract_precision<fp32>} : vector<8x128xf32>, vector<128x1920xf32>, vector<8x1920xf32> -> vector<8x1920xf32>
    %c0_3 = arith.constant 0 : index
    %c0_4 = arith.constant 0 : index
    %3 = vector.load %arg3[%c0_3, %c0_4] : memref<8x1920xf32, #tpu.memory_space<vmem>>, vector<8x1920xf32>
    tpu.vector_store %arg3[%c0_3, %c0_4], %2 {strides = array<i32>} : memref<8x1920xf32, #tpu.memory_space<vmem>>, vector<8x1920xf32>,
    return
  }
  func.func @transform_0(%arg0: i32) -> (i32, i32) {
    %c0_i32 = arith.constant 0 : i32
    %c0_i32_0 = arith.constant 0 : i32
    return %arg0, %c0_i32 : i32, i32
  }
  func.func @transform_1(%arg0: i32) -> (i32, i32) {
    %c0_i32 = arith.constant 0 : i32
    %c0_i32_0 = arith.constant 0 : i32
    %c0_i32_1 = arith.constant 0 : i32
    return %c0_i32, %c0_i32_0 : i32, i32
  }
  func.func @transform_2(%arg0: i32) -> (i32, i32) {
    %c0_i32 = arith.constant 0 : i32
    %c0_i32_0 = arith.constant 0 : i32
    return %arg0, %c0_i32 : i32, i32
  }
}

</mosaic_0001>

<bundles_post_ra>
// kernel: tpu_custom_call.1
= control target key start
LH: loop header
LB: loop body
LE: loop exit
PB: predicated region body
PF: predicated region fallthrough
CT: control target
= control target key end

     0   :  { %7 = vsyncpa [#allocation3], 0  ;;  %s12724_s0 = inlined_call_operand.hbm [shape: f32[16,128], index: 0, kind: input, shape index: {}]   ;;  %s12725_s1 = inlined_call_operand.hbm [shape: f32[128,1920], index: 1, kind: input, shape index: {}]   ;;  %s12726_s2 = inlined_call_operand.hbm [shape: f32[16,1920], index: 2, kind: output, shape index: {}]  }
   0x1   :  { %9 = vsyncpa [#allocation3 + $0x1], 0 }
   0x2   :  { %10 = vsyncpa [#allocation6], 0 }
   0x3   :  { %11 = vsyncpa [#allocation4], 0 }
   0x4   :  { %13 = vsyncpa [#allocation4 + $0x1], 0  ;;  %s9260_s9 = smov 0   ;;  %s9262_s10 = smov 0  }
   0x5   :  { %s9264_s11 = smov 0   ;;  %s9266_s12 = smov 0  }
   0x6 LB: > { %s9281_s13 = sadd.s32 4294967295, %s9235_s12   ;;  %s7151_s14 = sadd.s32 4294967294, %s9235_s12   ;;  %s9235_s12 = sphi %s9266_s12, %s14578_s12   ;;  %s9231_s11 = sphi %s9264_s11, %s14577_s11   ;;  %s9227_s10 = sphi %s9262_s10, %s14576_s10   ;;  %s9223_s9 = sphi %s9260_s9, %s14575_s9  }
   0x7   : > { %p39_p0 = scmp.ne.s32.totalorder %s9227_s10, %s9223_s9  ;;  %p12727_p1 = scmp.eq.s32.totalorder %s9281_s13, 0 }
   0x8   : > { %p90_p3 = scmp.eq.s32.totalorder %s7151_s14, 1  ;;  %p7152_p5 = scmp.ge.s32.totalorder %s9235_s12, 1 }
   0x9   : > { %p9290_p4 = por %p12727_p1, %p39_p0  ;;  %p97_p7 = scmp.lt.s32.totalorder %s9235_s12, 3 }
   0xa   : > { %p9295_p6 = por %p90_p3, %p39_p0  ;;  %s9237_s18 = smov [#allocation5]  }
   0xb   : > { %s13330_s15 = scalar_select %p9290_p4, 1, 0 }
   0xc   : > { %s13331_s16 = scalar_select %p9295_p6, 1, 0 }
   0xd   : > { %p9300_p8 = pnand %p7152_p5, %p97_p7  ;;  %s109_s19 = sshll.u32 %s9237_s18, 4  ;;  %s9304_s19 = int_to_ptr.vmem [resolvable:$true] %s109_s19 }
   0xe   : > { %s9316_s21 = sadd.s32 1, %s9235_s12   ;;  %s26_s22 = sadd.s32 1, %s9231_s11 }
   0xf   : > { %s13332_s17 = scalar_select %p9300_p8, 1, 0 }
  0x10   : > { %p9053_p9 = pneg %p9300_p8  ;;  %s23_s23 = ssub.s32 %s9235_s12, %s9316_s21 }
  0x11   : > { %s9107_s26 = scalar_lea.hbm %s12725_s1, 30720 }
  0x12   : > { %p9311_p11 = pnand %p9053_p9, %p12727_p1  ;;  %p9108_p12 = scmp.ne.s32.totalorder %s12725_s1, %s9107_s26 }
  0x13   : > { %p9114_p5 = scmp.lt.u32.totalorder %s9107_s26, %s12725_s1 }
  0x14   : > { %p9109_p13 = pneg %p9311_p11 }
  0x16   : > { %p9110_p0 = pnand %p9109_p13, %p9108_p12 }
  0x18   : > { %p9111_p3 = pneg %p9110_p0 }
  0x1a   : > { %p9116_p7 = pnand %p9114_p5, %p9111_p3 }
  0x1c   : > { %9119 = shalt.err (!%p9116_p7)
}
  0x1d   : > { %s9120_s3 = scalar_lea.vmem %s9304_s19, 30720  ;;  %p9128_p2 = scmp.lt.s32.totalorder %s9304_s19, %s9304_s19 }
  0x1e   : > { %p9121_p9 = scmp.ne.s32.totalorder %s9304_s19, %s9120_s3  ;;  %p9129_p6 = scmp.lt.s32.totalorder %s9120_s3, %s9120_s3 }
  0x20   : > { %p9123_p10 = pnand %p9121_p9, %p9109_p13  ;;  %p9130_p4 = por %p9129_p6, %p9128_p2 }
  0x22   : > { %p9124_p1 = pneg %p9123_p10 }
  0x24   : > { %p9131_p8 = pnand %p9130_p4, %p9124_p1 }
  0x26   : > { %9134 = shalt.err (!%p9131_p8)
}
  0x27   : > { %s9238_s4 = smov 1920   ;;  %s9239_s5 = smov 120  }
  0x28   : > { %9056 = dma.hbm_to_vmem [thread:$0]  (!%p9311_p11), %s12725_s1, 30720, %s9304_s19, [#allocation6], %s9238_s4, %s9238_s4, %s9239_s5  }
  0x29   : > { %p24_p2 = scmp.eq.s32.totalorder %s23_s23, 0  ;;  %p33_p1 = scmp.ne.s32.totalorder %s9231_s11, %s9227_s10 }
  0x2a   : > { %p34_p4 = scmp.eq.s32.totalorder %s9235_s12, 0  ;;  %p9066_p6 = scmp.lt.s32.totalorder %s9235_s12, 2 }
  0x2b   : > { %s9347_s8 = scalar_select %p24_p2, %s9231_s11, %s26_s22  }
  0x2c   : > { %p35_p8 = por %p34_p4, %p33_p1  ;;  %p13334_p10 = scmp.eq.s32.totalorder %s9281_s13, 1 }
  0x2d   : > { %s123_s18 = sand.u32 1, %s9231_s11   ;;  %s7156_s24 = sshll.u32 %s9235_s12, 7 }
  0x2e   : > { %p9351_p12 = por %p13334_p10, %p33_p1  ;;  %s7155_s25 = sshll.u32 %s123_s18, 3 }
  0x2f   : > { %s9360_s27 = scalar_lea.hbm %s12724_s0, %s7156_s24  ;;  %s127_s19 = scalar_lea.vmem [#allocation2], %s7155_s25 }
  0x30   : > { %s134_s22 = sshll.u32 %s127_s19, 4  ;;  %p9362_p11 = pnand %p9066_p6, %p35_p8  ;;  %s9366_s22 = int_to_ptr.vmem [resolvable:$true] %s134_s22 }
  0x31   : > { %s124_s28 = scalar_lea.sflag [#allocation3], %s123_s18  ;;  %s9135_s29 = scalar_lea.hbm %s9360_s27, 128 }
  0x32   : > { %p9136_p13 = scmp.ne.s32.totalorder %s9360_s27, %s9135_s29  ;;  %p9137_p0 = pneg %p9362_p11 }
  0x33   : > { %s9140_s4 = scalar_lea.hbm %s12724_s0, 256  ;;  %p9141_p7 = scmp.lt.u32.totalorder %s9360_s27, %s12724_s0 }
  0x34   : > { %p9138_p3 = pnand %p9137_p0, %p9136_p13  ;;  %p9142_p9 = scmp.lt.u32.totalorder %s9140_s4, %s9135_s29 }
  0x35   : > { %p9144_p1 = scmp.lt.u32.totalorder %s9135_s29, %s9360_s27 }
  0x36   : > { %p9139_p5 = pneg %p9138_p3  ;;  %p9143_p2 = por %p9142_p9, %p9141_p7 }
  0x38   : > { %p9145_p4 = por %p9144_p1, %p9143_p2 }
  0x3a   : > { %p9146_p6 = pnand %p9145_p4, %p9139_p5 }
  0x3c   : > { %9149 = shalt.err (!%p9146_p6)
}
  0x3d   : > { %s9150_s7 = scalar_lea.vmem %s9366_s22, 128  ;;  %s9240_s18 = smov [#allocation2]  }
  0x3e   : > { %p9151_p8 = scmp.ne.s32.totalorder %s9366_s22, %s9150_s7  ;;  %s9155_s24 = sshll.u32 %s9240_s18, 4  ;;  %s9156_s24 = int_to_ptr.vmem [resolvable:$false] %s9155_s24 }
  0x3f   : > { %s9157_s25 = scalar_lea.vmem %s9156_s24, 256  ;;  %p9158_p3 = scmp.lt.s32.totalorder %s9366_s22, %s9156_s24 }
  0x40   : > { %p9153_p10 = pnand %p9151_p8, %p9137_p0  ;;  %p9159_p7 = scmp.lt.s32.totalorder %s9157_s25, %s9150_s7 }
  0x42   : > { %p9154_p13 = pneg %p9153_p10  ;;  %p9160_p9 = por %p9159_p7, %p9158_p3 }
  0x44   : > { %p9161_p2 = pnand %p9160_p9, %p9154_p13 }
  0x46   : > { %9164 = shalt.err (!%p9161_p2)
}
  0x47   : > { %9060 = dma.hbm_to_vmem [thread:$0]  (!%p9362_p11), %s9360_s27, 128, %s9366_s22, %s124_s28  }
  0x48   : > { %p13337_p5 = scmp.ne.s32.totalorder %s13332_s17, 0 }
  0x4a   : > { %143 = sbr.rel (%p13337_p5) target bundleno = 1147 (0x47b), region = 28 }
  0x51   : > { %s9396_s20 = sand.u32 1, %s9227_s10   ;;  %p13338_p0 = scmp.ne.s32.totalorder %s13330_s15, 0 }
  0x52   : > { %s7158_s26 = sshll.u32 %s9396_s20, 3  ;;  %s146_s19 = scalar_lea.sflag [#allocation3], %s9396_s20 }
  0x53   : > { %s9400_s29 = scalar_lea.vmem [#allocation2], %s7158_s26 }
  0x54   : > { %9210 = dma.done.wait (%p13338_p0), %s146_s19, 128  }
  0x55   : > { %9212 = vsyncadd (%p13338_p0), %s146_s19, 4294967168  ;;  %p13339_p11 = scmp.eq.s32.totalorder %s9281_s13, 0 }
  0x57   : > { %9214 = dma.done.wait (%p13339_p11), [#allocation6], 30720   ;;  %p13340_p1 = pmov %p13339_p11 }
  0x58   : > { %v12730_v0 = vmov 0.0   ;;  %v176_v1 = vld [vmem:[#allocation5 + $0x8] sm:$0xff]  ;;  %v191_v2 = vld [vmem:[#allocation5 + $0x80] sm:$0xff]  ;;  %v178_v3 = vld [vmem:[#allocation5 + $0x18] sm:$0xff]  ;;  %s9043_s15 = smul.u32 120, %s9396_s20  ;;  %vm9243_vm0 = vmmov 0  }
  0x59   : > { %9216 = vsyncadd (%p13340_p1), [#allocation6], 4294936576  ;;  %511 = vmatprep.mubr.f32.mxu0 %v12730_v0  ;;  %1366 = vmatprep.mubr.f32.mxu1 %v12730_v0  ;;  %v415_v4 = vand.u32 4294901760, %v176_v1  ;;  %v419_v5 = vand.u32 4294901760, %v191_v2  ;;  %v193_v6 = vld [vmem:[#allocation5 + $0x90] sm:$0xff]  ;;  %v1270_v7 = vand.u32 4294901760, %v178_v3 }
  0x5a   : > { %v175_v8 = vld [vmem:[#allocation5] sm:$0xff]  ;;  %v190_v9 = vld [vmem:[#allocation5 + $0x78] sm:$0xff]  ;;  %v1274_v10 = vand.u32 4294901760, %v193_v6  ;;  %v177_v13 = vld [vmem:[#allocation5 + $0x10] sm:$0xff]  ;;  %s11545_s17 = scalar_lea.vmem [#allocation7], %s9043_s15  ;;  %s9044_s27 = smul.u32 1920, %s9281_s13 }
  0x5b   : > { %v417_v11 = vand.u32 4294901760, %v175_v8  ;;  %v421_v12 = vand.u32 4294901760, %v190_v9  ;;  %v192_v14 = vld [vmem:[#allocation5 + $0x88] sm:$0xff]  ;;  %v206_v15 = vld [vmem:[#allocation5 + $0xf8] sm:$0xff]  ;;  %v9412_v16 = vpack.c.bf16 %v419_v5, %v415_v4  ;;  %v9414_v17 = vsub.f32 %v176_v1, %v415_v4  ;;  %v221_v20 = vld [vmem:[#allocation5 + $0x170] sm:$0xff]  ;;  %s7071_s22 = sshll.u32 %s11545_s17, 4  ;;  %s12681_s22 = int_to_ptr.vmem [resolvable:$true] %s7071_s22 }
  0x5c   : > { %v9416_v18 = vsub.f32 %v191_v2, %v419_v5  ;;  %v9418_v19 = vsub.f32 %v178_v3, %v1270_v7  ;;  %v208_v21 = vld [vmem:[#allocation5 + $0x108] sm:$0xff]  ;;  %v223_v22 = vld [vmem:[#allocation5 + $0x180] sm:$0xff]  ;;  %v9420_v23 = vpack.c.bf16 %v1274_v10, %v1270_v7  ;;  %v9422_v24 = vsub.f32 %v193_v6, %v1274_v10  ;;  %v205_v27 = vld [vmem:[#allocation5 + $0xf0] sm:$0xff]  ;;  %s12679_s30 = scalar_lea.hbm %s12726_s2, %s9044_s27  ;;  %s7057_s3 = scalar_lea.sflag [#allocation4], %s9396_s20 }
  0x5d   : > { %13341 = vst [vmem:[#allocation11_spill] sm:$0xff] %v9412_v16  ;;  %13342 = vst [vmem:[#allocation12_spill] sm:$0xff] %v9414_v17  ;;  %v9424_v25 = vpack.c.bf16 %v421_v12, %v417_v11  ;;  %v9426_v26 = vsub.f32 %v175_v8, %v417_v11  ;;  %7476 = vmatprep.subr.bf16.mxu0 %v9412_v16  ;;  %v9429_v28 = vsub.f32 %v190_v9, %v421_v12  ;;  %v220_v32 = vld [vmem:[#allocation5 + $0x168] sm:$0xff]  ;;  %v207_v37 = vld [vmem:[#allocation5 + $0x100] sm:$0xff]  ;;  %s9165_s13 = scalar_lea.vmem %s12681_s22, 1920  ;;  %s9244_s4 = smov [#allocation7]  }
  0x5e   : > { %13343 = vst [vmem:[#allocation13_spill] sm:$0xff] %v9416_v18  ;;  %13344 = vst [vmem:[#allocation14_spill] sm:$0xff] %v9418_v19  ;;  %v1272_v29 = vand.u32 4294901760, %v177_v13  ;;  %v1276_v30 = vand.u32 4294901760, %v192_v14  ;;  %v423_v31 = vand.u32 4294901760, %v206_v15  ;;  %7668 = vmatprep.subr.bf16.mxu1 %v9420_v23  ;;  %v427_v33 = vand.u32 4294901760, %v221_v20  ;;  %p9166_p4 = scmp.ne.s32.totalorder %s12681_s22, %s9165_s13 }
  0x5f   : > { %13345 = vst [vmem:[#allocation15_spill] sm:$0xff] %v9420_v23  ;;  %13346 = vst [vmem:[#allocation16_spill] sm:$0xff] %v9422_v24  ;;  %7478 = vmatpush1.bf16.msra.mxu0 %v9424_v25  ;;  %v1278_v34 = vand.u32 4294901760, %v208_v21  ;;  %v1282_v35 = vand.u32 4294901760, %v223_v22  ;;  %v425_v36 = vand.u32 4294901760, %v205_v27  ;;  %v222_v38 = vld [vmem:[#allocation5 + $0x178] sm:$0xff] }
  0x60   : > { %13347 = vst [vmem:[#allocation17_spill] sm:$0xff] %v9424_v25  ;;  %13348 = vst [vmem:[#allocation18_spill] sm:$0xff] %v9429_v28  ;;  %v9433_v39 = vpack.c.bf16 %v1276_v30, %v1272_v29  ;;  %v9435_v40 = vsub.f32 %v177_v13, %v1272_v29  ;;  %v9437_v41 = vsub.f32 %v192_v14, %v1276_v30  ;;  %v236_v43 = vld [vmem:[#allocation5 + $0x1e8] sm:$0xff]  ;;  %v251_v44 = vld [vmem:[#allocation5 + $0x260] sm:$0xff]  ;;  %v429_v52 = vand.u32 4294901760, %v220_v32  ;;  %p9167_p6 = pnand %p9166_p4, %p9351_p12  ;;  %s9169_s5 = sshll.u32 %s9244_s4, 4  ;;  %s9170_s5 = int_to_ptr.vmem [resolvable:$false] %s9169_s5 }
  0x61   : > { %v9439_v42 = vsub.f32 %v206_v15, %v423_v31  ;;  %v238_v45 = vld [vmem:[#allocation5 + $0x1f8] sm:$0xff]  ;;  %v9441_v46 = vpack.c.bf16 %v427_v33, %v423_v31  ;;  %v9443_v47 = vsub.f32 %v221_v20, %v427_v33  ;;  %v9445_v48 = vpack.c.bf16 %v1282_v35, %v1278_v34  ;;  %v253_v50 = vld [vmem:[#allocation5 + $0x270] sm:$0xff]  ;;  %v235_v59 = vld [vmem:[#allocation5 + $0x1e0] sm:$0xff]  ;;  %s9171_s6 = scalar_lea.vmem %s9170_s5, 3840  ;;  %p9172_p10 = scmp.lt.s32.totalorder %s12681_s22, %s9170_s5 }
  0x62   : > { %13349 = vst [vmem:[#allocation19_spill] sm:$0xff] %v9433_v39  ;;  %v9447_v49 = vsub.f32 %v208_v21, %v1278_v34  ;;  %7670 = vmatpush1.bf16.msra.mxu1 %v9433_v39  ;;  %v9450_v51 = vsub.f32 %v223_v22, %v1282_v35  ;;  %v9452_v53 = vsub.f32 %v205_v27, %v425_v36  ;;  %v1280_v54 = vand.u32 4294901760, %v207_v37  ;;  %v250_v60 = vld [vmem:[#allocation5 + $0x258] sm:$0xff]  ;;  %v237_v2 = vld [vmem:[#allocation5 + $0x1f0] sm:$0xff]  ;;  %v252_v3 = vld [vmem:[#allocation5 + $0x268] sm:$0xff]  ;;  %p9168_p8 = pneg %p9167_p6  ;;  %p9173_p13 = scmp.lt.s32.totalorder %s9171_s6, %s9165_s13 }
  0x63   : > { %13350 = vst [vmem:[#allocation20_spill] sm:$0xff] %v9441_v46  ;;  %13351 = vst [vmem:[#allocation21_spill] sm:$0xff] %v9445_v48  ;;  %7480 = vmatprep.subr.bf16.mxu0 %v9441_v46  ;;  %7672 = vmatprep.subr.bf16.mxu1 %v9445_v48  ;;  %v1284_v55 = vand.u32 4294901760, %v222_v38  ;;  %v431_v56 = vand.u32 4294901760, %v236_v43  ;;  %v435_v57 = vand.u32 4294901760, %v251_v44  ;;  %v1286_v58 = vand.u32 4294901760, %v238_v45 }
  0x64   : > { %v9456_v61 = vpack.c.bf16 %v429_v52, %v425_v36  ;;  %v9458_v62 = vsub.f32 %v220_v32, %v429_v52  ;;  %v9460_v63 = vsub.f32 %v207_v37, %v1280_v54  ;;  %v1290_v1 = vand.u32 4294901760, %v253_v50  ;;  %v266_v4 = vld [vmem:[#allocation5 + $0x2d8] sm:$0xff]  ;;  %v281_v9 = vld [vmem:[#allocation5 + $0x350] sm:$0xff]  ;;  %v268_v10 = vld [vmem:[#allocation5 + $0x2e8] sm:$0xff]  ;;  %p9174_p3 = por %p9173_p13, %p9172_p10 }
  0x65   : > { %v9462_v5 = vpack.c.bf16 %v1284_v55, %v1280_v54  ;;  %v9464_v6 = vsub.f32 %v222_v38, %v1284_v55  ;;  %v9466_v7 = vpack.c.bf16 %v435_v57, %v431_v56  ;;  %v9468_v8 = vsub.f32 %v236_v43, %v431_v56  ;;  %v283_v11 = vld [vmem:[#allocation5 + $0x360] sm:$0xff]  ;;  %v265_v33 = vld [vmem:[#allocation5 + $0x2d0] sm:$0xff]  ;;  %v280_v38 = vld [vmem:[#allocation5 + $0x348] sm:$0xff] }
  0x66   : > { %13352 = vst [vmem:[#allocation22_spill] sm:$0xff] %v9456_v61  ;;  %7482 = vmatpush1.bf16.msra.mxu0 %v9456_v61  ;;  %v9471_v12 = vsub.f32 %v251_v44, %v435_v57  ;;  %v9473_v13 = vpack.c.bf16 %v1290_v1, %v1286_v58  ;;  %v9475_v14 = vsub.f32 %v238_v45, %v1286_v58  ;;  %v433_v20 = vand.u32 4294901760, %v235_v59  ;;  %v267_v43 = vld [vmem:[#allocation5 + $0x2e0] sm:$0xff]  ;;  %v282_v44 = vld [vmem:[#allocation5 + $0x358] sm:$0xff]  ;;  %v296_v55 = vld [vmem:[#allocation5 + $0x3c8] sm:$0xff]  ;;  %p9175_p7 = pnand %p9174_p3, %p9168_p8 }
  0x67   : > { %13353 = vst [vmem:[#allocation23_spill] sm:$0xff] %v9462_v5  ;;  %13354 = vst [vmem:[#allocation24_spill] sm:$0xff] %v9466_v7  ;;  %v9477_v15 = vsub.f32 %v253_v50, %v1290_v1  ;;  %7674 = vmatpush1.bf16.msra.mxu1 %v9462_v5  ;;  %7484 = vmatprep.subr.bf16.mxu0 %v9466_v7  ;;  %v437_v21 = vand.u32 4294901760, %v250_v60  ;;  %v1288_v22 = vand.u32 4294901760, %v237_v2  ;;  %v1292_v27 = vand.u32 4294901760, %v252_v3  ;;  %v311_v56 = vld [vmem:[#allocation5 + $0x440] sm:$0xff] }
  0x68   : > { %13355 = vst [vmem:[#allocation25_spill] sm:$0xff] %v9473_v13  ;;  %7676 = vmatprep.subr.bf16.mxu1 %v9473_v13  ;;  %v439_v29 = vand.u32 4294901760, %v266_v4  ;;  %v443_v30 = vand.u32 4294901760, %v281_v9  ;;  %v1294_v31 = vand.u32 4294901760, %v268_v10  ;;  %v1298_v32 = vand.u32 4294901760, %v283_v11  ;;  %v298_v57 = vld [vmem:[#allocation5 + $0x3d8] sm:$0xff] }
  0x69   : > { %v9482_v34 = vpack.c.bf16 %v437_v21, %v433_v20  ;;  %v9484_v35 = vsub.f32 %v235_v59, %v433_v20  ;;  %v9486_v36 = vsub.f32 %v250_v60, %v437_v21  ;;  %v9488_v37 = vpack.c.bf16 %v1292_v27, %v1288_v22  ;;  %v313_v21 = vld [vmem:[#allocation5 + $0x450] sm:$0xff]  ;;  %v310_v0 = vld [vmem:[#allocation5 + $0x438] sm:$0xff]  ;;  %v328_v48 = vld [vmem:[#allocation5 + $0x4c8] sm:$0xff] }
  0x6a   : > { %v9490_v45 = vsub.f32 %v237_v2, %v1288_v22  ;;  %v9492_v50 = vsub.f32 %v252_v3, %v1292_v27  ;;  %v9494_v52 = vpack.c.bf16 %v443_v30, %v439_v29  ;;  %v9496_v54 = vsub.f32 %v266_v4, %v439_v29  ;;  %v341_v13 = vld [vmem:[#allocation5 + $0x530] sm:$0xff]  ;;  %v327_v39 = vld [vmem:[#allocation5 + $0x4c0] sm:$0xff]  ;;  %v342_v16 = vld [vmem:[#allocation5 + $0x538] sm:$0xff] }
  0x6b   : > { %13356 = vst [vmem:[#allocation26_spill] sm:$0xff] %v9482_v34  ;;  %13357 = vst [vmem:[#allocation27_spill] sm:$0xff] %v9488_v37  ;;  %7486 = vmatpush1.bf16.msra.mxu0 %v9482_v34  ;;  %7678 = vmatpush1.bf16.msra.mxu1 %v9488_v37  ;;  %v9500_v58 = vsub.f32 %v281_v9, %v443_v30  ;;  %v9502_v59 = vpack.c.bf16 %v1298_v32, %v1294_v31  ;;  %v441_v1 = vand.u32 4294901760, %v265_v33  ;;  %v295_v30 = vld [vmem:[#allocation5 + $0x3c0] sm:$0xff]  ;;  %v326_v34 = vld [vmem:[#allocation5 + $0x4b8] sm:$0xff] }
  0x6c   : > { %13358 = vst [vmem:[#allocation28_spill] sm:$0xff] %v9494_v52  ;;  %v9504_v60 = vsub.f32 %v268_v10, %v1294_v31  ;;  %7488 = vmatprep.subr.bf16.mxu0 %v9494_v52  ;;  %v9507_v2 = vsub.f32 %v283_v11, %v1298_v32  ;;  %v445_v3 = vand.u32 4294901760, %v280_v38  ;;  %v1296_v4 = vand.u32 4294901760, %v267_v43  ;;  %v297_v10 = vld [vmem:[#allocation5 + $0x3d0] sm:$0xff]  ;;  %v312_v52 = vld [vmem:[#allocation5 + $0x448] sm:$0xff] }
  0x6d   : > { %13359 = vst [vmem:[#allocation29_spill] sm:$0xff] %v9502_v59  ;;  %v1300_v20 = vand.u32 4294901760, %v282_v44  ;;  %7680 = vmatprep.subr.bf16.mxu1 %v9502_v59  ;;  %v9510_v22 = vsub.f32 %v265_v33, %v441_v1  ;;  %v447_v27 = vand.u32 4294901760, %v296_v55  ;;  %v451_v9 = vand.u32 4294901760, %v311_v56 }
  0x6e   : > { %v1302_v29 = vand.u32 4294901760, %v298_v57  ;;  %v9512_v31 = vpack.c.bf16 %v445_v3, %v441_v1  ;;  %v9514_v37 = vsub.f32 %v280_v38, %v445_v3  ;;  %v9518_v32 = vsub.f32 %v267_v43, %v1296_v4 }
  0x6f   : > { %v9516_v11 = vpack.c.bf16 %v1300_v20, %v1296_v4  ;;  %v9520_v59 = vsub.f32 %v282_v44, %v1300_v20  ;;  %v9522_v33 = vpack.c.bf16 %v451_v9, %v447_v27  ;;  %v9524_v5 = vsub.f32 %v296_v55, %v447_v27  ;;  %v343_v55 = vld [vmem:[#allocation5 + $0x540] sm:$0xff] }
  0x70   : > { %13360 = vst [vmem:[#allocation30_spill] sm:$0xff] %v9512_v31  ;;  %13362 = vst [vmem:[#allocation32_spill] sm:$0xff] %v9518_v32  ;;  %v9526_v7 = vsub.f32 %v311_v56, %v451_v9  ;;  %7490 = vmatpush1.bf16.msra.mxu0 %v9512_v31  ;;  %v1306_v38 = vand.u32 4294901760, %v313_v21  ;;  %v9530_v1 = vsub.f32 %v298_v57, %v1302_v29  ;;  %v449_v43 = vand.u32 4294901760, %v295_v30  ;;  %v325_v57 = vld [vmem:[#allocation5 + $0x4b0] sm:$0xff]  ;;  %v340_v31 = vld [vmem:[#allocation5 + $0x528] sm:$0xff] }
  0x71   : > { %13361 = vst [vmem:[#allocation31_spill] sm:$0xff] %v9516_v11  ;;  %13363 = vst [vmem:[#allocation33_spill] sm:$0xff] %v9520_v59  ;;  %7682 = vmatpush1.bf16.msra.mxu1 %v9516_v11  ;;  %v453_v3 = vand.u32 4294901760, %v310_v0  ;;  %7492 = vmatprep.subr.bf16.mxu0 %v9522_v33  ;;  %v1304_v4 = vand.u32 4294901760, %v297_v10  ;;  %v1308_v44 = vand.u32 4294901760, %v312_v52  ;;  %v455_v20 = vand.u32 4294901760, %v326_v34 }
  0x72   : > { %13364 = vst [vmem:[#allocation34_spill] sm:$0xff] %v9522_v33  ;;  %13365 = vst [vmem:[#allocation35_spill] sm:$0xff] %v9524_v5  ;;  %v459_v61 = vand.u32 4294901760, %v341_v13  ;;  %v9533_v27 = vpack.c.bf16 %v1306_v38, %v1302_v29  ;;  %v9535_v56 = vsub.f32 %v313_v21, %v1306_v38  ;;  %v9539_v11 = vsub.f32 %v295_v30, %v449_v43  ;;  %v356_v29 = vld [vmem:[#allocation5 + $0x5a8] sm:$0xff] }
  0x73   : > { %13366 = vst [vmem:[#allocation36_spill] sm:$0xff] %v9526_v7  ;;  %13367 = vst [vmem:[#allocation37_spill] sm:$0xff] %v9530_v1  ;;  %v9537_v9 = vpack.c.bf16 %v453_v3, %v449_v43  ;;  %v9541_v46 = vsub.f32 %v310_v0, %v453_v3  ;;  %v9543_v33 = vpack.c.bf16 %v1308_v44, %v1304_v4  ;;  %v371_v1 = vld [vmem:[#allocation5 + $0x620] sm:$0xff]  ;;  %v1310_v0 = vand.u32 4294901760, %v328_v48 }
  0x74   : > { %13368 = vst [vmem:[#allocation38_spill] sm:$0xff] %v9533_v27  ;;  %13369 = vst [vmem:[#allocation39_spill] sm:$0xff] %v9535_v56  ;;  %v9545_v25 = vsub.f32 %v297_v10, %v1304_v4  ;;  %v9547_v23 = vsub.f32 %v312_v52, %v1308_v44  ;;  %7684 = vmatprep.subr.bf16.mxu1 %v9533_v27  ;;  %v9551_v21 = vpack.c.bf16 %v459_v61, %v455_v20  ;;  %v401_v56 = vld [vmem:[#allocation5 + $0x710] sm:$0xff] }
  0x75   : > { %13370 = vst [vmem:[#allocation40_spill] sm:$0xff] %v9537_v9  ;;  %13371 = vst [vmem:[#allocation41_spill] sm:$0xff] %v9539_v11  ;;  %7494 = vmatpush1.bf16.msra.mxu0 %v9537_v9  ;;  %v9553_v30 = vsub.f32 %v326_v34, %v455_v20  ;;  %v9555_v38 = vsub.f32 %v341_v13, %v459_v61  ;;  %7686 = vmatpush1.bf16.msra.mxu1 %v9543_v33  ;;  %v1314_v10 = vand.u32 4294901760, %v343_v55  ;;  %v372_v11 = vld [vmem:[#allocation5 + $0x628] sm:$0xff] }
  0x76   : > { %13372 = vst [vmem:[#allocation42_spill] sm:$0xff] %v9541_v46  ;;  %13373 = vst [vmem:[#allocation43_spill] sm:$0xff] %v9543_v33  ;;  %v457_v43 = vand.u32 4294901760, %v325_v57  ;;  %v461_v52 = vand.u32 4294901760, %v340_v31  ;;  %v1312_v3 = vand.u32 4294901760, %v327_v39  ;;  %7496 = vmatprep.subr.bf16.mxu0 %v9551_v21  ;;  %v9559_v4 = vsub.f32 %v328_v48, %v1310_v0  ;;  %v355_v33 = vld [vmem:[#allocation5 + $0x5a0] sm:$0xff] }
  0x77   : > { %13374 = vst [vmem:[#allocation44_spill] sm:$0xff] %v9545_v25  ;;  %13375 = vst [vmem:[#allocation45_spill] sm:$0xff] %v9547_v23  ;;  %v1316_v44 = vand.u32 4294901760, %v342_v16  ;;  %v463_v27 = vand.u32 4294901760, %v356_v29  ;;  %v467_v9 = vand.u32 4294901760, %v371_v1  ;;  %v358_v23 = vld [vmem:[#allocation5 + $0x5b8] sm:$0xff]  ;;  %v9561_v34 = vpack.c.bf16 %v1314_v10, %v1310_v0 }
  0x78   : > { %13376 = vst [vmem:[#allocation46_spill] sm:$0xff] %v9551_v21  ;;  %13377 = vst [vmem:[#allocation47_spill] sm:$0xff] %v9553_v30  ;;  %v373_v25 = vld [vmem:[#allocation5 + $0x630] sm:$0xff]  ;;  %v9563_v61 = vsub.f32 %v343_v55, %v1314_v10  ;;  %v9565_v13 = vpack.c.bf16 %v461_v52, %v457_v43  ;;  %v9567_v20 = vsub.f32 %v325_v57, %v457_v43  ;;  %v386_v0 = vld [vmem:[#allocation5 + $0x698] sm:$0xff]  ;;  %v465_v43 = vand.u32 4294901760, %v355_v33 }
  0x79   : > { %13378 = vst [vmem:[#allocation48_spill] sm:$0xff] %v9555_v38  ;;  %13379 = vst [vmem:[#allocation49_spill] sm:$0xff] %v9559_v4  ;;  %v370_v38 = vld [vmem:[#allocation5 + $0x618] sm:$0xff]  ;;  %v357_v30 = vld [vmem:[#allocation5 + $0x5b0] sm:$0xff]  ;;  %v9569_v46 = vsub.f32 %v340_v31, %v461_v52  ;;  %v9571_v48 = vpack.c.bf16 %v1316_v44, %v1312_v3  ;;  %v9573_v21 = vsub.f32 %v327_v39, %v1312_v3  ;;  %7688 = vmatprep.subr.bf16.mxu1 %v9561_v34 }
  0x7a   : > { %13380 = vst [vmem:[#allocation50_spill] sm:$0xff] %v9561_v34  ;;  %13381 = vst [vmem:[#allocation51_spill] sm:$0xff] %v9563_v61  ;;  %v9575_v4 = vsub.f32 %v342_v16, %v1316_v44  ;;  %7498 = vmatpush1.bf16.msra.mxu0 %v9565_v13  ;;  %v9579_v55 = vpack.c.bf16 %v467_v9, %v463_v27  ;;  %v9581_v57 = vsub.f32 %v356_v29, %v463_v27 }
  0x7b   : > { %13382 = vst [vmem:[#allocation52_spill] sm:$0xff] %v9565_v13  ;;  %13383 = vst [vmem:[#allocation53_spill] sm:$0xff] %v9567_v20  ;;  %v9583_v10 = vsub.f32 %v371_v1, %v467_v9  ;;  %v1318_v31 = vand.u32 4294901760, %v358_v23  ;;  %7690 = vmatpush1.bf16.msra.mxu1 %v9571_v48  ;;  %v1322_v39 = vand.u32 4294901760, %v373_v25  ;;  %v469_v16 = vand.u32 4294901760, %v370_v38  ;;  %v402_v20 = vld [vmem:[#allocation5 + $0x718] sm:$0xff] }
  0x7c   : > { %13384 = vst [vmem:[#allocation54_spill] sm:$0xff] %v9569_v46  ;;  %13385 = vst [vmem:[#allocation55_spill] sm:$0xff] %v9571_v48  ;;  %v1320_v52 = vand.u32 4294901760, %v357_v30  ;;  %7500 = vmatprep.subr.bf16.mxu0 %v9579_v55  ;;  %v1324_v44 = vand.u32 4294901760, %v372_v11  ;;  %v471_v34 = vand.u32 4294901760, %v386_v0  ;;  %v475_v13 = vand.u32 4294901760, %v401_v56 }
  0x7d   : > { %13386 = vst [vmem:[#allocation56_spill] sm:$0xff] %v9573_v21  ;;  %13387 = vst [vmem:[#allocation57_spill] sm:$0xff] %v9575_v4  ;;  %v9587_v3 = vsub.f32 %v358_v23, %v1318_v31  ;;  %v388_v4 = vld [vmem:[#allocation5 + $0x6a8] sm:$0xff]  ;;  %v403_v21 = vld [vmem:[#allocation5 + $0x720] sm:$0xff]  ;;  %v9589_v27 = vpack.c.bf16 %v1322_v39, %v1318_v31  ;;  %v9591_v1 = vsub.f32 %v373_v25, %v1322_v39 }
  0x7e   : > { %13388 = vst [vmem:[#allocation58_spill] sm:$0xff] %v9579_v55  ;;  %13389 = vst [vmem:[#allocation59_spill] sm:$0xff] %v9581_v57  ;;  %v9593_v9 = vpack.c.bf16 %v469_v16, %v465_v43  ;;  %v9595_v29 = vsub.f32 %v355_v33, %v465_v43  ;;  %v385_v48 = vld [vmem:[#allocation5 + $0x690] sm:$0xff]  ;;  %v387_v57 = vld [vmem:[#allocation5 + $0x6a0] sm:$0xff]  ;;  %v9597_v46 = vsub.f32 %v370_v38, %v469_v16  ;;  %v1326_v38 = vand.u32 4294901760, %v388_v4 }
  0x7f   : > { %13390 = vst [vmem:[#allocation60_spill] sm:$0xff] %v9583_v10  ;;  %13391 = vst [vmem:[#allocation61_spill] sm:$0xff] %v9587_v3  ;;  %v400_v10 = vld [vmem:[#allocation5 + $0x708] sm:$0xff]  ;;  %v9599_v23 = vpack.c.bf16 %v1324_v44, %v1320_v52  ;;  %v9601_v55 = vsub.f32 %v357_v30, %v1320_v52  ;;  %v9603_v3 = vsub.f32 %v372_v11, %v1324_v44  ;;  %7692 = vmatprep.subr.bf16.mxu1 %v9589_v27 }
  0x80   : > { %13392 = vst [vmem:[#allocation62_spill] sm:$0xff] %v9589_v27  ;;  %13393 = vst [vmem:[#allocation63_spill] sm:$0xff] %v9593_v9  ;;  %7502 = vmatpush1.bf16.msra.mxu0 %v9593_v9  ;;  %v9607_v25 = vpack.c.bf16 %v475_v13, %v471_v34  ;;  %v9609_v33 = vsub.f32 %v386_v0, %v471_v34  ;;  %v9611_v31 = vsub.f32 %v401_v56, %v475_v13  ;;  %v174_v9 = vld [vmem:[%s9400_s29] sm:$0xff] }
  0x81   : > { %13394 = vst [vmem:[#allocation64_spill] sm:$0xff] %v9599_v23  ;;  %7694 = vmatpush1.bf16.msra.mxu1 %v9599_v23  ;;  %v1330_v39 = vand.u32 4294901760, %v403_v21  ;;  %v473_v30 = vand.u32 4294901760, %v385_v48  ;;  %v477_v43 = vand.u32 4294901760, %v400_v10  ;;  %v1328_v11 = vand.u32 4294901760, %v387_v57 }
  0x82   : > { %13395 = vst [vmem:[#allocation65_spill] sm:$0xff] %v9607_v25  ;;  %13396 = vst [vmem:[#allocation66_spill] sm:$0xff] %v9611_v31  ;;  %7504 = vmatprep.subr.bf16.mxu0 %v9607_v25  ;;  %v9615_v16 = vsub.f32 %v388_v4, %v1326_v38  ;;  %v1332_v52 = vand.u32 4294901760, %v402_v20  ;;  %v12808_v44 = vand.u32 4294901760, %v9414_v17  ;;  %v12807_v34 = vand.u32 4294901760, %v9416_v18 }
  0x83   : > { %v9619_v0 = vpack.c.bf16 %v1330_v39, %v1326_v38  ;;  %v9621_v56 = vsub.f32 %v403_v21, %v1330_v39  ;;  %v9623_v13 = vpack.c.bf16 %v477_v43, %v473_v30  ;;  %v9625_v23 = vsub.f32 %v385_v48, %v473_v30 }
  0x84   : > { %13397 = vst [vmem:[#allocation67_spill] sm:$0xff] %v9615_v16  ;;  %v9628_v27 = vsub.f32 %v400_v10, %v477_v43  ;;  %v9630_v31 = vpack.c.bf16 %v1332_v52, %v1328_v11  ;;  %v9632_v4 = vsub.f32 %v387_v57, %v1328_v11  ;;  %v9634_v25 = vsub.f32 %v402_v20, %v1332_v52 }
  0x85   : > { %13398 = vst [vmem:[#allocation68_spill] sm:$0xff] %v9619_v0  ;;  %13399 = vst [vmem:[#allocation69_spill] sm:$0xff] %v9621_v56  ;;  %7696 = vmatprep.subr.bf16.mxu1 %v9619_v0  ;;  %7506 = vmatpush1.bf16.msra.mxu0 %v9623_v13  ;;  %v526_v21 = vsub.f32 %v9414_v17, %v12808_v44  ;;  %v538_v48 = vsub.f32 %v9416_v18, %v12807_v34  ;;  %v12811_v10 = vand.u32 4294901760, %v9418_v19 }
  0x86   : > { %13400 = vst [vmem:[#allocation70_spill] sm:$0xff] %v9623_v13  ;;  %13401 = vst [vmem:[#allocation71_spill] sm:$0xff] %v9625_v23  ;;  %v12816_v38 = vand.u32 4294901760, %v9422_v24  ;;  %7698 = vmatpush1.bf16.msra.mxu1 %v9630_v31  ;;  %v9647_v20 = vand.u32 4294901760, %v174_v9  ;;  %v12823_v57 = vand.u32 4294901760, %v9426_v26  ;;  %v12824_v39 = vand.u32 4294901760, %v9429_v28 }
  0x87   : > { %13402 = vst [vmem:[#allocation72_spill] sm:$0xff] %v9628_v27  ;;  %13403 = vst [vmem:[#allocation73_spill] sm:$0xff] %v9630_v31  ;;  %v12830_v30 = vand.u32 4294901760, %v9435_v40  ;;  %v527_v43 = vand.u32 4294901760, %v526_v21  ;;  %v539_v11 = vand.u32 4294901760, %v538_v48  ;;  %v1381_v52 = vsub.f32 %v9418_v19, %v12811_v10 }
  0x88   : > { %13404 = vst [vmem:[#allocation74_spill] sm:$0xff] %v9632_v4  ;;  %13405 = vst [vmem:[#allocation75_spill] sm:$0xff] %v9634_v25  ;;  %v1393_v34 = vsub.f32 %v9422_v24, %v12816_v38  ;;  %v9659_v44 = vsub.f32 %v174_v9, %v9647_v20  ;;  %v532_v31 = vsub.f32 %v9426_v26, %v12823_v57  ;;  %v12828_v38 = vand.u32 4294901760, %v9437_v41 }
  0x89   : > { %13406 = vst [vmem:[#allocation76_spill] sm:$0xff] %v9647_v20  ;;  %v544_v21 = vsub.f32 %v9429_v28, %v12824_v39  ;;  %v1387_v48 = vsub.f32 %v9435_v40, %v12830_v30  ;;  %v7507_v10 = vpack.c.bf16 %v539_v11, %v527_v43  ;;  %v1382_v13 = vand.u32 4294901760, %v1381_v52 }
  0x8a   : > { %13407 = vst [vmem:[#allocation77_spill] sm:$0xff] %v9659_v44  ;;  %v1394_v0 = vand.u32 4294901760, %v1393_v34  ;;  %v9672_v9 = vand.u32 4294901760, %v9659_v44  ;;  %v533_v20 = vand.u32 4294901760, %v532_v31  ;;  %v1399_v39 = vsub.f32 %v9437_v41, %v12828_v38 }
  0x8b   : > { %v545_v24 = vand.u32 4294901760, %v544_v21  ;;  %v1388_v19 = vand.u32 4294901760, %v1387_v48  ;;  %7508 = vmatprep.subr.bf16.mxu0 %v7507_v10  ;;  %v12827_v28 = vand.u32 4294901760, %v9439_v42  ;;  %v12829_v43 = vand.u32 4294901760, %v9443_v47 }
  0x8c   : > { %13408 = vst [vmem:[#allocation78_spill] sm:$0xff] %v9672_v9  ;;  %v7699_v57 = vpack.c.bf16 %v1394_v0, %v1382_v13  ;;  %v515_v34 = vsub.f32 %v9659_v44, %v9672_v9  ;;  %v12831_v52 = vand.u32 4294901760, %v9447_v49  ;;  %v12832_v31 = vand.u32 4294901760, %v9450_v51 }
  0x8d   : > { %v7509_v11 = vpack.c.bf16 %v545_v24, %v533_v20  ;;  %v1400_v21 = vand.u32 4294901760, %v1399_v39  ;;  %v550_v0 = vsub.f32 %v9439_v42, %v12827_v28  ;;  %v562_v13 = vsub.f32 %v9443_v47, %v12829_v43 }
  0x8e   : > { %7700 = vmatprep.subr.bf16.mxu1 %v7699_v57  ;;  %v12833_v10 = vand.u32 4294901760, %v9452_v53  ;;  %v9690_v48 = vand.u32 4294901760, %v515_v34  ;;  %v1405_v24 = vsub.f32 %v9447_v49, %v12831_v52  ;;  %v1417_v20 = vsub.f32 %v9450_v51, %v12832_v31 }
  0x8f   : > { %v12842_v57 = vand.u32 4294901760, %v9458_v62  ;;  %v7701_v39 = vpack.c.bf16 %v1400_v21, %v1388_v19  ;;  %v551_v28 = vand.u32 4294901760, %v550_v0  ;;  %v563_v38 = vand.u32 4294901760, %v562_v13 }
  0x90   : > { %13409 = vst [vmem:[#allocation79_spill] sm:$0xff] %v9690_v48  ;;  %v556_v43 = vsub.f32 %v9452_v53, %v12833_v10  ;;  %517 = vmatmul.mubr.f32.vlgmr.msra.gmra.mrb[0].mxu0 %v9690_v48  ;;  %1372 = vmatmul.mubr.f32.vlgmr.msra.gmra.mrb[0].mxu1 %v9690_v48  ;;  %v1406_v34 = vand.u32 4294901760, %v1405_v24  ;;  %v1418_v30 = vand.u32 4294901760, %v1417_v20  ;;  %v12838_v31 = vand.u32 4294901760, %v9460_v63 }
  0x91   : > { %v568_v52 = vsub.f32 %v9458_v62, %v12842_v57  ;;  %7510 = vmatpush1.bf16.msra.mxu0 %v7509_v11  ;;  %7702 = vmatpush1.bf16.msra.mxu1 %v7701_v39  ;;  %v7511_v19 = vpack.c.bf16 %v563_v38, %v551_v28  ;;  %v12839_v0 = vand.u32 4294901760, %v9464_v6  ;;  %v12840_v13 = vand.u32 4294901760, %v9468_v8 }
  0x92   : > { %v557_v21 = vand.u32 4294901760, %v556_v43  ;;  %v7703_v10 = vpack.c.bf16 %v1418_v30, %v1406_v34  ;;  %v1411_v24 = vsub.f32 %v9460_v63, %v12838_v31  ;;  %v12841_v20 = vand.u32 4294901760, %v9471_v12 }
  0x93   : > { %v569_v9 = vand.u32 4294901760, %v568_v52  ;;  %v13410_v48 = vmov 0.0   ;;  %7512 = vmatprep.subr.bf16.mxu0 %v7511_v19  ;;  %v1423_v28 = vsub.f32 %v9464_v6, %v12839_v0  ;;  %v574_v38 = vsub.f32 %v9468_v8, %v12840_v13 }
  0x94   : > { %747 = vmatprep.mubr.f32.mxu0 %v13410_v48  ;;  %1602 = vmatprep.mubr.f32.mxu1 %v13410_v48  ;;  %v12843_v30 = vand.u32 4294901760, %v9475_v14  ;;  %v12854_v43 = vand.u32 4294901760, %v9477_v15  ;;  %v1412_v52 = vand.u32 4294901760, %v1411_v24  ;;  %v586_v39 = vsub.f32 %v9471_v12, %v12841_v20 }
  0x95   : > { %7704 = vmatprep.subr.bf16.mxu1 %v7703_v10  ;;  %v7513_v11 = vpack.c.bf16 %v569_v9, %v557_v21  ;;  %v12846_v34 = vand.u32 4294901760, %v9484_v35  ;;  %v1424_v19 = vand.u32 4294901760, %v1423_v28  ;;  %v575_v31 = vand.u32 4294901760, %v574_v38 }
  0x96   : > { %v1429_v0 = vsub.f32 %v9475_v14, %v12843_v30  ;;  %v1441_v13 = vsub.f32 %v9477_v15, %v12854_v43  ;;  %v587_v10 = vand.u32 4294901760, %v586_v39  ;;  %v12847_v21 = vand.u32 4294901760, %v9486_v36 }
  0x97   : > { %7514 = vmatpush1.bf16.msra.mxu0 %v7513_v11  ;;  %v580_v9 = vsub.f32 %v9484_v35, %v12846_v34  ;;  %v12851_v24 = vand.u32 4294901760, %v9490_v45  ;;  %v7705_v28 = vpack.c.bf16 %v1424_v19, %v1412_v52  ;;  %v12848_v57 = vand.u32 4294901760, %v9492_v50 }
  0x98   : > { %v1430_v38 = vand.u32 4294901760, %v1429_v0  ;;  %v1442_v20 = vand.u32 4294901760, %v1441_v13  ;;  %v7515_v30 = vpack.c.bf16 %v587_v10, %v575_v31  ;;  %v592_v11 = vsub.f32 %v9486_v36, %v12847_v21 }
  0x99   : > { %v581_v44 = vand.u32 4294901760, %v580_v9  ;;  %v1435_v39 = vsub.f32 %v9490_v45, %v12851_v24  ;;  %7706 = vmatpush1.bf16.msra.mxu1 %v7705_v28  ;;  %v1447_v52 = vsub.f32 %v9492_v50, %v12848_v57  ;;  %v12849_v0 = vand.u32 4294901760, %v9496_v54 }
  0x9a   : > { %v7707_v34 = vpack.c.bf16 %v1442_v20, %v1430_v38  ;;  %v12850_v13 = vand.u32 4294901760, %v9500_v58  ;;  %7516 = vmatprep.subr.bf16.mxu0 %v7515_v30  ;;  %v593_v31 = vand.u32 4294901760, %v592_v11  ;;  %v12852_v10 = vand.u32 4294901760, %v9504_v60 }
  0x9b   : > { %v1436_v19 = vand.u32 4294901760, %v1435_v39  ;;  %v12853_v9 = vand.u32 4294901760, %v9507_v2  ;;  %v1448_v21 = vand.u32 4294901760, %v1447_v52  ;;  %v598_v20 = vsub.f32 %v9496_v54, %v12849_v0 }
  0x9c   : > { %7708 = vmatprep.subr.bf16.mxu1 %v7707_v34  ;;  %v610_v28 = vsub.f32 %v9500_v58, %v12850_v13  ;;  %v12857_v38 = vand.u32 4294901760, %v9510_v22  ;;  %v7517_v57 = vpack.c.bf16 %v593_v31, %v581_v44  ;;  %v1453_v30 = vsub.f32 %v9504_v60, %v12852_v10 }
  0x9d   : > { %v1465_v34 = vsub.f32 %v9507_v2, %v12853_v9  ;;  %v12856_v11 = vand.u32 4294901760, %v9514_v37  ;;  %v7709_v39 = vpack.c.bf16 %v1448_v21, %v1436_v19  ;;  %v599_v52 = vand.u32 4294901760, %v598_v20 }
  0x9e   : > { %v611_v0 = vand.u32 4294901760, %v610_v28  ;;  %v604_v13 = vsub.f32 %v9510_v22, %v12857_v38  ;;  %7518 = vmatpush1.bf16.msra.mxu0 %v7517_v57  ;;  %v1454_v24 = vand.u32 4294901760, %v1453_v30  ;;  %v12855_v10 = vand.u32 4294901760, %v9518_v32 }
  0x9f   : > { %v1466_v44 = vand.u32 4294901760, %v1465_v34  ;;  %v616_v31 = vsub.f32 %v9514_v37, %v12856_v11  ;;  %7710 = vmatpush1.bf16.msra.mxu1 %v7709_v39  ;;  %v12860_v21 = vand.u32 4294901760, %v9520_v59  ;;  %v12861_v19 = vand.u32 4294901760, %v9524_v5 }
  0xa0   : > { %v7519_v9 = vpack.c.bf16 %v611_v0, %v599_v52  ;;  %v605_v43 = vand.u32 4294901760, %v604_v13  ;;  %v1459_v57 = vsub.f32 %v9518_v32, %v12855_v10  ;;  %v12862_v30 = vand.u32 4294901760, %v9526_v7  ;;  %v13411_v13 = vld [vmem:[#allocation37_spill] sm:$0xff]  ;;  %v13412_v52 = vld [vmem:[#allocation39_spill] sm:$0xff] }
  0xa1   : > { %v7711_v20 = vpack.c.bf16 %v1466_v44, %v1454_v24  ;;  %v617_v28 = vand.u32 4294901760, %v616_v31  ;;  %v1471_v34 = vsub.f32 %v9520_v59, %v12860_v21  ;;  %v622_v0 = vsub.f32 %v9524_v5, %v12861_v19 }
  0xa2   : > { %7520 = vmatprep.subr.bf16.mxu0 %v7519_v9  ;;  %v12870_v39 = vand.u32 4294901760, %v13411_v13  ;;  %v12873_v24 = vand.u32 4294901760, %v13412_v52  ;;  %v1460_v31 = vand.u32 4294901760, %v1459_v57  ;;  %v634_v10 = vsub.f32 %v9526_v7, %v12862_v30  ;;  %v13413_v9 = vld [vmem:[#allocation41_spill] sm:$0xff]  ;;  %v13415_v30 = vld [vmem:[#allocation44_spill] sm:$0xff] }
  0xa3   : > { %7712 = vmatprep.subr.bf16.mxu1 %v7711_v20  ;;  %v7521_v44 = vpack.c.bf16 %v617_v28, %v605_v43  ;;  %v12872_v11 = vand.u32 4294901760, %v13413_v9  ;;  %v1472_v38 = vand.u32 4294901760, %v1471_v34  ;;  %v623_v32 = vand.u32 4294901760, %v622_v0  ;;  %v13414_v28 = vld [vmem:[#allocation42_spill] sm:$0xff]  ;;  %v13416_v7 = vld [vmem:[#allocation45_spill] sm:$0xff] }
  0xa4   : > { %v1477_v21 = vsub.f32 %v13411_v13, %v12870_v39  ;;  %v1489_v19 = vsub.f32 %v13412_v52, %v12873_v24  ;;  %v635_v20 = vand.u32 4294901760, %v634_v10  ;;  %v12875_v57 = vand.u32 4294901760, %v13414_v28 }
  0xa5   : > { %7522 = vmatpush1.bf16.msra.mxu0 %v7521_v44  ;;  %v628_v43 = vsub.f32 %v13413_v9, %v12872_v11  ;;  %v12878_v59 = vand.u32 4294901760, %v13415_v30  ;;  %v7713_v34 = vpack.c.bf16 %v1472_v38, %v1460_v31  ;;  %v12877_v5 = vand.u32 4294901760, %v13416_v7  ;;  %v13418_v31 = vld [vmem:[#allocation48_spill] sm:$0xff] }
  0xa6   : > { %v1478_v0 = vand.u32 4294901760, %v1477_v21  ;;  %v1490_v48 = vand.u32 4294901760, %v1489_v19  ;;  %v7523_v39 = vpack.c.bf16 %v635_v20, %v623_v32  ;;  %v640_v44 = vsub.f32 %v13414_v28, %v12875_v57  ;;  %v13417_v21 = vld [vmem:[#allocation47_spill] sm:$0xff] }
  0xa7   : > { %v629_v13 = vand.u32 4294901760, %v628_v43  ;;  %v1483_v10 = vsub.f32 %v13415_v30, %v12878_v59  ;;  %7714 = vmatpush1.bf16.msra.mxu1 %v7713_v34  ;;  %v1495_v38 = vsub.f32 %v13416_v7, %v12877_v5  ;;  %v12880_v19 = vand.u32 4294901760, %v13417_v21  ;;  %v13419_v43 = vld [vmem:[#allocation49_spill] sm:$0xff] }
  0xa8   : > { %v7715_v11 = vpack.c.bf16 %v1490_v48, %v1478_v0  ;;  %v12881_v24 = vand.u32 4294901760, %v13418_v31  ;;  %7524 = vmatprep.subr.bf16.mxu0 %v7523_v39  ;;  %v641_v32 = vand.u32 4294901760, %v640_v44  ;;  %v12883_v9 = vand.u32 4294901760, %v13419_v43  ;;  %v13420_v0 = vld [vmem:[#allocation53_spill] sm:$0xff]  ;;  %v13421_v44 = vld [vmem:[#allocation54_spill] sm:$0xff] }
  0xa9   : > { %v1484_v20 = vand.u32 4294901760, %v1483_v10  ;;  %v12885_v57 = vand.u32 4294901760, %v9563_v61  ;;  %v1496_v28 = vand.u32 4294901760, %v1495_v38  ;;  %v646_v48 = vsub.f32 %v13417_v21, %v12880_v19  ;;  %v13423_v21 = vld [vmem:[#allocation57_spill] sm:$0xff] }
  0xaa   : > { %7716 = vmatprep.subr.bf16.mxu1 %v7715_v11  ;;  %v658_v34 = vsub.f32 %v13418_v31, %v12881_v24  ;;  %v12892_v5 = vand.u32 4294901760, %v13420_v0  ;;  %v7525_v59 = vpack.c.bf16 %v641_v32, %v629_v13  ;;  %v1501_v39 = vsub.f32 %v13419_v43, %v12883_v9  ;;  %v13422_v9 = vld [vmem:[#allocation56_spill] sm:$0xff] }
  0xab   : > { %v1513_v11 = vsub.f32 %v9563_v61, %v12885_v57  ;;  %v12890_v10 = vand.u32 4294901760, %v13421_v44  ;;  %v7717_v38 = vpack.c.bf16 %v1496_v28, %v1484_v20  ;;  %v647_v7 = vand.u32 4294901760, %v646_v48  ;;  %v13424_v20 = vld [vmem:[#allocation59_spill] sm:$0xff] }
  0xac   : > { %v659_v19 = vand.u32 4294901760, %v658_v34  ;;  %v652_v24 = vsub.f32 %v13420_v0, %v12892_v5  ;;  %7526 = vmatpush1.bf16.msra.mxu0 %v7525_v59  ;;  %v1502_v31 = vand.u32 4294901760, %v1501_v39  ;;  %v12891_v43 = vand.u32 4294901760, %v13422_v9  ;;  %v13425_v39 = vld [vmem:[#allocation60_spill] sm:$0xff] }
  0xad   : > { %v1514_v13 = vand.u32 4294901760, %v1513_v11  ;;  %v664_v32 = vsub.f32 %v13421_v44, %v12890_v10  ;;  %7718 = vmatpush1.bf16.msra.mxu1 %v7717_v38  ;;  %v12893_v28 = vand.u32 4294901760, %v13423_v21  ;;  %v12894_v48 = vand.u32 4294901760, %v13424_v20 }
  0xae   : > { %v7527_v57 = vpack.c.bf16 %v659_v19, %v647_v7  ;;  %v653_v61 = vand.u32 4294901760, %v652_v24  ;;  %v1507_v59 = vsub.f32 %v13422_v9, %v12891_v43  ;;  %v12895_v11 = vand.u32 4294901760, %v13425_v39  ;;  %v13426_v24 = vld [vmem:[#allocation61_spill] sm:$0xff] }
  0xaf   : > { %v7719_v34 = vpack.c.bf16 %v1514_v13, %v1502_v31  ;;  %v665_v30 = vand.u32 4294901760, %v664_v32  ;;  %v1519_v10 = vsub.f32 %v13423_v21, %v12893_v28  ;;  %v670_v7 = vsub.f32 %v13424_v20, %v12894_v48 }
  0xb0   : > { %7528 = vmatprep.subr.bf16.mxu0 %v7527_v57  ;;  %v12897_v19 = vand.u32 4294901760, %v13426_v24  ;;  %v12901_v31 = vand.u32 4294901760, %v9591_v1  ;;  %v1508_v13 = vand.u32 4294901760, %v1507_v59  ;;  %v682_v32 = vsub.f32 %v13425_v39, %v12895_v11 }
  0xb1   : > { %7720 = vmatprep.subr.bf16.mxu1 %v7719_v34  ;;  %v7529_v38 = vpack.c.bf16 %v665_v30, %v653_v61  ;;  %v12899_v57 = vand.u32 4294901760, %v9595_v29  ;;  %v1520_v43 = vand.u32 4294901760, %v1519_v10  ;;  %v671_v5 = vand.u32 4294901760, %v670_v7 }
  0xb2   : > { %v1525_v28 = vsub.f32 %v13426_v24, %v12897_v19  ;;  %v1537_v48 = vsub.f32 %v9591_v1, %v12901_v31  ;;  %v683_v34 = vand.u32 4294901760, %v682_v32  ;;  %v12900_v30 = vand.u32 4294901760, %v9597_v46 }
  0xb3   : > { %7530 = vmatpush1.bf16.msra.mxu0 %v7529_v38  ;;  %v676_v61 = vsub.f32 %v9595_v29, %v12899_v57  ;;  %v12905_v59 = vand.u32 4294901760, %v9601_v55  ;;  %v7721_v10 = vpack.c.bf16 %v1520_v43, %v1508_v13  ;;  %v12902_v39 = vand.u32 4294901760, %v9603_v3 }
  0xb4   : > { %v1526_v7 = vand.u32 4294901760, %v1525_v28  ;;  %v1538_v11 = vand.u32 4294901760, %v1537_v48  ;;  %v7531_v19 = vpack.c.bf16 %v683_v34, %v671_v5  ;;  %v688_v38 = vsub.f32 %v9597_v46, %v12900_v30  ;;  %v13427_v48 = vld [vmem:[#allocation66_spill] sm:$0xff] }
  0xb5   : > { %v677_v24 = vand.u32 4294901760, %v676_v61  ;;  %v1531_v32 = vsub.f32 %v9601_v55, %v12905_v59  ;;  %7722 = vmatpush1.bf16.msra.mxu1 %v7721_v10  ;;  %v1543_v43 = vsub.f32 %v9603_v3, %v12902_v39  ;;  %v12903_v28 = vand.u32 4294901760, %v9609_v33 }
  0xb6   : > { %v7723_v57 = vpack.c.bf16 %v1538_v11, %v1526_v7  ;;  %v12904_v13 = vand.u32 4294901760, %v13427_v48  ;;  %7532 = vmatprep.subr.bf16.mxu0 %v7531_v19  ;;  %v689_v5 = vand.u32 4294901760, %v688_v38  ;;  %v12906_v61 = vand.u32 4294901760, %v9615_v16 }
  0xb7   : > { %v1532_v34 = vand.u32 4294901760, %v1531_v32  ;;  %v12907_v30 = vand.u32 4294901760, %v9621_v56  ;;  %v1544_v31 = vand.u32 4294901760, %v1543_v43  ;;  %v694_v11 = vsub.f32 %v9609_v33, %v12903_v28 }
  0xb8   : > { %7724 = vmatprep.subr.bf16.mxu1 %v7723_v57  ;;  %v706_v10 = vsub.f32 %v13427_v48, %v12904_v13  ;;  %v12913_v7 = vand.u32 4294901760, %v9625_v23  ;;  %v7533_v39 = vpack.c.bf16 %v689_v5, %v677_v24  ;;  %v1549_v19 = vsub.f32 %v9615_v16, %v12906_v61 }
  0xb9   : > { %v1561_v57 = vsub.f32 %v9621_v56, %v12907_v30  ;;  %v12912_v38 = vand.u32 4294901760, %v9628_v27  ;;  %v7725_v32 = vpack.c.bf16 %v1544_v31, %v1532_v34  ;;  %v695_v43 = vand.u32 4294901760, %v694_v11 }
  0xba   : > { %v707_v28 = vand.u32 4294901760, %v706_v10  ;;  %v700_v13 = vsub.f32 %v9625_v23, %v12913_v7  ;;  %7534 = vmatpush1.bf16.msra.mxu0 %v7533_v39  ;;  %v1550_v59 = vand.u32 4294901760, %v1549_v19  ;;  %v12910_v61 = vand.u32 4294901760, %v9632_v4 }
  0xbb   : > { %v1562_v24 = vand.u32 4294901760, %v1561_v57  ;;  %v712_v5 = vsub.f32 %v9628_v27, %v12912_v38  ;;  %7726 = vmatpush1.bf16.msra.mxu1 %v7725_v32  ;;  %v12911_v31 = vand.u32 4294901760, %v9634_v25  ;;  %v7539_v19 = vpack.c.bf16 %v9416_v18, %v9414_v17  ;;  %v13428_v32 = vld [vmem:[#allocation14_spill] sm:$0xff]  ;;  %v13433_v38 = vld [vmem:[#allocation36_spill] sm:$0xff] }
  0xbc   : > { %v7535_v30 = vpack.c.bf16 %v707_v28, %v695_v43  ;;  %v701_v56 = vand.u32 4294901760, %v700_v13  ;;  %v1555_v10 = vsub.f32 %v9632_v4, %v12910_v61  ;;  %v13434_v7 = vmov 0.0  }
  0xbd   : > { %v7727_v34 = vpack.c.bf16 %v1562_v24, %v1550_v59  ;;  %v713_v11 = vand.u32 4294901760, %v712_v5  ;;  %v1567_v39 = vsub.f32 %v9634_v25, %v12911_v31  ;;  %v13429_v59 = vld [vmem:[#allocation16_spill] sm:$0xff]  ;;  %v13430_v24 = vld [vmem:[#allocation18_spill] sm:$0xff]  ;;  %v13435_v18 = vand.u32 4294901760, %v13428_v32 }
  0xbe   : > { %7536 = vmatprep.subr.bf16.mxu0 %v7535_v30  ;;  %v1556_v28 = vand.u32 4294901760, %v1555_v10  ;;  %v7731_v43 = vpack.c.bf16 %v13429_v59, %v13428_v32  ;;  %v7541_v5 = vpack.c.bf16 %v13430_v24, %v9426_v26  ;;  %v7543_v30 = vpack.c.bf16 %v9443_v47, %v9439_v42  ;;  %v13431_v31 = vld [vmem:[#allocation76_spill] sm:$0xff] }
  0xbf   : > { %7728 = vmatprep.subr.bf16.mxu1 %v7727_v34  ;;  %v7537_v57 = vpack.c.bf16 %v713_v11, %v701_v56  ;;  %v1568_v13 = vand.u32 4294901760, %v1567_v39  ;;  %v7733_v56 = vpack.c.bf16 %v9437_v41, %v9435_v40  ;;  %v7735_v34 = vpack.c.bf16 %v9450_v51, %v9447_v49 }
  0xc0   : > { %v7545_v11 = vpack.c.bf16 %v9458_v62, %v9452_v53  ;;  %v7737_v10 = vpack.c.bf16 %v9464_v6, %v9460_v63  ;;  %v7547_v39 = vpack.c.bf16 %v9471_v12, %v9468_v8  ;;  %v13436_v17 = vand.u32 4294901760, %v13429_v59 }
  0xc1   : > { %7538 = vmatpush1.bf16.msra.mxu0 %v7537_v57  ;;  %v7729_v61 = vpack.c.bf16 %v1568_v13, %v1556_v28  ;;  %v7741_v57 = vpack.c.bf16 %v9492_v50, %v9490_v45  ;;  %v7551_v28 = vpack.c.bf16 %v9500_v58, %v9496_v54  ;;  %v7743_v13 = vpack.c.bf16 %v9507_v2, %v9504_v60 }
  0xc2   : > { %7540 = vmatprep.subr.bf16.mxu0 %v7539_v19  ;;  %v7549_v19 = vpack.c.bf16 %v9486_v36, %v9484_v35  ;;  %v9948_v25 = vpack.c.bf16 %v13436_v17, %v13435_v18  ;;  %v13437_v4 = vand.u32 4294901760, %v9426_v26  ;;  %v13439_v23 = vand.u32 4294901760, %v9435_v40 }
  0xc3   : > { %7730 = vmatpush1.bf16.msra.mxu1 %v7729_v61  ;;  %v7739_v61 = vpack.c.bf16 %v9477_v15, %v9475_v14  ;;  %v13440_v16 = vand.u32 4294901760, %v9437_v41  ;;  %v13441_v32 = vand.u32 4294901760, %v9439_v42  ;;  %v13442_v17 = vand.u32 4294901760, %v9443_v47 }
  0xc4   : > { %749 = vmatmul.mubr.f32.vlgmr.msra.gmra.mrb[0].mxu0 %v13431_v31  ;;  %7732 = vmatprep.subr.bf16.mxu1 %v7731_v43  ;;  %v7553_v43 = vpack.c.bf16 %v9514_v37, %v9510_v22  ;;  %v13443_v26 = vand.u32 4294901760, %v9447_v49  ;;  %v13444_v59 = vand.u32 4294901760, %v9450_v51  ;;  %v13445_v40 = vand.u32 4294901760, %v9452_v53 }
  0xc5   : > { %7542 = vmatpush1.bf16.msra.mxu0 %v7541_v5  ;;  %v13432_v5 = vld [vmem:[#allocation35_spill] sm:$0xff]  ;;  %883 = vmatprep.mubr.f32.mxu0 %v13434_v7  ;;  %v9961_v48 = vpack.c.bf16 %v13440_v16, %v13439_v23  ;;  %v9967_v18 = vpack.c.bf16 %v13442_v17, %v13441_v32  ;;  %v13446_v41 = vand.u32 4294901760, %v9458_v62  ;;  %v13447_v42 = vand.u32 4294901760, %v9460_v63 }
  0xc6   : > { %7544 = vmatprep.subr.bf16.mxu0 %v7543_v30  ;;  %1604 = vmatmul.mubr.f32.vlgmr.msra.gmra.mrb[0].mxu1 %v13431_v31  ;;  %v7555_v30 = vpack.c.bf16 %v13433_v38, %v13432_v5  ;;  %v13438_v31 = vand.u32 4294901760, %v13430_v24  ;;  %v13448_v47 = vand.u32 4294901760, %v9464_v6  ;;  %v13450_v49 = vand.u32 4294901760, %v9471_v12 }
  0xc7   : > { %7734 = vmatpush1.bf16.msra.mxu1 %v7733_v56  ;;  %1738 = vmatprep.mubr.f32.mxu1 %v13434_v7  ;;  %v9979_v23 = vpack.c.bf16 %v13446_v41, %v13445_v40  ;;  %v13451_v24 = vand.u32 4294901760, %v9475_v14  ;;  %v13452_v53 = vand.u32 4294901760, %v9477_v15  ;;  %v13453_v56 = vand.u32 4294901760, %v9484_v35  ;;  %v13469_v41 = vld [vmem:[#allocation37_spill] sm:$0xff] }
  0xc8   : > { %v9955_v27 = vpack.c.bf16 %v13438_v31, %v13437_v4  ;;  %7736 = vmatprep.subr.bf16.mxu1 %v7735_v34  ;;  %v9973_v4 = vpack.c.bf16 %v13444_v59, %v13443_v26  ;;  %v9985_v16 = vpack.c.bf16 %v13448_v47, %v13447_v42  ;;  %v13449_v31 = vand.u32 4294901760, %v9468_v8  ;;  %v13465_v59 = vld [vmem:[#allocation33_spill] sm:$0xff] }
  0xc9   : > { %7546 = vmatpush1.bf16.msra.mxu0 %v7545_v11  ;;  %v9997_v62 = vpack.c.bf16 %v13452_v53, %v13451_v24  ;;  %v13454_v63 = vand.u32 4294901760, %v9486_v36  ;;  %v13455_v34 = vand.u32 4294901760, %v9490_v45  ;;  %v13456_v8 = vand.u32 4294901760, %v9492_v50  ;;  %v13463_v50 = vld [vmem:[#allocation32_spill] sm:$0xff]  ;;  %v13472_v47 = vld [vmem:[#allocation41_spill] sm:$0xff] }
  0xca   : > { %7548 = vmatprep.subr.bf16.mxu0 %v7547_v39  ;;  %v9991_v51 = vpack.c.bf16 %v13450_v49, %v13449_v31  ;;  %v13457_v12 = vand.u32 4294901760, %v9496_v54  ;;  %v13458_v14 = vand.u32 4294901760, %v9500_v58  ;;  %v13459_v15 = vand.u32 4294901760, %v9504_v60  ;;  %v13474_v49 = vld [vmem:[#allocation42_spill] sm:$0xff] }
  0xcb   : > { %v10003_v6 = vpack.c.bf16 %v13454_v63, %v13453_v56  ;;  %v10009_v11 = vpack.c.bf16 %v13456_v8, %v13455_v34  ;;  %v13460_v35 = vand.u32 4294901760, %v9507_v2  ;;  %v13461_v36 = vand.u32 4294901760, %v9510_v22  ;;  %7738 = vmatpush1.bf16.msra.mxu1 %v7737_v10  ;;  %v13477_v56 = vld [vmem:[#allocation44_spill] sm:$0xff]  ;;  %v13479_v63 = vld [vmem:[#allocation45_spill] sm:$0xff] }
  0xcc   : > { %v10015_v39 = vpack.c.bf16 %v13458_v14, %v13457_v12  ;;  %v13462_v45 = vand.u32 4294901760, %v9514_v37  ;;  %v13464_v26 = vand.u32 4294901760, %v13463_v50  ;;  %v13466_v54 = vand.u32 4294901760, %v13465_v59  ;;  %7740 = vmatprep.subr.bf16.mxu1 %v7739_v61  ;;  %v13484_v12 = vld [vmem:[#allocation48_spill] sm:$0xff] }
  0xcd   : > { %v10021_v32 = vpack.c.bf16 %v13460_v35, %v13459_v15  ;;  %v13467_v58 = vand.u32 4294901760, %v13432_v5  ;;  %v13468_v60 = vand.u32 4294901760, %v13433_v38  ;;  %v13470_v42 = vand.u32 4294901760, %v13469_v41  ;;  %7550 = vmatpush1.bf16.msra.mxu0 %v7549_v19  ;;  %v13482_v38 = vld [vmem:[#allocation47_spill] sm:$0xff]  ;;  %v13487_v35 = vld [vmem:[#allocation49_spill] sm:$0xff] }
  0xce   : > { %v10027_v17 = vpack.c.bf16 %v13462_v45, %v13461_v36  ;;  %v10033_v40 = vpack.c.bf16 %v13466_v54, %v13464_v26  ;;  %v13471_v22 = vand.u32 4294901760, %v13412_v52  ;;  %v13473_v31 = vand.u32 4294901760, %v13472_v47  ;;  %v13489_v45 = vld [vmem:[#allocation51_spill] sm:$0xff]  ;;  %7552 = vmatprep.subr.bf16.mxu0 %v7551_v28 }
  0xcf   : > { %v10039_v2 = vpack.c.bf16 %v13468_v60, %v13467_v58  ;;  %v13475_v24 = vand.u32 4294901760, %v13474_v49  ;;  %v13478_v10 = vand.u32 4294901760, %v13477_v56  ;;  %v13480_v5 = vand.u32 4294901760, %v13479_v63  ;;  %7742 = vmatpush1.bf16.msra.mxu1 %v7741_v57 }
  0xd0   : > { %v10045_v37 = vpack.c.bf16 %v13471_v22, %v13470_v42  ;;  %v13483_v8 = vand.u32 4294901760, %v13482_v38  ;;  %v13485_v14 = vand.u32 4294901760, %v13484_v12  ;;  %v13488_v36 = vand.u32 4294901760, %v13487_v35  ;;  %7744 = vmatprep.subr.bf16.mxu1 %v7743_v13 }
  0xd1   : > { %v10051_v53 = vpack.c.bf16 %v13475_v24, %v13473_v31  ;;  %v10057_v34 = vpack.c.bf16 %v13480_v5, %v13478_v10  ;;  %v13490_v26 = vand.u32 4294901760, %v13489_v45  ;;  %v13492_v58 = vand.u32 4294901760, %v13420_v0  ;;  %v13499_v24 = vld [vmem:[#allocation60_spill] sm:$0xff]  ;;  %7554 = vmatpush1.bf16.msra.mxu0 %v7553_v43 }
  0xd2   : > { %v10063_v15 = vpack.c.bf16 %v13485_v14, %v13483_v8  ;;  %v13493_v60 = vand.u32 4294901760, %v13421_v44  ;;  %v13495_v61 = vand.u32 4294901760, %v13422_v9  ;;  %v13496_v19 = vand.u32 4294901760, %v13423_v21  ;;  %v13502_v8 = vld [vmem:[#allocation61_spill] sm:$0xff]  ;;  %7556 = vmatprep.subr.bf16.mxu0 %v7555_v30 }
  0xd3   : > { %13476 = vst [vmem:[#allocation39_spill] sm:$0xff] %v10051_v53  ;;  %13481 = vst [vmem:[#allocation53_spill] sm:$0xff] %v10057_v34  ;;  %v10069_v54 = vpack.c.bf16 %v13490_v26, %v13488_v36  ;;  %v13498_v31 = vand.u32 4294901760, %v13424_v20  ;;  %v13500_v10 = vand.u32 4294901760, %v13499_v24  ;;  %v13503_v14 = vand.u32 4294901760, %v13502_v8 }
  0xd4   : > { %13486 = vst [vmem:[#allocation54_spill] sm:$0xff] %v10063_v15  ;;  %v10075_v42 = vpack.c.bf16 %v13493_v60, %v13492_v58  ;;  %v10081_v22 = vpack.c.bf16 %v13496_v19, %v13495_v61  ;;  %v13504_v36 = vand.u32 4294901760, %v9591_v1  ;;  %v13506_v28 = vand.u32 4294901760, %v9595_v29 }
  0xd5   : > { %13491 = vst [vmem:[#allocation56_spill] sm:$0xff] %v10069_v54  ;;  %v10087_v5 = vpack.c.bf16 %v13500_v10, %v13498_v31  ;;  %v13507_v58 = vand.u32 4294901760, %v9597_v46  ;;  %v13509_v61 = vand.u32 4294901760, %v9601_v55  ;;  %v13510_v19 = vand.u32 4294901760, %v9603_v3  ;;  %v13513_v10 = vld [vmem:[#allocation66_spill] sm:$0xff] }
  0xd6   : > { %13494 = vst [vmem:[#allocation57_spill] sm:$0xff] %v10075_v42  ;;  %13497 = vst [vmem:[#allocation59_spill] sm:$0xff] %v10081_v22  ;;  %v10093_v26 = vpack.c.bf16 %v13504_v36, %v13503_v14  ;;  %v13512_v31 = vand.u32 4294901760, %v9609_v33  ;;  %v13516_v14 = vld [vmem:[#allocation67_spill] sm:$0xff]  ;;  %v7559_v57 = vpack.c.bf16 %v13484_v12, %v13482_v38  ;;  %v7751_v13 = vpack.c.bf16 %v13489_v45, %v13487_v35  ;;  %v13538_v38 = vld [vmem:[#allocation25_spill] sm:$0xff] }
  0xd7   : > { %13501 = vst [vmem:[#allocation14_spill] sm:$0xff] %v10087_v5  ;;  %v10099_v60 = vpack.c.bf16 %v13507_v58, %v13506_v28  ;;  %v10105_v22 = vpack.c.bf16 %v13510_v19, %v13509_v61  ;;  %v13514_v5 = vand.u32 4294901760, %v13513_v10  ;;  %v13517_v36 = vand.u32 4294901760, %v13516_v14  ;;  %v13520_v28 = vld [vmem:[#allocation71_spill] sm:$0xff]  ;;  %v13524_v19 = vld [vmem:[#allocation74_spill] sm:$0xff]  ;;  %v13542_v45 = vld [vmem:[#allocation29_spill] sm:$0xff] }
  0xd8   : > { %13505 = vst [vmem:[#allocation16_spill] sm:$0xff] %v10093_v26  ;;  %v13518_v26 = vld [vmem:[#allocation69_spill] sm:$0xff]  ;;  %v13521_v58 = vand.u32 4294901760, %v13520_v28  ;;  %v7745_v61 = vpack.c.bf16 %v13465_v59, %v13463_v50  ;;  %v7749_v50 = vpack.c.bf16 %v13479_v63, %v13477_v56  ;;  %v7561_v43 = vpack.c.bf16 %v13421_v44, %v13420_v0  ;;  %v13536_v56 = vld [vmem:[#allocation24_spill] sm:$0xff]  ;;  %v13537_v63 = vld [vmem:[#allocation23_spill] sm:$0xff] }
  0xd9   : > { %13508 = vst [vmem:[#allocation18_spill] sm:$0xff] %v10099_v60  ;;  %13511 = vst [vmem:[#allocation35_spill] sm:$0xff] %v10105_v22  ;;  %v10111_v42 = vpack.c.bf16 %v13514_v5, %v13512_v31  ;;  %v13519_v54 = vand.u32 4294901760, %v13518_v26  ;;  %v13522_v60 = vld [vmem:[#allocation72_spill] sm:$0xff]  ;;  %v13525_v22 = vand.u32 4294901760, %v13524_v19  ;;  %v13526_v5 = vld [vmem:[#allocation75_spill] sm:$0xff]  ;;  %v7753_v30 = vpack.c.bf16 %v13423_v21, %v13422_v9 }
  0xda   : > { %v13523_v15 = vand.u32 4294901760, %v13522_v60  ;;  %v13527_v31 = vand.u32 4294901760, %v13526_v5  ;;  %7746 = vmatpush1.bf16.msra.mxu1 %v7745_v61  ;;  %v7755_v59 = vpack.c.bf16 %v9591_v1, %v13502_v8  ;;  %v7567_v0 = vpack.c.bf16 %v13513_v10, %v9609_v33  ;;  %v13528_v1 = vld [vmem:[#allocation11_spill] sm:$0xff]  ;;  %v13532_v33 = vld [vmem:[#allocation20_spill] sm:$0xff]  ;;  %v13539_v12 = vld [vmem:[#allocation26_spill] sm:$0xff] }
  0xdb   : > { %13515 = vst [vmem:[#allocation36_spill] sm:$0xff] %v10111_v42  ;;  %v10117_v34 = vpack.c.bf16 %v13519_v54, %v13517_v36  ;;  %v7747_v54 = vpack.c.bf16 %v13412_v52, %v13469_v41  ;;  %v7557_v36 = vpack.c.bf16 %v13474_v49, %v13472_v47  ;;  %v7563_v52 = vpack.c.bf16 %v13499_v24, %v13424_v20  ;;  %v13533_v20 = vld [vmem:[#allocation19_spill] sm:$0xff]  ;;  %v13534_v47 = vld [vmem:[#allocation21_spill] sm:$0xff]  ;;  %v13535_v49 = vld [vmem:[#allocation22_spill] sm:$0xff] }
  0xdc   : > { %v10123_v53 = vpack.c.bf16 %v13523_v15, %v13521_v58  ;;  %v10131_v42 = vpack.c.bf16 %v13527_v31, %v13525_v22  ;;  %v7565_v41 = vpack.c.bf16 %v9597_v46, %v9595_v29  ;;  %v7757_v44 = vpack.c.bf16 %v9603_v3, %v9601_v55  ;;  %v13529_v29 = vld [vmem:[#allocation77_spill] sm:$0xff]  ;;  %v13530_v55 = vld [vmem:[#allocation15_spill] sm:$0xff]  ;;  %v13540_v15 = vld [vmem:[#allocation28_spill] sm:$0xff] }
  0xdd   : > { %7748 = vmatprep.subr.bf16.mxu1 %v7747_v54  ;;  %7558 = vmatpush1.bf16.msra.mxu0 %v7557_v36  ;;  %v7759_v9 = vpack.c.bf16 %v13518_v26, %v13516_v14  ;;  %v7569_v21 = vpack.c.bf16 %v13522_v60, %v13520_v28  ;;  %v7761_v46 = vpack.c.bf16 %v13526_v5, %v13524_v19  ;;  %v13531_v3 = vld [vmem:[#allocation17_spill] sm:$0xff]  ;;  %v13541_v35 = vld [vmem:[#allocation27_spill] sm:$0xff]  ;;  %v13543_v22 = vld [vmem:[#allocation30_spill] sm:$0xff] }
  0xde   : > { %7560 = vmatprep.subr.bf16.mxu0 %v7559_v57  ;;  %7750 = vmatpush1.bf16.msra.mxu1 %v7749_v50  ;;  %v13544_v24 = vld [vmem:[#allocation34_spill] sm:$0xff]  ;;  %v13545_v8 = vld [vmem:[#allocation31_spill] sm:$0xff]  ;;  %v13547_v60 = vld [vmem:[#allocation40_spill] sm:$0xff] }
  0xdf   : > { %7752 = vmatprep.subr.bf16.mxu1 %v7751_v13  ;;  %v13546_v26 = vld [vmem:[#allocation38_spill] sm:$0xff]  ;;  %v13549_v14 = vld [vmem:[#allocation43_spill] sm:$0xff]  ;;  %v13551_v58 = vld [vmem:[#allocation52_spill] sm:$0xff] }
  0xe0   : > { %v13548_v10 = vld [vmem:[#allocation46_spill] sm:$0xff]  ;;  %v13553_v19 = vld [vmem:[#allocation55_spill] sm:$0xff]  ;;  %v13556_v54 = vld [vmem:[#allocation65_spill] sm:$0xff] }
  0xe1   : > { %7562 = vmatpush1.bf16.msra.mxu0 %v7561_v43  ;;  %v13550_v28 = vld [vmem:[#allocation50_spill] sm:$0xff]  ;;  %v13555_v31 = vld [vmem:[#allocation63_spill] sm:$0xff]  ;;  %v13557_v36 = vld [vmem:[#allocation12_spill] sm:$0xff] }
  0xe2   : > { %7564 = vmatprep.subr.bf16.mxu0 %v7563_v52  ;;  %7754 = vmatpush1.bf16.msra.mxu1 %v7753_v30  ;;  %v13552_v61 = vld [vmem:[#allocation58_spill] sm:$0xff]  ;;  %v13558_v57 = vand.u32 4294901760, %v13557_v36  ;;  %v13559_v50 = vld [vmem:[#allocation13_spill] sm:$0xff]  ;;  %v13561_v52 = vld [vmem:[#allocation64_spill] sm:$0xff] }
  0xe3   : > { %7756 = vmatprep.subr.bf16.mxu1 %v7755_v59  ;;  %v13554_v5 = vld [vmem:[#allocation62_spill] sm:$0xff]  ;;  %v13560_v13 = vand.u32 4294901760, %v13559_v50  ;;  %v13562_v30 = vld [vmem:[#allocation68_spill] sm:$0xff] }
  0xe4   : > { %v13563_v59 = vld [vmem:[#allocation70_spill] sm:$0xff] }
  0xe5   : > { %7566 = vmatpush1.bf16.msra.mxu0 %v7565_v41  ;;  %v7603_v43 = vpack.c.bf16 %v13560_v13, %v13558_v57  ;;  %v13564_v41 = vld [vmem:[#allocation73_spill] sm:$0xff]  ;;  %v212_v50 = vld [vmem:[#allocation5 + $0x128] sm:$0xff] }
  0xe6   : > { %7568 = vmatprep.subr.bf16.mxu0 %v7567_v0  ;;  %7758 = vmatpush1.bf16.msra.mxu1 %v7757_v44  ;;  %v13565_v0 = vld [vmem:[#allocation78_spill] sm:$0xff]  ;;  %v13566_v44 = vld [vmem:[#allocation39_spill] sm:$0xff]  ;;  %v227_v13 = vld [vmem:[#allocation5 + $0x1a0] sm:$0xff] }
  0xe7   : > { %7760 = vmatprep.subr.bf16.mxu1 %v7759_v9  ;;  %v210_v9 = vld [vmem:[#allocation5 + $0x118] sm:$0xff] }
  0xe9   : > { %7570 = vmatpush1.bf16.msra.mxu0 %v7569_v21  ;;  %v225_v21 = vld [vmem:[#allocation5 + $0x190] sm:$0xff] }
  0xea   : > { %7572 = vmatprep.subr.bf16.mxu0 %v13528_v1  ;;  %7762 = vmatpush1.bf16.msra.mxu1 %v7761_v46  ;;  %v13567_v46 = vld [vmem:[#allocation54_spill] sm:$0xff] }
  0xeb   : > { %7764 = vmatprep.subr.bf16.mxu1 %v13530_v55 }
  0xec   : > { %886 = vmatmul.mubr.f32.vlgmr.msra.gmra.mrb[0].mxu0 %v13529_v29 }
  0xed   : > { %7574 = vmatpush1.bf16.msra.mxu0 %v13531_v3  ;;  %988 = vmatprep.mubr.f32.mxu0 %v13434_v7 }
  0xee   : > { %7576 = vmatprep.subr.bf16.mxu0 %v13532_v33  ;;  %1741 = vmatmul.mubr.f32.vlgmr.msra.gmra.mrb[0].mxu1 %v13529_v29  ;;  %v2137_v29 = vand.u32 4294901760, %v225_v21 }
  0xef   : > { %7766 = vmatpush1.bf16.msra.mxu1 %v13533_v20  ;;  %1843 = vmatprep.mubr.f32.mxu1 %v13434_v7 }
  0xf0   : > { %7768 = vmatprep.subr.bf16.mxu1 %v13534_v47 }
  0xf1   : > { %7578 = vmatpush1.bf16.msra.mxu0 %v13535_v49 }
  0xf2   : > { %7580 = vmatprep.subr.bf16.mxu0 %v13536_v56 }
  0xf3   : > { %7770 = vmatpush1.bf16.msra.mxu1 %v13537_v63 }
  0xf4   : > { %7772 = vmatprep.subr.bf16.mxu1 %v13538_v38 }
  0xf5   : > { %7582 = vmatpush1.bf16.msra.mxu0 %v13539_v12 }
  0xf6   : > { %7584 = vmatprep.subr.bf16.mxu0 %v13540_v15 }
  0xf7   : > { %7774 = vmatpush1.bf16.msra.mxu1 %v13541_v35 }
  0xf8   : > { %7776 = vmatprep.subr.bf16.mxu1 %v13542_v45 }
  0xf9   : > { %7586 = vmatpush1.bf16.msra.mxu0 %v13543_v22 }
  0xfa   : > { %7588 = vmatprep.subr.bf16.mxu0 %v13544_v24 }
  0xfb   : > { %7778 = vmatpush1.bf16.msra.mxu1 %v13545_v8 }
  0xfc   : > { %7780 = vmatprep.subr.bf16.mxu1 %v13546_v26 }
  0xfd   : > { %7590 = vmatpush1.bf16.msra.mxu0 %v13547_v60 }
  0xfe   : > { %7592 = vmatprep.subr.bf16.mxu0 %v13548_v10 }
  0xff   : > { %7782 = vmatpush1.bf16.msra.mxu1 %v13549_v14 }
 0x100   : > { %7784 = vmatprep.subr.bf16.mxu1 %v13550_v28 }
 0x101   : > { %7594 = vmatpush1.bf16.msra.mxu0 %v13551_v58 }
 0x102   : > { %7596 = vmatprep.subr.bf16.mxu0 %v13552_v61 }
 0x103   : > { %7786 = vmatpush1.bf16.msra.mxu1 %v13553_v19 }
 0x104   : > { %7788 = vmatprep.subr.bf16.mxu1 %v13554_v5  ;;  %v240_v5 = vld [vmem:[#allocation5 + $0x208] sm:$0xff] }
 0x105   : > { %7598 = vmatpush1.bf16.msra.mxu0 %v13555_v31  ;;  %v2992_v31 = vand.u32 4294901760, %v227_v13 }
 0x106   : > { %7600 = vmatprep.subr.bf16.mxu0 %v13556_v54  ;;  %v2988_v54 = vand.u32 4294901760, %v212_v50 }
 0x107   : > { %7790 = vmatpush1.bf16.msra.mxu1 %v13561_v52  ;;  %v211_v52 = vld [vmem:[#allocation5 + $0x120] sm:$0xff] }
 0x108   : > { %7792 = vmatprep.subr.bf16.mxu1 %v13562_v30  ;;  %v13573_v30 = vld [vmem:[#allocation56_spill] sm:$0xff] }
 0x109   : > { %7602 = vmatpush1.bf16.msra.mxu0 %v13563_v59  ;;  %v224_v59 = vld [vmem:[#allocation5 + $0x188] sm:$0xff] }
 0x10a   : > { %7604 = vmatprep.subr.bf16.mxu0 %v7603_v43  ;;  %v13570_v43 = vld [vmem:[#allocation53_spill] sm:$0xff] }
 0x10b   : > { %7794 = vmatpush1.bf16.msra.mxu1 %v13564_v41  ;;  %v209_v41 = vld [vmem:[#allocation5 + $0x110] sm:$0xff] }
 0x10c   : > { %992 = vmatmul.mubr.f32.vlgmr.msra.gmra.mrb[0].mxu0 %v13565_v0  ;;  %7796 = vmatprep.subr.bf16.mxu1 %v9948_v25  ;;  %v195_v25 = vld [vmem:[#allocation5 + $0xa0] sm:$0xff] }
 0x10d   : > { %7606 = vmatpush1.bf16.msra.mxu0 %v9955_v27  ;;  %1158 = vmatprep.mubr.f32.mxu0 %v13434_v7  ;;  %v180_v27 = vld [vmem:[#allocation5 + $0x28] sm:$0xff] }
 0x10e   : > { %7608 = vmatprep.subr.bf16.mxu0 %v9967_v18  ;;  %1847 = vmatmul.mubr.f32.vlgmr.msra.gmra.mrb[0].mxu1 %v13565_v0  ;;  %v197_v18 = vld [vmem:[#allocation5 + $0xb0] sm:$0xff] }
 0x10f   : > { %7798 = vmatpush1.bf16.msra.mxu1 %v9961_v48  ;;  %2013 = vmatprep.mubr.f32.mxu1 %v13434_v7  ;;  %v182_v48 = vld [vmem:[#allocation5 + $0x38] sm:$0xff] }
 0x110   : > { %7800 = vmatprep.subr.bf16.mxu1 %v9973_v4  ;;  %v179_v4 = vld [vmem:[#allocation5 + $0x20] sm:$0xff] }
 0x111   : > { %7610 = vmatpush1.bf16.msra.mxu0 %v9979_v23  ;;  %v194_v23 = vld [vmem:[#allocation5 + $0x98] sm:$0xff] }
 0x112   : > { %7612 = vmatprep.subr.bf16.mxu0 %v9991_v51  ;;  %v2129_v51 = vand.u32 4294901760, %v195_v25 }
 0x113   : > { %7802 = vmatpush1.bf16.msra.mxu1 %v9985_v16  ;;  %v2125_v16 = vand.u32 4294901760, %v180_v27 }
 0x114   : > { %7804 = vmatprep.subr.bf16.mxu1 %v9997_v62  ;;  %v2980_v62 = vand.u32 4294901760, %v182_v48  ;;  %v10231_v0 = vsub.f32 %v195_v25, %v2129_v51  ;;  %v13578_v25 = vld [vmem:[#allocation14_spill] sm:$0xff] }
 0x115   : > { %7614 = vmatpush1.bf16.msra.mxu0 %v10003_v6  ;;  %v2984_v6 = vand.u32 4294901760, %v197_v18  ;;  %v10228_v36 = vsub.f32 %v180_v27, %v2125_v16 }
 0x116   : > { %7616 = vmatprep.subr.bf16.mxu0 %v10015_v39  ;;  %v181_v39 = vld [vmem:[#allocation5 + $0x30] sm:$0xff]  ;;  %13571 = vst [vmem:[#allocation37_spill] sm:$0xff] %v10231_v0  ;;  %v10237_v27 = vsub.f32 %v182_v48, %v2980_v62 }
 0x117   : > { %7806 = vmatpush1.bf16.msra.mxu1 %v10009_v11  ;;  %v196_v11 = vld [vmem:[#allocation5 + $0xa8] sm:$0xff]  ;;  %13569 = vst [vmem:[#allocation33_spill] sm:$0xff] %v10228_v36  ;;  %v2982_v57 = vand.u32 4294901760, %v181_v39 }
 0x118   : > { %7808 = vmatprep.subr.bf16.mxu1 %v10021_v32  ;;  %v2127_v32 = vand.u32 4294901760, %v179_v4  ;;  %13575 = vst [vmem:[#allocation42_spill] sm:$0xff] %v10237_v27  ;;  %v13597_v27 = vld [vmem:[#allocation35_spill] sm:$0xff] }
 0x119   : > { %7618 = vmatpush1.bf16.msra.mxu0 %v10027_v17  ;;  %v2131_v17 = vand.u32 4294901760, %v194_v23  ;;  %v10250_v48 = vsub.f32 %v181_v39, %v2982_v57  ;;  %v10261_v39 = vsub.f32 %v225_v21, %v2137_v29 }
 0x11a   : > { %7620 = vmatprep.subr.bf16.mxu0 %v10039_v2  ;;  %v10226_v2 = vpack.c.bf16 %v2129_v51, %v2125_v16  ;;  %v10239_v16 = vsub.f32 %v197_v18, %v2984_v6  ;;  %v10244_v51 = vsub.f32 %v179_v4, %v2127_v32  ;;  %v2135_v18 = vand.u32 4294901760, %v209_v41 }
 0x11b   : > { %7810 = vmatpush1.bf16.msra.mxu1 %v10033_v40  ;;  %v2986_v40 = vand.u32 4294901760, %v196_v11  ;;  %13582 = vst [vmem:[#allocation51_spill] sm:$0xff] %v10250_v48  ;;  %v2990_v4 = vand.u32 4294901760, %v211_v52  ;;  %13589 = vst [vmem:[#allocation67_spill] sm:$0xff] %v10261_v39  ;;  %v239_v48 = vld [vmem:[#allocation5 + $0x200] sm:$0xff]  ;;  %v270_v39 = vld [vmem:[#allocation5 + $0x2f8] sm:$0xff] }
 0x11c   : > { %7812 = vmatprep.subr.bf16.mxu1 %v10045_v37  ;;  %13568 = vst [vmem:[#allocation32_spill] sm:$0xff] %v10226_v2  ;;  %v10233_v37 = vpack.c.bf16 %v2984_v6, %v2980_v62  ;;  %13576 = vst [vmem:[#allocation44_spill] sm:$0xff] %v10239_v16  ;;  %v10241_v2 = vpack.c.bf16 %v2131_v17, %v2127_v32  ;;  %v2139_v62 = vand.u32 4294901760, %v224_v59  ;;  %v13583_v6 = vld [vmem:[#allocation59_spill] sm:$0xff] }
 0x11d   : > { %7622 = vmatpush1.bf16.msra.mxu0 %v13566_v44  ;;  %v2133_v44 = vand.u32 4294901760, %v210_v9  ;;  %13579 = vst [vmem:[#allocation47_spill] sm:$0xff] %v10244_v51  ;;  %v10248_v19 = vpack.c.bf16 %v2986_v40, %v2982_v57  ;;  %v2141_v57 = vand.u32 4294901760, %v240_v5  ;;  %v10270_v16 = vsub.f32 %v209_v41, %v2135_v18 }
 0x11e   : > { %7624 = vmatprep.subr.bf16.mxu0 %v13567_v46  ;;  %13572 = vst [vmem:[#allocation41_spill] sm:$0xff] %v10233_v37  ;;  %v13574_v46 = vld [vmem:[#allocation57_spill] sm:$0xff]  ;;  %13577 = vst [vmem:[#allocation45_spill] sm:$0xff] %v10241_v2  ;;  %v10246_v37 = vsub.f32 %v194_v23, %v2131_v17  ;;  %v242_v23 = vld [vmem:[#allocation5 + $0x218] sm:$0xff] }
 0x11f   : > { %7814 = vmatpush1.bf16.msra.mxu1 %v13570_v43  ;;  %v226_v43 = vld [vmem:[#allocation5 + $0x198] sm:$0xff]  ;;  %13581 = vst [vmem:[#allocation49_spill] sm:$0xff] %v10248_v19  ;;  %v10255_v2 = vpack.c.bf16 %v2137_v29, %v2133_v44  ;;  %v257_v17 = vld [vmem:[#allocation5 + $0x290] sm:$0xff]  ;;  %v10259_v51 = vsub.f32 %v210_v9, %v2133_v44  ;;  %13594 = vst [vmem:[#allocation74_spill] sm:$0xff] %v10270_v16  ;;  %v10272_v9 = vpack.c.bf16 %v2139_v62, %v2135_v18 }
 0x120   : > { %7816 = vmatprep.subr.bf16.mxu1 %v13573_v30  ;;  %13580 = vst [vmem:[#allocation48_spill] sm:$0xff] %v10246_v37  ;;  %v255_v30 = vld [vmem:[#allocation5 + $0x280] sm:$0xff]  ;;  %v2994_v32 = vand.u32 4294901760, %v226_v43  ;;  %v13587_v37 = vld [vmem:[#allocation18_spill] sm:$0xff]  ;;  %v10274_v29 = vsub.f32 %v224_v59, %v2139_v62  ;;  %v2996_v21 = vand.u32 4294901760, %v242_v23  ;;  %v3000_v44 = vand.u32 4294901760, %v257_v17 }
 0x121   : > { %7626 = vmatpush1.bf16.msra.mxu0 %v13574_v46  ;;  %v10253_v46 = vsub.f32 %v196_v11, %v2986_v40  ;;  %13585 = vst [vmem:[#allocation61_spill] sm:$0xff] %v10255_v2  ;;  %13588 = vst [vmem:[#allocation66_spill] sm:$0xff] %v10259_v51  ;;  %v2145_v19 = vand.u32 4294901760, %v255_v30  ;;  %v13590_v11 = vld [vmem:[#allocation36_spill] sm:$0xff]  ;;  %v10264_v40 = vpack.c.bf16 %v2992_v31, %v2988_v54  ;;  %v285_v51 = vld [vmem:[#allocation5 + $0x370] sm:$0xff] }
 0x122   : > { %7628 = vmatprep.subr.bf16.mxu0 %v13578_v25  ;;  %v13586_v25 = vld [vmem:[#allocation16_spill] sm:$0xff]  ;;  %v10266_v2 = vsub.f32 %v212_v50, %v2988_v54  ;;  %13595 = vst [vmem:[#allocation75_spill] sm:$0xff] %v10272_v9  ;;  %13596 = vst [vmem:[#allocation11_spill] sm:$0xff] %v10274_v29  ;;  %v10279_v54 = vsub.f32 %v211_v52, %v2990_v4  ;;  %v10283_v41 = vsub.f32 %v226_v43, %v2994_v32  ;;  %v272_v62 = vld [vmem:[#allocation5 + $0x308] sm:$0xff] }
 0x123   : > { %7818 = vmatpush1.bf16.msra.mxu1 %v13583_v6  ;;  %13584 = vst [vmem:[#allocation60_spill] sm:$0xff] %v10253_v46  ;;  %v254_v6 = vld [vmem:[#allocation5 + $0x278] sm:$0xff]  ;;  %13591 = vst [vmem:[#allocation69_spill] sm:$0xff] %v10264_v40  ;;  %v10268_v46 = vsub.f32 %v227_v13, %v2992_v31  ;;  %v2143_v31 = vand.u32 4294901760, %v239_v48  ;;  %v10285_v59 = vpack.c.bf16 %v2145_v19, %v2141_v57  ;;  %v287_v9 = vld [vmem:[#allocation5 + $0x380] sm:$0xff] }
 0x124   : > { %7820 = vmatprep.subr.bf16.mxu1 %v13586_v25  ;;  %13592 = vst [vmem:[#allocation71_spill] sm:$0xff] %v10266_v2  ;;  %v241_v25 = vld [vmem:[#allocation5 + $0x210] sm:$0xff]  ;;  %13599 = vst [vmem:[#allocation17_spill] sm:$0xff] %v10279_v54  ;;  %v2147_v50 = vand.u32 4294901760, %v254_v6  ;;  %v10290_v52 = vsub.f32 %v255_v30, %v2145_v19  ;;  %v10292_v54 = vpack.c.bf16 %v3000_v44, %v2996_v21  ;;  %v3004_v30 = vand.u32 4294901760, %v272_v62 }
 0x125   : > { %7630 = vmatpush1.bf16.msra.mxu0 %v13587_v37  ;;  %13593 = vst [vmem:[#allocation72_spill] sm:$0xff] %v10268_v46  ;;  %v256_v37 = vld [vmem:[#allocation5 + $0x288] sm:$0xff]  ;;  %13600 = vst [vmem:[#allocation20_spill] sm:$0xff] %v10283_v41  ;;  %v2998_v13 = vand.u32 4294901760, %v241_v25  ;;  %v269_v40 = vld [vmem:[#allocation5 + $0x2f0] sm:$0xff]  ;;  %v10296_v43 = vsub.f32 %v257_v17, %v3000_v44 }
 0x126   : > { %7632 = vmatprep.subr.bf16.mxu0 %v13590_v11  ;;  %v10277_v11 = vpack.c.bf16 %v2994_v32, %v2990_v4  ;;  %13601 = vst [vmem:[#allocation19_spill] sm:$0xff] %v10285_v59  ;;  %v3002_v18 = vand.u32 4294901760, %v256_v37  ;;  %13603 = vst [vmem:[#allocation22_spill] sm:$0xff] %v10290_v52  ;;  %v2149_v4 = vand.u32 4294901760, %v270_v39  ;;  %v10298_v32 = vsub.f32 %v239_v48, %v2143_v31  ;;  %v271_v59 = vld [vmem:[#allocation5 + $0x300] sm:$0xff]  ;;  %v286_v41 = vld [vmem:[#allocation5 + $0x378] sm:$0xff] }
 0x127   : > { %7822 = vmatpush1.bf16.msra.mxu1 %v13597_v27  ;;  %v10288_v27 = vsub.f32 %v240_v5, %v2141_v57  ;;  %13604 = vst [vmem:[#allocation24_spill] sm:$0xff] %v10292_v54  ;;  %13606 = vst [vmem:[#allocation25_spill] sm:$0xff] %v10296_v43  ;;  %v10302_v19 = vpack.c.bf16 %v2147_v50, %v2143_v31  ;;  %v10304_v5 = vsub.f32 %v254_v6, %v2147_v50  ;;  %v300_v52 = vld [vmem:[#allocation5 + $0x3e8] sm:$0xff]  ;;  %v315_v54 = vld [vmem:[#allocation5 + $0x460] sm:$0xff] }
 0x128   : > { %13598 = vst [vmem:[#allocation15_spill] sm:$0xff] %v10277_v11  ;;  %7824 = vmatprep.subr.bf16.mxu1 %v10117_v34  ;;  %v2153_v11 = vand.u32 4294901760, %v285_v51  ;;  %v284_v34 = vld [vmem:[#allocation5 + $0x368] sm:$0xff]  ;;  %13607 = vst [vmem:[#allocation26_spill] sm:$0xff] %v10298_v32  ;;  %v3008_v57 = vand.u32 4294901760, %v287_v9  ;;  %v10308_v48 = vpack.c.bf16 %v3002_v18, %v2998_v13  ;;  %v2151_v17 = vand.u32 4294901760, %v269_v40 }
 0x129   : > { %7634 = vmatpush1.bf16.msra.mxu0 %v10123_v53  ;;  %13602 = vst [vmem:[#allocation21_spill] sm:$0xff] %v10288_v27  ;;  %v10294_v53 = vsub.f32 %v242_v23, %v2996_v21  ;;  %13609 = vst [vmem:[#allocation28_spill] sm:$0xff] %v10302_v19  ;;  %v10310_v23 = vsub.f32 %v241_v25, %v2998_v13  ;;  %v10314_v6 = vsub.f32 %v256_v37, %v3002_v18  ;;  %v302_v50 = vld [vmem:[#allocation5 + $0x3f8] sm:$0xff] }
 0x12a   : > { %7636 = vmatprep.subr.bf16.mxu0 %v13528_v1  ;;  %v13608_v1 = vld [vmem:[#allocation76_spill] sm:$0xff]  ;;  %13610 = vst [vmem:[#allocation27_spill] sm:$0xff] %v10304_v5  ;;  %13611 = vst [vmem:[#allocation29_spill] sm:$0xff] %v10308_v48  ;;  %v10316_v21 = vpack.c.bf16 %v2153_v11, %v2149_v4  ;;  %v3006_v44 = vand.u32 4294901760, %v271_v59  ;;  %v3010_v31 = vand.u32 4294901760, %v286_v41  ;;  %v10321_v25 = vsub.f32 %v285_v51, %v2153_v11 }
 0x12b   : > { %13605 = vst [vmem:[#allocation23_spill] sm:$0xff] %v10294_v53  ;;  %7826 = vmatpush1.bf16.msra.mxu1 %v10131_v42  ;;  %13612 = vst [vmem:[#allocation30_spill] sm:$0xff] %v10310_v23  ;;  %v2155_v42 = vand.u32 4294901760, %v284_v34  ;;  %v2157_v13 = vand.u32 4294901760, %v300_v52  ;;  %v2161_v48 = vand.u32 4294901760, %v315_v54  ;;  %v10327_v37 = vsub.f32 %v272_v62, %v3004_v30  ;;  %v314_v19 = vld [vmem:[#allocation5 + $0x458] sm:$0xff] }
 0x12c   : > { %1160 = vmatmul.mubr.f32.vlgmr.msra.gmra.mrb[0].mxu0 %v13608_v1  ;;  %7828 = vmatprep.subr.bf16.mxu1 %v13530_v55  ;;  %13613 = vst [vmem:[#allocation34_spill] sm:$0xff] %v10314_v6  ;;  %13614 = vst [vmem:[#allocation31_spill] sm:$0xff] %v10316_v21  ;;  %v317_v55 = vld [vmem:[#allocation5 + $0x470] sm:$0xff]  ;;  %v10329_v18 = vsub.f32 %v287_v9, %v3008_v57  ;;  %v299_v21 = vld [vmem:[#allocation5 + $0x3e0] sm:$0xff]  ;;  %v10340_v62 = vpack.c.bf16 %v3010_v31, %v3006_v44 }
 0x12d   : > { %7638 = vmatpush1.bf16.msra.mxu0 %v13531_v3  ;;  %1262 = vmatprep.mubr.f32.mxu0 %v13434_v7  ;;  %v10319_v3 = vsub.f32 %v270_v39, %v2149_v4  ;;  %13616 = vst [vmem:[#allocation40_spill] sm:$0xff] %v10321_v25  ;;  %13618 = vst [vmem:[#allocation43_spill] sm:$0xff] %v10327_v37  ;;  %v301_v6 = vld [vmem:[#allocation5 + $0x3f0] sm:$0xff]  ;;  %v10333_v51 = vpack.c.bf16 %v2155_v42, %v2151_v17  ;;  %v3016_v11 = vand.u32 4294901760, %v317_v55  ;;  %v316_v4 = vld [vmem:[#allocation5 + $0x468] sm:$0xff] }
 0x12e   : > { %7640 = vmatprep.subr.bf16.mxu0 %v13532_v33  ;;  %2015 = vmatmul.mubr.f32.vlgmr.msra.gmra.mrb[0].mxu1 %v13608_v1  ;;  %v10325_v33 = vpack.c.bf16 %v3008_v57, %v3004_v30  ;;  %13619 = vst [vmem:[#allocation50_spill] sm:$0xff] %v10329_v18  ;;  %v10335_v39 = vsub.f32 %v269_v40, %v2151_v17  ;;  %v330_v25 = vld [vmem:[#allocation5 + $0x4d8] sm:$0xff]  ;;  %13623 = vst [vmem:[#allocation13_spill] sm:$0xff] %v10340_v62  ;;  %v2159_v40 = vand.u32 4294901760, %v299_v21  ;;  %v347_v18 = vld [vmem:[#allocation5 + $0x560] sm:$0xff] }
 0x12f   : > { %13615 = vst [vmem:[#allocation38_spill] sm:$0xff] %v10319_v3  ;;  %7830 = vmatpush1.bf16.msra.mxu1 %v13533_v20  ;;  %2117 = vmatprep.mubr.f32.mxu1 %v13434_v7  ;;  %13620 = vst [vmem:[#allocation52_spill] sm:$0xff] %v10333_v51  ;;  %v3012_v20 = vand.u32 4294901760, %v302_v50  ;;  %v10338_v9 = vsub.f32 %v284_v34, %v2155_v42  ;;  %v10342_v30 = vsub.f32 %v271_v59, %v3006_v44  ;;  %v344_v62 = vld [vmem:[#allocation5 + $0x548] sm:$0xff] }
 0x130   : > { %13617 = vst [vmem:[#allocation46_spill] sm:$0xff] %v10325_v33  ;;  %7832 = vmatprep.subr.bf16.mxu1 %v13534_v47  ;;  %13621 = vst [vmem:[#allocation58_spill] sm:$0xff] %v10335_v39  ;;  %v345_v33 = vld [vmem:[#allocation5 + $0x550] sm:$0xff]  ;;  %v10344_v47 = vsub.f32 %v286_v41, %v3010_v31  ;;  %v10348_v57 = vsub.f32 %v300_v52, %v2157_v13  ;;  %v2163_v17 = vand.u32 4294901760, %v314_v19  ;;  %v332_v39 = vld [vmem:[#allocation5 + $0x4e8] sm:$0xff]  ;;  %v3014_v37 = vand.u32 4294901760, %v301_v6 }
 0x131   : > { %7642 = vmatpush1.bf16.msra.mxu0 %v13535_v49  ;;  %13622 = vst [vmem:[#allocation12_spill] sm:$0xff] %v10338_v9  ;;  %13624 = vst [vmem:[#allocation39_spill] sm:$0xff] %v10342_v30  ;;  %v10346_v49 = vpack.c.bf16 %v2161_v48, %v2157_v13  ;;  %v2165_v34 = vand.u32 4294901760, %v330_v25  ;;  %v2169_v42 = vand.u32 4294901760, %v345_v33  ;;  %v329_v9 = vld [vmem:[#allocation5 + $0x4d0] sm:$0xff]  ;;  %v10353_v41 = vsub.f32 %v315_v54, %v2161_v48  ;;  %v360_v48 = vld [vmem:[#allocation5 + $0x5c8] sm:$0xff] }
 0x132   : > { %7644 = vmatprep.subr.bf16.mxu0 %v13536_v56  ;;  %13625 = vst [vmem:[#allocation54_spill] sm:$0xff] %v10344_v47  ;;  %13627 = vst [vmem:[#allocation56_spill] sm:$0xff] %v10348_v57  ;;  %v3018_v56 = vand.u32 4294901760, %v316_v4  ;;  %v10355_v59 = vpack.c.bf16 %v3016_v11, %v3012_v20  ;;  %v10357_v52 = vsub.f32 %v302_v50, %v3012_v20  ;;  %v3020_v31 = vand.u32 4294901760, %v332_v39  ;;  %v331_v57 = vld [vmem:[#allocation5 + $0x4e0] sm:$0xff]  ;;  %v346_v47 = vld [vmem:[#allocation5 + $0x558] sm:$0xff] }
 0x133   : > { %13626 = vst [vmem:[#allocation53_spill] sm:$0xff] %v10346_v49  ;;  %7834 = vmatpush1.bf16.msra.mxu1 %v13537_v63  ;;  %13628 = vst [vmem:[#allocation57_spill] sm:$0xff] %v10353_v41  ;;  %v10360_v44 = vsub.f32 %v317_v55, %v3016_v11  ;;  %v10362_v63 = vsub.f32 %v299_v21, %v2159_v40  ;;  %v3024_v13 = vand.u32 4294901760, %v347_v18  ;;  %v2171_v54 = vand.u32 4294901760, %v344_v62  ;;  %v375_v41 = vld [vmem:[#allocation5 + $0x640] sm:$0xff]  ;;  %v362_v20 = vld [vmem:[#allocation5 + $0x5d8] sm:$0xff] }
 0x134   : > { %7836 = vmatprep.subr.bf16.mxu1 %v13538_v38  ;;  %13629 = vst [vmem:[#allocation14_spill] sm:$0xff] %v10355_v59  ;;  %v10364_v30 = vpack.c.bf16 %v2163_v17, %v2159_v40  ;;  %v10366_v38 = vsub.f32 %v314_v19, %v2163_v17  ;;  %v10369_v50 = vpack.c.bf16 %v3018_v56, %v3014_v37  ;;  %v377_v11 = vld [vmem:[#allocation5 + $0x650] sm:$0xff]  ;;  %v359_v40 = vld [vmem:[#allocation5 + $0x5c0] sm:$0xff]  ;;  %v2177_v59 = vand.u32 4294901760, %v375_v41 }
 0x135   : > { %7646 = vmatpush1.bf16.msra.mxu0 %v13539_v12  ;;  %v2167_v12 = vand.u32 4294901760, %v329_v9  ;;  %v10373_v21 = vsub.f32 %v316_v4, %v3018_v56  ;;  %v10375_v55 = vpack.c.bf16 %v2169_v42, %v2165_v34  ;;  %v10379_v19 = vsub.f32 %v330_v25, %v2165_v34 }
 0x136   : > { %7648 = vmatprep.subr.bf16.mxu0 %v13540_v15  ;;  %13630 = vst [vmem:[#allocation59_spill] sm:$0xff] %v10364_v30  ;;  %13631 = vst [vmem:[#allocation16_spill] sm:$0xff] %v10369_v50  ;;  %v10371_v15 = vsub.f32 %v301_v6, %v3014_v37  ;;  %v10381_v17 = vsub.f32 %v345_v33, %v2169_v42  ;;  %v3026_v30 = vand.u32 4294901760, %v346_v47  ;;  %v374_v50 = vld [vmem:[#allocation5 + $0x638] sm:$0xff]  ;;  %v361_v6 = vld [vmem:[#allocation5 + $0x5d0] sm:$0xff]  ;;  %v3028_v25 = vand.u32 4294901760, %v362_v20 }
 0x137   : > { %7838 = vmatpush1.bf16.msra.mxu1 %v13541_v35  ;;  %13632 = vst [vmem:[#allocation18_spill] sm:$0xff] %v10375_v55  ;;  %13633 = vst [vmem:[#allocation36_spill] sm:$0xff] %v10379_v19  ;;  %v3022_v35 = vand.u32 4294901760, %v331_v57  ;;  %v376_v37 = vld [vmem:[#allocation5 + $0x648] sm:$0xff]  ;;  %v10384_v4 = vpack.c.bf16 %v3024_v13, %v3020_v31  ;;  %v10386_v56 = vsub.f32 %v332_v39, %v3020_v31  ;;  %v2173_v55 = vand.u32 4294901760, %v360_v48 }
 0x138   : > { %7840 = vmatprep.subr.bf16.mxu1 %v13542_v45  ;;  %13634 = vst [vmem:[#allocation35_spill] sm:$0xff] %v10381_v17  ;;  %v10388_v45 = vsub.f32 %v347_v18, %v3024_v13  ;;  %v3032_v33 = vand.u32 4294901760, %v377_v11  ;;  %v2175_v34 = vand.u32 4294901760, %v359_v40  ;;  %v2179_v42 = vand.u32 4294901760, %v374_v50 }
 0x139   : > { %7650 = vmatpush1.bf16.msra.mxu0 %v13543_v22  ;;  %13635 = vst [vmem:[#allocation80_spill] sm:$0xff] %v10384_v4  ;;  %v10390_v22 = vpack.c.bf16 %v2171_v54, %v2167_v12  ;;  %v3030_v17 = vand.u32 4294901760, %v361_v6  ;;  %v3034_v19 = vand.u32 4294901760, %v376_v37  ;;  %v10397_v39 = vsub.f32 %v344_v62, %v2171_v54  ;;  %v390_v4 = vld [vmem:[#allocation5 + $0x6b8] sm:$0xff]  ;;  %v407_v54 = vld [vmem:[#allocation5 + $0x740] sm:$0xff] }
 0x13a   : > { %7652 = vmatprep.subr.bf16.mxu0 %v13544_v24  ;;  %13636 = vst [vmem:[#allocation81_spill] sm:$0xff] %v10388_v45  ;;  %v10395_v24 = vsub.f32 %v329_v9, %v2167_v12  ;;  %v10399_v18 = vpack.c.bf16 %v3026_v30, %v3022_v35  ;;  %v10402_v31 = vsub.f32 %v331_v57, %v3022_v35  ;;  %v392_v12 = vld [vmem:[#allocation5 + $0x6c8] sm:$0xff]  ;;  %v13662_v35 = vld [vmem:[#allocation63_spill] sm:$0xff] }
 0x13b   : > { %13637 = vst [vmem:[#allocation82_spill] sm:$0xff] %v10390_v22  ;;  %7842 = vmatpush1.bf16.msra.mxu1 %v13545_v8  ;;  %13639 = vst [vmem:[#allocation84_spill] sm:$0xff] %v10397_v39  ;;  %v10404_v13 = vsub.f32 %v346_v47, %v3026_v30  ;;  %v10406_v8 = vpack.c.bf16 %v2177_v59, %v2173_v55  ;;  %v10408_v22 = vsub.f32 %v360_v48, %v2173_v55 }
 0x13c   : > { %7844 = vmatprep.subr.bf16.mxu1 %v13546_v26  ;;  %13638 = vst [vmem:[#allocation83_spill] sm:$0xff] %v10395_v24  ;;  %13640 = vst [vmem:[#allocation85_spill] sm:$0xff] %v10399_v18  ;;  %v405_v26 = vld [vmem:[#allocation5 + $0x730] sm:$0xff]  ;;  %v10410_v45 = vsub.f32 %v375_v41, %v2177_v59  ;;  %v10414_v9 = vsub.f32 %v362_v20, %v3028_v25  ;;  %v10416_v62 = vsub.f32 %v377_v11, %v3032_v33  ;;  %v404_v20 = vld [vmem:[#allocation5 + $0x728] sm:$0xff] }
 0x13d   : > { %7654 = vmatpush1.bf16.msra.mxu0 %v13547_v60  ;;  %13641 = vst [vmem:[#allocation86_spill] sm:$0xff] %v10402_v31  ;;  %13642 = vst [vmem:[#allocation87_spill] sm:$0xff] %v10404_v13  ;;  %v10412_v60 = vpack.c.bf16 %v3032_v33, %v3028_v25  ;;  %v10421_v30 = vsub.f32 %v359_v40, %v2175_v34  ;;  %v10423_v47 = vsub.f32 %v374_v50, %v2179_v42  ;;  %v389_v41 = vld [vmem:[#allocation5 + $0x6b0] sm:$0xff]  ;;  %v391_v11 = vld [vmem:[#allocation5 + $0x6c0] sm:$0xff] }
 0x13e   : > { %7656 = vmatprep.subr.bf16.mxu0 %v13548_v10  ;;  %13643 = vst [vmem:[#allocation88_spill] sm:$0xff] %v10406_v8  ;;  %13644 = vst [vmem:[#allocation89_spill] sm:$0xff] %v10408_v22  ;;  %v10419_v10 = vpack.c.bf16 %v2179_v42, %v2175_v34  ;;  %v10425_v57 = vpack.c.bf16 %v3034_v19, %v3030_v17  ;;  %v10429_v59 = vsub.f32 %v361_v6, %v3030_v17  ;;  %v406_v50 = vld [vmem:[#allocation5 + $0x738] sm:$0xff]  ;;  %v13655_v25 = vld [vmem:[#allocation42_spill] sm:$0xff] }
 0x13f   : > { %13645 = vst [vmem:[#allocation90_spill] sm:$0xff] %v10410_v45  ;;  %13646 = vst [vmem:[#allocation91_spill] sm:$0xff] %v10412_v60  ;;  %7846 = vmatpush1.bf16.msra.mxu1 %v13549_v14  ;;  %v10431_v48 = vsub.f32 %v376_v37, %v3034_v19  ;;  %v2181_v14 = vand.u32 4294901760, %v390_v4  ;;  %v2185_v55 = vand.u32 4294901760, %v405_v26  ;;  %v3036_v17 = vand.u32 4294901760, %v392_v12  ;;  %v13658_v37 = vld [vmem:[#allocation55_spill] sm:$0xff] }
 0x140   : > { %13647 = vst [vmem:[#allocation92_spill] sm:$0xff] %v10414_v9  ;;  %13648 = vst [vmem:[#allocation93_spill] sm:$0xff] %v10416_v62  ;;  %7848 = vmatprep.subr.bf16.mxu1 %v13550_v28  ;;  %v13656_v28 = vld [vmem:[#allocation44_spill] sm:$0xff]  ;;  %v3040_v19 = vand.u32 4294901760, %v407_v54  ;;  %v2183_v6 = vand.u32 4294901760, %v389_v41  ;;  %v2187_v42 = vand.u32 4294901760, %v404_v20 }
 0x141   : > { %13649 = vst [vmem:[#allocation94_spill] sm:$0xff] %v10419_v10  ;;  %13650 = vst [vmem:[#allocation95_spill] sm:$0xff] %v10421_v30  ;;  %7658 = vmatpush1.bf16.msra.mxu0 %v13551_v58  ;;  %v10438_v58 = vsub.f32 %v390_v4, %v2181_v14  ;;  %v13659_v10 = vld [vmem:[#allocation47_spill] sm:$0xff]  ;;  %v13660_v60 = vld [vmem:[#allocation48_spill] sm:$0xff]  ;;  %v10445_v33 = vpack.c.bf16 %v2185_v55, %v2181_v14  ;;  %v3042_v34 = vand.u32 4294901760, %v406_v50 }
 0x142   : > { %13651 = vst [vmem:[#allocation96_spill] sm:$0xff] %v10423_v47  ;;  %13652 = vst [vmem:[#allocation97_spill] sm:$0xff] %v10425_v57  ;;  %7660 = vmatprep.subr.bf16.mxu0 %v13552_v61  ;;  %v3038_v57 = vand.u32 4294901760, %v391_v11  ;;  %v13661_v40 = vld [vmem:[#allocation62_spill] sm:$0xff]  ;;  %v13664_v4 = vld [vmem:[#allocation51_spill] sm:$0xff]  ;;  %v13668_v61 = vand.u32 4294901760, %v10231_v0  ;;  %v10468_v62 = vsub.f32 %v407_v54, %v3040_v19  ;;  %v10482_v54 = vsub.f32 %v389_v41, %v2183_v6 }
 0x143   : > { %13653 = vst [vmem:[#allocation98_spill] sm:$0xff] %v10429_v59  ;;  %13654 = vst [vmem:[#allocation99_spill] sm:$0xff] %v10431_v48  ;;  %7850 = vmatpush1.bf16.msra.mxu1 %v13658_v37  ;;  %v13665_v48 = vld [vmem:[#allocation60_spill] sm:$0xff]  ;;  %v13666_v47 = vld [vmem:[#allocation65_spill] sm:$0xff]  ;;  %v13667_v37 = vand.u32 4294901760, %v10228_v36  ;;  %v10464_v59 = vpack.c.bf16 %v3040_v19, %v3036_v17  ;;  %v10496_v41 = vsub.f32 %v404_v20, %v2187_v42 }
 0x144   : > { %13657 = vst [vmem:[#allocation100_spill] sm:$0xff] %v10438_v58  ;;  %7852 = vmatprep.subr.bf16.mxu1 %v13661_v40  ;;  %13663 = vst [vmem:[#allocation55_spill] sm:$0xff] %v10445_v33  ;;  %v2248_v18 = vsub.f32 %v10231_v0, %v13668_v61  ;;  %v13669_v40 = vand.u32 4294901760, %v13655_v25  ;;  %v10462_v33 = vsub.f32 %v405_v26, %v2185_v55  ;;  %v13674_v61 = vand.u32 4294901760, %v13659_v10  ;;  %v13676_v26 = vld [vmem:[#allocation66_spill] sm:$0xff]  ;;  %v13686_v20 = vld [vmem:[#allocation41_spill] sm:$0xff] }
 0x145   : > { %7662 = vmatpush1.bf16.msra.mxu0 %v13662_v35  ;;  %v2236_v30 = vsub.f32 %v10228_v36, %v13667_v37  ;;  %v13670_v35 = vand.u32 4294901760, %v13656_v28  ;;  %13671 = vst [vmem:[#allocation62_spill] sm:$0xff] %v10464_v59  ;;  %v13672_v37 = vld [vmem:[#allocation64_spill] sm:$0xff]  ;;  %v10471_v36 = vpack.c.bf16 %v2187_v42, %v2183_v6  ;;  %v10498_v6 = vpack.c.bf16 %v3042_v34, %v3038_v57 }
 0x146   : > { %7664 = vmatprep.subr.bf16.mxu0 %v13666_v47  ;;  %v3091_v14 = vsub.f32 %v13655_v25, %v13669_v40  ;;  %v10466_v47 = vsub.f32 %v392_v12, %v3036_v17  ;;  %v2242_v40 = vsub.f32 %v13659_v10, %v13674_v61  ;;  %v13675_v25 = vand.u32 4294901760, %v13660_v60  ;;  %v13678_v12 = vld [vmem:[#allocation70_spill] sm:$0xff]  ;;  %v13681_v10 = vld [vmem:[#allocation67_spill] sm:$0xff] }
 0x147   : > { %v3103_v58 = vsub.f32 %v13656_v28, %v13670_v35  ;;  %7854 = vmatpush1.bf16.msra.mxu1 %v13672_v37  ;;  %13673 = vst [vmem:[#allocation63_spill] sm:$0xff] %v10471_v36  ;;  %v13677_v28 = vld [vmem:[#allocation68_spill] sm:$0xff]  ;;  %v13679_v17 = vand.u32 4294901760, %v13664_v4  ;;  %v13680_v37 = vand.u32 4294901760, %v13665_v48  ;;  %v2237_v55 = vand.u32 4294901760, %v2236_v30  ;;  %13683 = vst [vmem:[#allocation65_spill] sm:$0xff] %v10498_v6 }
 0x148   : > { %v2254_v35 = vsub.f32 %v13660_v60, %v13675_v25  ;;  %7856 = vmatprep.subr.bf16.mxu1 %v13677_v28  ;;  %v13682_v60 = vld [vmem:[#allocation32_spill] sm:$0xff]  ;;  %v2249_v28 = vand.u32 4294901760, %v2248_v18  ;;  %v3092_v0 = vand.u32 4294901760, %v3091_v14  ;;  %v13684_v36 = vld [vmem:[#allocation73_spill] sm:$0xff]  ;;  %v2243_v25 = vand.u32 4294901760, %v2242_v40 }
 0x149   : > { %7666 = vmatpush1.bf16.msra.mxu0 %v13678_v12  ;;  %v10487_v19 = vsub.f32 %v13664_v4, %v13679_v17  ;;  %v10492_v61 = vsub.f32 %v13665_v48, %v13680_v37  ;;  %v3104_v12 = vand.u32 4294901760, %v3103_v58  ;;  %v12996_v17 = vand.u32 4294901760, %v10266_v2  ;;  %v13687_v58 = vld [vmem:[#allocation45_spill] sm:$0xff] }
 0x14a   : > { %7860 = vmatprep.subr.bf16.mxu0 %v13682_v60  ;;  %v10504_v37 = vsub.f32 %v391_v11, %v3038_v57  ;;  %v2255_v60 = vand.u32 4294901760, %v2254_v35  ;;  %v13685_v18 = vand.u32 4294901760, %v13676_v26  ;;  %v10511_v42 = vsub.f32 %v406_v50, %v3042_v34  ;;  %v13690_v11 = vld [vmem:[#allocation61_spill] sm:$0xff] }
 0x14b   : > { %7858 = vmatpush1.bf16.msra.mxu1 %v13684_v36  ;;  %v3098_v14 = vand.u32 4294901760, %v10487_v19  ;;  %v3110_v36 = vand.u32 4294901760, %v10492_v61  ;;  %v13689_v4 = vand.u32 4294901760, %v13681_v10  ;;  %v10520_v40 = vpack.c.bf16 %v2249_v28, %v2237_v55  ;;  %v13692_v61 = vld [vmem:[#allocation17_spill] sm:$0xff]  ;;  %v13693_v55 = vld [vmem:[#allocation20_spill] sm:$0xff] }
 0x14c   : > { %1264 = vmatmul.mubr.f32.vlgmr.msra.gmra.mrb[0].mxu0 %v13608_v1  ;;  %v2260_v30 = vsub.f32 %v13676_v26, %v13685_v18  ;;  %8052 = vmatprep.subr.bf16.mxu1 %v13686_v20  ;;  %13688 = vst [vmem:[#allocation64_spill] sm:$0xff] %v10511_v42  ;;  %v10522_v35 = vpack.c.bf16 %v3104_v12, %v3092_v0  ;;  %v13694_v0 = vld [vmem:[#allocation49_spill] sm:$0xff]  ;;  %v13756_v26 = vld [vmem:[#allocation95_spill] sm:$0xff] }
 0x14d   : > { %7862 = vmatpush1.bf16.msra.mxu0 %v13687_v58  ;;  %v2272_v57 = vsub.f32 %v13681_v10, %v13689_v4  ;;  %2221 = vmatprep.mubr.f32.mxu0 %v13434_v7  ;;  %v3115_v34 = vsub.f32 %v10266_v2, %v12996_v17  ;;  %v13691_v4 = vand.u32 4294901760, %v10268_v46  ;;  %v10537_v12 = vpack.c.bf16 %v2255_v60, %v2243_v25  ;;  %v13695_v58 = vld [vmem:[#allocation22_spill] sm:$0xff]  ;;  %v13696_v17 = vld [vmem:[#allocation69_spill] sm:$0xff]  ;;  %v13697_v2 = vld [vmem:[#allocation75_spill] sm:$0xff] }
 0x14e   : > { %7864 = vmatprep.subr.bf16.mxu0 %v13690_v11  ;;  %2119 = vmatmul.mubr.f32.vlgmr.msra.gmra.mrb[0].mxu1 %v13608_v1  ;;  %v2261_v50 = vand.u32 4294901760, %v2260_v30  ;;  %v13699_v60 = vand.u32 4294901760, %v10270_v16  ;;  %v13700_v30 = vand.u32 4294901760, %v10274_v29  ;;  %v13706_v11 = vld [vmem:[#allocation34_spill] sm:$0xff]  ;;  %v13763_v10 = vand.u32 4294901760, %v10408_v22 }
 0x14f   : > { %v3127_v19 = vsub.f32 %v10268_v46, %v13691_v4  ;;  %8054 = vmatpush1.bf16.msra.mxu1 %v13694_v0  ;;  %3076 = vmatprep.mubr.f32.mxu1 %v13434_v7  ;;  %v2273_v4 = vand.u32 4294901760, %v2272_v57  ;;  %v13698_v46 = vld [vmem:[#allocation19_spill] sm:$0xff]  ;;  %v3116_v18 = vand.u32 4294901760, %v3115_v34  ;;  %v13701_v0 = vand.u32 4294901760, %v13692_v61 }
 0x150   : > { %8056 = vmatprep.subr.bf16.mxu1 %v13696_v17  ;;  %v10550_v25 = vsub.f32 %v10270_v16, %v13699_v60  ;;  %v10555_v20 = vsub.f32 %v10274_v29, %v13700_v30  ;;  %v13703_v17 = vld [vmem:[#allocation15_spill] sm:$0xff]  ;;  %v13704_v30 = vand.u32 4294901760, %v10288_v27  ;;  %v13705_v34 = vand.u32 4294901760, %v13695_v58  ;;  %v13707_v29 = vld [vmem:[#allocation24_spill] sm:$0xff]  ;;  %v13735_v16 = vld [vmem:[#allocation81_spill] sm:$0xff] }
 0x151   : > { %7866 = vmatpush1.bf16.msra.mxu0 %v13697_v2  ;;  %v3128_v28 = vand.u32 4294901760, %v3127_v19  ;;  %v13702_v2 = vand.u32 4294901760, %v13693_v55  ;;  %v13772_v22 = vand.u32 4294901760, %v13756_v26 }
 0x152   : > { %7868 = vmatprep.subr.bf16.mxu0 %v13698_v46  ;;  %v10562_v46 = vsub.f32 %v13692_v61, %v13701_v0  ;;  %v10573_v57 = vsub.f32 %v10288_v27, %v13704_v30  ;;  %v10578_v19 = vsub.f32 %v13695_v58, %v13705_v34  ;;  %v13710_v30 = vand.u32 4294901760, %v10296_v43  ;;  %v13712_v61 = vld [vmem:[#allocation31_spill] sm:$0xff] }
 0x153   : > { %v10567_v60 = vsub.f32 %v13693_v55, %v13702_v2  ;;  %8058 = vmatpush1.bf16.msra.mxu1 %v13703_v17  ;;  %v13708_v2 = vld [vmem:[#allocation28_spill] sm:$0xff]  ;;  %v13709_v17 = vand.u32 4294901760, %v10294_v53  ;;  %v13711_v34 = vand.u32 4294901760, %v10298_v32  ;;  %v13713_v58 = vand.u32 4294901760, %v10304_v5 }
 0x154   : > { %8060 = vmatprep.subr.bf16.mxu1 %v13707_v29  ;;  %v10592_v27 = vsub.f32 %v10296_v43, %v13710_v30  ;;  %v10600_v29 = vpack.c.bf16 %v3110_v36, %v3098_v14  ;;  %v10614_v43 = vpack.c.bf16 %v3128_v28, %v3116_v18  ;;  %v13715_v36 = vld [vmem:[#allocation29_spill] sm:$0xff]  ;;  %v13718_v28 = vld [vmem:[#allocation46_spill] sm:$0xff]  ;;  %v13723_v14 = vld [vmem:[#allocation59_spill] sm:$0xff] }
 0x155   : > { %7870 = vmatpush1.bf16.msra.mxu0 %v13708_v2  ;;  %v10587_v55 = vsub.f32 %v10294_v53, %v13709_v17  ;;  %v10597_v0 = vsub.f32 %v10298_v32, %v13711_v34  ;;  %v10602_v2 = vpack.c.bf16 %v2273_v4, %v2261_v50  ;;  %v10607_v17 = vsub.f32 %v10304_v5, %v13713_v58  ;;  %v13724_v50 = vld [vmem:[#allocation43_spill] sm:$0xff]  ;;  %v13738_v58 = vld [vmem:[#allocation58_spill] sm:$0xff] }
 0x156   : > { %7872 = vmatprep.subr.bf16.mxu0 %v13712_v61  ;;  %v13714_v53 = vand.u32 4294901760, %v10310_v23  ;;  %v13716_v4 = vand.u32 4294901760, %v13706_v11  ;;  %v13726_v61 = vand.u32 4294901760, %v10362_v63  ;;  %v13729_v34 = vand.u32 4294901760, %v10371_v15 }
 0x157   : > { %8062 = vmatpush1.bf16.msra.mxu1 %v13715_v36  ;;  %v13719_v36 = vld [vmem:[#allocation13_spill] sm:$0xff]  ;;  %v13730_v32 = vand.u32 4294901760, %v10373_v21 }
 0x158   : > { %v10612_v30 = vsub.f32 %v10310_v23, %v13714_v53  ;;  %v10625_v5 = vsub.f32 %v13706_v11, %v13716_v4  ;;  %v13717_v53 = vand.u32 4294901760, %v10319_v3  ;;  %8064 = vmatprep.subr.bf16.mxu1 %v13718_v28  ;;  %v13025_v28 = vand.u32 4294901760, %v10360_v44  ;;  %v13725_v23 = vld [vmem:[#allocation50_spill] sm:$0xff] }
 0x159   : > { %7874 = vmatpush1.bf16.msra.mxu0 %v10333_v51  ;;  %v13722_v51 = vld [vmem:[#allocation14_spill] sm:$0xff]  ;;  %v13727_v4 = vand.u32 4294901760, %v10366_v38 }
 0x15a   : > { %v10630_v18 = vsub.f32 %v10319_v3, %v13717_v53  ;;  %7876 = vmatprep.subr.bf16.mxu0 %v10346_v49  ;;  %v13026_v53 = vand.u32 4294901760, %v10357_v52  ;;  %v13720_v49 = vld [vmem:[#allocation40_spill] sm:$0xff] }
 0x15b   : > { %8066 = vmatpush1.bf16.msra.mxu1 %v13719_v36  ;;  %v10665_v3 = vpack.c.bf16 %v13727_v4, %v13726_v61  ;;  %v13742_v61 = vand.u32 4294901760, %v10386_v56  ;;  %v13743_v4 = vand.u32 4294901760, %v13735_v16 }
 0x15c   : > { %v10655_v11 = vpack.c.bf16 %v13025_v28, %v13026_v53  ;;  %8068 = vmatprep.subr.bf16.mxu1 %v13722_v51  ;;  %v10671_v28 = vpack.c.bf16 %v13730_v32, %v13729_v34  ;;  %v13732_v53 = vld [vmem:[#allocation18_spill] sm:$0xff]  ;;  %v13734_v51 = vld [vmem:[#allocation35_spill] sm:$0xff]  ;;  %v13736_v32 = vld [vmem:[#allocation16_spill] sm:$0xff]  ;;  %v13737_v34 = vand.u32 4294901760, %v13720_v49 }
 0x15d   : > { %7878 = vmatpush1.bf16.msra.mxu0 %v13723_v14  ;;  %13728 = vst [vmem:[#allocation70_spill] sm:$0xff] %v10665_v3  ;;  %v13740_v48 = vand.u32 4294901760, %v13734_v51  ;;  %v10699_v3 = vpack.c.bf16 %v13743_v4, %v13742_v61  ;;  %v13752_v61 = vand.u32 4294901760, %v10402_v31  ;;  %v13753_v4 = vand.u32 4294901760, %v10404_v13  ;;  %v13769_v13 = vld [vmem:[#allocation91_spill] sm:$0xff] }
 0x15e   : > { %13721 = vst [vmem:[#allocation68_spill] sm:$0xff] %v10655_v11  ;;  %13731 = vst [vmem:[#allocation73_spill] sm:$0xff] %v10671_v28  ;;  %7880 = vmatprep.subr.bf16.mxu0 %v13732_v53  ;;  %v13733_v11 = vld [vmem:[#allocation36_spill] sm:$0xff]  ;;  %v10686_v14 = vsub.f32 %v13720_v49, %v13737_v34  ;;  %v13746_v53 = vld [vmem:[#allocation82_spill] sm:$0xff]  ;;  %v13747_v34 = vand.u32 4294901760, %v13724_v50 }
 0x15f   : > { %8070 = vmatpush1.bf16.msra.mxu1 %v13736_v32  ;;  %v13739_v36 = vand.u32 4294901760, %v13733_v11  ;;  %13744 = vst [vmem:[#allocation35_spill] sm:$0xff] %v10699_v3  ;;  %v13745_v32 = vld [vmem:[#allocation80_spill] sm:$0xff]  ;;  %v10719_v3 = vpack.c.bf16 %v13753_v4, %v13752_v61  ;;  %v13760_v61 = vld [vmem:[#allocation85_spill] sm:$0xff]  ;;  %v13761_v4 = vand.u32 4294901760, %v13725_v23 }
 0x160   : > { %8072 = vmatprep.subr.bf16.mxu1 %v13745_v32  ;;  %v10706_v28 = vsub.f32 %v13724_v50, %v13747_v34  ;;  %v13748_v49 = vld [vmem:[#allocation12_spill] sm:$0xff]  ;;  %v13755_v32 = vld [vmem:[#allocation93_spill] sm:$0xff]  ;;  %v13764_v50 = vand.u32 4294901760, %v10410_v45 }
 0x161   : > { %v10693_v1 = vpack.c.bf16 %v13740_v48, %v13739_v36  ;;  %7882 = vmatpush1.bf16.msra.mxu0 %v13746_v53  ;;  %v13749_v48 = vand.u32 4294901760, %v10395_v24  ;;  %v13750_v36 = vand.u32 4294901760, %v10397_v39  ;;  %13754 = vst [vmem:[#allocation101_spill] sm:$0xff] %v10719_v3  ;;  %v13759_v24 = vld [vmem:[#allocation99_spill] sm:$0xff]  ;;  %v3175_v53 = vsub.f32 %v13725_v23, %v13761_v4  ;;  %v13771_v23 = vld [vmem:[#allocation54_spill] sm:$0xff] }
 0x162   : > { %7884 = vmatprep.subr.bf16.mxu0 %v10406_v8  ;;  %v13762_v3 = vld [vmem:[#allocation39_spill] sm:$0xff]  ;;  %v10739_v8 = vpack.c.bf16 %v13764_v50, %v13763_v10  ;;  %v13767_v31 = vand.u32 4294901760, %v13755_v32  ;;  %v2321_v4 = vand.u32 4294901760, %v10686_v14  ;;  %v13782_v14 = vand.u32 4294901760, %v13748_v49 }
 0x163   : > { %13741 = vst [vmem:[#allocation36_spill] sm:$0xff] %v10693_v1  ;;  %v10713_v1 = vpack.c.bf16 %v13750_v36, %v13749_v48  ;;  %v13757_v48 = vld [vmem:[#allocation96_spill] sm:$0xff]  ;;  %8074 = vmatpush1.bf16.msra.mxu1 %v13760_v61  ;;  %v13766_v36 = vand.u32 4294901760, %v10414_v9  ;;  %v13770_v61 = vld [vmem:[#allocation94_spill] sm:$0xff] }
 0x164   : > { %13765 = vst [vmem:[#allocation93_spill] sm:$0xff] %v10739_v8  ;;  %8076 = vmatprep.subr.bf16.mxu1 %v13769_v13  ;;  %v13773_v45 = vand.u32 4294901760, %v13757_v48  ;;  %v13776_v8 = vand.u32 4294901760, %v13759_v24  ;;  %v2326_v34 = vsub.f32 %v13748_v49, %v13782_v14  ;;  %v13784_v48 = vand.u32 4294901760, %v10462_v33 }
 0x165   : > { %13751 = vst [vmem:[#allocation81_spill] sm:$0xff] %v10713_v1  ;;  %v13758_v1 = vld [vmem:[#allocation98_spill] sm:$0xff]  ;;  %v10745_v39 = vpack.c.bf16 %v13767_v31, %v13766_v36  ;;  %7886 = vmatpush1.bf16.msra.mxu0 %v13770_v61  ;;  %v13778_v36 = vld [vmem:[#allocation55_spill] sm:$0xff]  ;;  %v13800_v49 = vand.u32 4294901760, %v10562_v46  ;;  %v3164_v46 = vand.u32 4294901760, %v10706_v28 }
 0x166   : > { %v10755_v10 = vpack.c.bf16 %v13773_v45, %v13772_v22  ;;  %v13775_v50 = vand.u32 4294901760, %v13758_v1  ;;  %7888 = vmatprep.subr.bf16.mxu0 %v13778_v36  ;;  %v13786_v22 = vand.u32 4294901760, %v10466_v47  ;;  %v13791_v36 = vld [vmem:[#allocation56_spill] sm:$0xff] }
 0x167   : > { %13768 = vst [vmem:[#allocation95_spill] sm:$0xff] %v10745_v39  ;;  %v13779_v39 = vld [vmem:[#allocation100_spill] sm:$0xff] }
 0x168   : > { %13774 = vst [vmem:[#allocation98_spill] sm:$0xff] %v10755_v10  ;;  %v10761_v31 = vpack.c.bf16 %v13776_v8, %v13775_v50  ;;  %v13780_v8 = vld [vmem:[#allocation97_spill] sm:$0xff]  ;;  %v13781_v50 = vand.u32 4294901760, %v13738_v58  ;;  %v13783_v13 = vand.u32 4294901760, %v13779_v39  ;;  %v13787_v10 = vand.u32 4294901760, %v10468_v62 }
 0x169   : > { %8078 = vmatpush1.bf16.msra.mxu1 %v13780_v8  ;;  %v13789_v8 = vld [vmem:[#allocation63_spill] sm:$0xff] }
 0x16a   : > { %13777 = vst [vmem:[#allocation99_spill] sm:$0xff] %v10761_v31  ;;  %v2314_v61 = vsub.f32 %v13738_v58, %v13781_v50  ;;  %v10783_v31 = vpack.c.bf16 %v13784_v48, %v13783_v13  ;;  %v10789_v45 = vpack.c.bf16 %v13787_v10, %v13786_v22  ;;  %8080 = vmatprep.subr.bf16.mxu1 %v10464_v59  ;;  %v13790_v50 = vand.u32 4294901760, %v13762_v3 }
 0x16b   : > { %7890 = vmatpush1.bf16.msra.mxu0 %v13789_v8  ;;  %v13792_v58 = vand.u32 4294901760, %v10482_v54  ;;  %v13793_v13 = vand.u32 4294901760, %v10496_v41  ;;  %v13796_v10 = vand.u32 4294901760, %v10511_v42  ;;  %v13801_v59 = vand.u32 4294901760, %v10567_v60 }
 0x16c   : > { %13785 = vst [vmem:[#allocation54_spill] sm:$0xff] %v10783_v31  ;;  %13788 = vst [vmem:[#allocation100_spill] sm:$0xff] %v10789_v45  ;;  %v3169_v14 = vsub.f32 %v13762_v3, %v13790_v50  ;;  %v13795_v31 = vand.u32 4294901760, %v10504_v37  ;;  %7892 = vmatprep.subr.bf16.mxu0 %v10520_v40  ;;  %v13798_v45 = vand.u32 4294901760, %v10550_v25  ;;  %v13799_v50 = vand.u32 4294901760, %v10555_v20 }
 0x16d   : > { %v10801_v48 = vpack.c.bf16 %v13793_v13, %v13792_v58  ;;  %v8089_v3 = vpack.c.bf16 %v13801_v59, %v13800_v49  ;;  %v13802_v58 = vand.u32 4294901760, %v13771_v23  ;;  %v13805_v40 = vand.u32 4294901760, %v10578_v19  ;;  %8082 = vmatpush1.bf16.msra.mxu1 %v10498_v6  ;;  %v13808_v49 = vld [vmem:[#allocation79_spill] sm:$0xff] }
 0x16e   : > { %v10807_v22 = vpack.c.bf16 %v13796_v10, %v13795_v31  ;;  %v7897_v8 = vpack.c.bf16 %v13799_v50, %v13798_v45  ;;  %v13804_v31 = vand.u32 4294901760, %v10573_v57  ;;  %v13806_v25 = vand.u32 4294901760, %v10587_v55  ;;  %2227 = vmatmul.mubr.f32.vlgmr.msra.gmra.mrb[2].mxu0 %v13808_v49  ;;  %8084 = vmatprep.subr.bf16.mxu1 %v10522_v35 }
 0x16f   : > { %13794 = vst [vmem:[#allocation56_spill] sm:$0xff] %v10801_v48  ;;  %v3181_v13 = vsub.f32 %v13771_v23, %v13802_v58  ;;  %v13803_v48 = vld [vmem:[#allocation57_spill] sm:$0xff]  ;;  %v13807_v20 = vand.u32 4294901760, %v10592_v27  ;;  %v3176_v60 = vand.u32 4294901760, %v3175_v53  ;;  %v13809_v59 = vand.u32 4294901760, %v10597_v0  ;;  %7894 = vmatpush1.bf16.msra.mxu0 %v10537_v12  ;;  %2457 = vmatprep.mubr.f32.mxu0 %v13434_v7 }
 0x170   : > { %13797 = vst [vmem:[#allocation102_spill] sm:$0xff] %v10807_v22  ;;  %v13058_v42 = vand.u32 4294901760, %v13803_v48  ;;  %v7899_v10 = vpack.c.bf16 %v13805_v40, %v13804_v31  ;;  %v13810_v50 = vand.u32 4294901760, %v10607_v17  ;;  %v13811_v19 = vand.u32 4294901760, %v10612_v30  ;;  %7896 = vmatprep.subr.bf16.mxu0 %v10602_v2  ;;  %3082 = vmatmul.mubr.f32.vlgmr.msra.gmra.mrb[2].mxu1 %v13808_v49  ;;  %v13825_v49 = vld [vmem:[#allocation83_spill] sm:$0xff] }
 0x171   : > { %v8091_v45 = vpack.c.bf16 %v13807_v20, %v13806_v25  ;;  %v13812_v58 = vand.u32 4294901760, %v10625_v5  ;;  %v13813_v27 = vand.u32 4294901760, %v10630_v18  ;;  %v2315_v28 = vand.u32 4294901760, %v2314_v61  ;;  %8086 = vmatpush1.bf16.msra.mxu1 %v10600_v29  ;;  %3312 = vmatprep.mubr.f32.mxu1 %v13434_v7 }
 0x172   : > { %v7901_v57 = vpack.c.bf16 %v13810_v50, %v13809_v59  ;;  %v2327_v53 = vand.u32 4294901760, %v2326_v34  ;;  %v3170_v40 = vand.u32 4294901760, %v3169_v14  ;;  %v13814_v0 = vand.u32 4294901760, %v13791_v36  ;;  %8088 = vmatprep.subr.bf16.mxu1 %v10614_v43 }
 0x173   : > { %v8093_v55 = vpack.c.bf16 %v13812_v58, %v13811_v19  ;;  %v7903_v31 = vpack.c.bf16 %v2321_v4, %v13813_v27  ;;  %v3182_v30 = vand.u32 4294901760, %v3181_v13  ;;  %v2344_v5 = vsub.f32 %v13803_v48, %v13058_v42  ;;  %7898 = vmatpush1.bf16.msra.mxu0 %v7897_v8 }
 0x174   : > { %v2332_v17 = vsub.f32 %v13791_v36, %v13814_v0  ;;  %v13815_v18 = vand.u32 4294901760, %v10357_v52  ;;  %v13816_v12 = vand.u32 4294901760, %v10360_v44  ;;  %v8095_v61 = vpack.c.bf16 %v3176_v60, %v3164_v46  ;;  %7900 = vmatprep.subr.bf16.mxu0 %v7899_v10 }
 0x175   : > { %v13817_v2 = vand.u32 4294901760, %v10362_v63  ;;  %v13818_v14 = vand.u32 4294901760, %v10366_v38  ;;  %v13819_v25 = vand.u32 4294901760, %v10371_v15  ;;  %v13820_v59 = vand.u32 4294901760, %v10373_v21  ;;  %8090 = vmatpush1.bf16.msra.mxu1 %v8089_v3  ;;  %v13833_v3 = vld [vmem:[#allocation89_spill] sm:$0xff] }
 0x176   : > { %v3187_v35 = vsub.f32 %v10357_v52, %v13815_v18  ;;  %v3199_v34 = vsub.f32 %v10360_v44, %v13816_v12  ;;  %v13821_v46 = vand.u32 4294901760, %v13733_v11  ;;  %v13822_v19 = vand.u32 4294901760, %v13734_v51  ;;  %8092 = vmatprep.subr.bf16.mxu1 %v8091_v45 }
 0x177   : > { %v2338_v4 = vsub.f32 %v10362_v63, %v13817_v2  ;;  %v2350_v13 = vsub.f32 %v10366_v38, %v13818_v14  ;;  %v3193_v20 = vsub.f32 %v10371_v15, %v13819_v25  ;;  %v3205_v50 = vsub.f32 %v10373_v21, %v13820_v59  ;;  %7902 = vmatpush1.bf16.msra.mxu0 %v7901_v57 }
 0x178   : > { %v2356_v60 = vsub.f32 %v13733_v11, %v13821_v46  ;;  %v2368_v58 = vsub.f32 %v13734_v51, %v13822_v19  ;;  %v7905_v27 = vpack.c.bf16 %v2327_v53, %v2315_v28  ;;  %v2333_v0 = vand.u32 4294901760, %v2332_v17  ;;  %v13827_v28 = vld [vmem:[#allocation84_spill] sm:$0xff]  ;;  %7904 = vmatprep.subr.bf16.mxu0 %v7903_v31 }
 0x179   : > { %v13823_v29 = vand.u32 4294901760, %v10386_v56  ;;  %v13824_v12 = vand.u32 4294901760, %v13735_v16  ;;  %v8097_v14 = vpack.c.bf16 %v3182_v30, %v3170_v40  ;;  %v2345_v25 = vand.u32 4294901760, %v2344_v5  ;;  %v13829_v30 = vld [vmem:[#allocation86_spill] sm:$0xff]  ;;  %8094 = vmatpush1.bf16.msra.mxu1 %v8093_v55 }
 0x17a   : > { %v3188_v59 = vand.u32 4294901760, %v3187_v35  ;;  %v3200_v46 = vand.u32 4294901760, %v3199_v34  ;;  %v2339_v19 = vand.u32 4294901760, %v2338_v4  ;;  %v2351_v42 = vand.u32 4294901760, %v2350_v13  ;;  %v13831_v34 = vld [vmem:[#allocation87_spill] sm:$0xff]  ;;  %8096 = vmatprep.subr.bf16.mxu1 %v8095_v61 }
 0x17b   : > { %v3211_v18 = vsub.f32 %v10386_v56, %v13823_v29  ;;  %v3223_v2 = vsub.f32 %v13735_v16, %v13824_v12  ;;  %v13826_v43 = vand.u32 4294901760, %v13825_v49  ;;  %v13828_v53 = vand.u32 4294901760, %v13827_v28  ;;  %7906 = vmatpush1.bf16.msra.mxu0 %v7905_v27 }
 0x17c   : > { %v3194_v29 = vand.u32 4294901760, %v3193_v20  ;;  %v3206_v22 = vand.u32 4294901760, %v3205_v50  ;;  %v2357_v6 = vand.u32 4294901760, %v2356_v60  ;;  %v2369_v12 = vand.u32 4294901760, %v2368_v58  ;;  %v13835_v60 = vld [vmem:[#allocation90_spill] sm:$0xff] }
 0x17d   : > { %v2362_v8 = vsub.f32 %v13825_v49, %v13826_v43  ;;  %v2374_v17 = vsub.f32 %v13827_v28, %v13828_v53  ;;  %v3212_v10 = vand.u32 4294901760, %v3211_v18  ;;  %v3224_v40 = vand.u32 4294901760, %v3223_v2  ;;  %8098 = vmatpush1.bf16.msra.mxu1 %v8097_v14 }
 0x17e   : > { %v13830_v5 = vand.u32 4294901760, %v13829_v30  ;;  %v13832_v4 = vand.u32 4294901760, %v13831_v34  ;;  %v7907_v43 = vpack.c.bf16 %v2345_v25, %v2333_v0  ;;  %v8099_v53 = vpack.c.bf16 %v3200_v46, %v3188_v59 }
 0x17f   : > { %v13834_v20 = vand.u32 4294901760, %v13833_v3  ;;  %v13836_v45 = vand.u32 4294901760, %v13835_v60  ;;  %v2363_v58 = vand.u32 4294901760, %v2362_v8  ;;  %v2375_v18 = vand.u32 4294901760, %v2374_v17 }
 0x180   : > { %v3217_v35 = vsub.f32 %v13829_v30, %v13830_v5  ;;  %v3229_v13 = vsub.f32 %v13831_v34, %v13832_v4  ;;  %v13837_v2 = vand.u32 4294901760, %v10414_v9  ;;  %v13838_v30 = vand.u32 4294901760, %v13755_v32  ;;  %v13840_v4 = vld [vmem:[#allocation96_spill] sm:$0xff]  ;;  %7908 = vmatprep.subr.bf16.mxu0 %v7907_v43  ;;  %8100 = vmatprep.subr.bf16.mxu1 %v8099_v53 }
 0x181   : > { %v2380_v50 = vsub.f32 %v13833_v3, %v13834_v20  ;;  %v2392_v57 = vsub.f32 %v13835_v60, %v13836_v45  ;;  %v7909_v0 = vpack.c.bf16 %v2351_v42, %v2339_v19  ;;  %v8101_v25 = vpack.c.bf16 %v3206_v22, %v3194_v29 }
 0x182   : > { %v3235_v5 = vsub.f32 %v10414_v9, %v13837_v2  ;;  %v3247_v31 = vsub.f32 %v13755_v32, %v13838_v30  ;;  %v13839_v59 = vand.u32 4294901760, %v13756_v26  ;;  %v13841_v20 = vand.u32 4294901760, %v13840_v4 }
 0x183   : > { %v7911_v17 = vpack.c.bf16 %v2369_v12, %v2357_v6  ;;  %v8103_v45 = vpack.c.bf16 %v3224_v40, %v3212_v10  ;;  %v3218_v2 = vand.u32 4294901760, %v3217_v35  ;;  %v3230_v9 = vand.u32 4294901760, %v3229_v13  ;;  %7910 = vmatpush1.bf16.msra.mxu0 %v7909_v0  ;;  %8102 = vmatpush1.bf16.msra.mxu1 %v8101_v25 }
 0x184   : > { %v2386_v46 = vsub.f32 %v13756_v26, %v13839_v59  ;;  %v2398_v8 = vsub.f32 %v13840_v4, %v13841_v20  ;;  %v2381_v34 = vand.u32 4294901760, %v2380_v50  ;;  %v2393_v30 = vand.u32 4294901760, %v2392_v57 }
 0x185   : > { %v13842_v42 = vand.u32 4294901760, %v13779_v39  ;;  %v13843_v55 = vand.u32 4294901760, %v10462_v33  ;;  %v7913_v29 = vpack.c.bf16 %v2375_v18, %v2363_v58  ;;  %v3236_v59 = vand.u32 4294901760, %v3235_v5  ;;  %7912 = vmatprep.subr.bf16.mxu0 %v7911_v17  ;;  %8104 = vmatprep.subr.bf16.mxu1 %v8103_v45 }
 0x186   : > { %v3248_v20 = vand.u32 4294901760, %v3247_v31  ;;  %v13844_v61 = vand.u32 4294901760, %v13758_v1  ;;  %v2387_v27 = vand.u32 4294901760, %v2386_v46  ;;  %v2399_v12 = vand.u32 4294901760, %v2398_v8 }
 0x187   : > { %v2404_v22 = vsub.f32 %v13779_v39, %v13842_v42  ;;  %v2416_v19 = vsub.f32 %v10462_v33, %v13843_v55  ;;  %v13845_v10 = vand.u32 4294901760, %v13759_v24  ;;  %v13846_v35 = vand.u32 4294901760, %v10466_v47  ;;  %7914 = vmatpush1.bf16.msra.mxu0 %v7913_v29  ;;  %v13855_v29 = vld [vmem:[#allocation42_spill] sm:$0xff] }
 0x188   : > { %v3241_v6 = vsub.f32 %v13758_v1, %v13844_v61  ;;  %v13847_v43 = vand.u32 4294901760, %v10468_v62  ;;  %v13848_v57 = vand.u32 4294901760, %v10482_v54  ;;  %v13849_v58 = vand.u32 4294901760, %v10496_v41 }
 0x189   : > { %v3253_v40 = vsub.f32 %v13759_v24, %v13845_v10  ;;  %v3259_v13 = vsub.f32 %v10466_v47, %v13846_v35  ;;  %v7915_v5 = vpack.c.bf16 %v2393_v30, %v2381_v34  ;;  %v2405_v31 = vand.u32 4294901760, %v2404_v22  ;;  %v13851_v35 = vld [vmem:[#allocation64_spill] sm:$0xff] }
 0x18a   : > { %v3271_v50 = vsub.f32 %v10468_v62, %v13847_v43  ;;  %v2410_v14 = vsub.f32 %v10482_v54, %v13848_v57  ;;  %v2422_v18 = vsub.f32 %v10496_v41, %v13849_v58  ;;  %v2417_v46 = vand.u32 4294901760, %v2416_v19 }
 0x18b   : > { %v8105_v8 = vpack.c.bf16 %v3230_v9, %v3218_v2  ;;  %v8107_v42 = vpack.c.bf16 %v3248_v20, %v3236_v59  ;;  %v3242_v53 = vand.u32 4294901760, %v3241_v6  ;;  %v7917_v0 = vpack.c.bf16 %v2399_v12, %v2387_v27  ;;  %7916 = vmatprep.subr.bf16.mxu0 %v7915_v5  ;;  %v13853_v6 = vld [vmem:[#allocation33_spill] sm:$0xff]  ;;  %v13860_v5 = vld [vmem:[#allocation67_spill] sm:$0xff] }
 0x18c   : > { %v3254_v55 = vand.u32 4294901760, %v3253_v40  ;;  %v13850_v61 = vand.u32 4294901760, %v10504_v37  ;;  %v13852_v43 = vand.u32 4294901760, %v13851_v35  ;;  %v3260_v17 = vand.u32 4294901760, %v3259_v13  ;;  %v13854_v27 = vld [vmem:[#allocation37_spill] sm:$0xff]  ;;  %v13856_v40 = vld [vmem:[#allocation44_spill] sm:$0xff] }
 0x18d   : > { %v3272_v34 = vand.u32 4294901760, %v3271_v50  ;;  %v2411_v30 = vand.u32 4294901760, %v2410_v14  ;;  %v2423_v22 = vand.u32 4294901760, %v2422_v18  ;;  %v7919_v9 = vpack.c.bf16 %v2417_v46, %v2405_v31  ;;  %8106 = vmatpush1.bf16.msra.mxu1 %v8105_v8  ;;  %7918 = vmatpush1.bf16.msra.mxu0 %v7917_v0  ;;  %v13857_v50 = vld [vmem:[#allocation47_spill] sm:$0xff]  ;;  %v13858_v14 = vld [vmem:[#allocation48_spill] sm:$0xff]  ;;  %v13859_v18 = vld [vmem:[#allocation66_spill] sm:$0xff] }
 0x18e   : > { %v3265_v10 = vsub.f32 %v10504_v37, %v13850_v61  ;;  %v3277_v57 = vsub.f32 %v13851_v35, %v13852_v43  ;;  %v8109_v25 = vpack.c.bf16 %v3254_v55, %v3242_v53  ;;  %8108 = vmatprep.subr.bf16.mxu1 %v8107_v42  ;;  %v7923_v12 = vpack.c.bf16 %v13854_v27, %v13853_v6  ;;  %v13861_v46 = vld [vmem:[#allocation76_spill] sm:$0xff]  ;;  %v13862_v8 = vld [vmem:[#allocation51_spill] sm:$0xff] }
 0x18f   : > { %v8111_v59 = vpack.c.bf16 %v3272_v34, %v3260_v17  ;;  %v7921_v20 = vpack.c.bf16 %v2423_v22, %v2411_v30  ;;  %7920 = vmatprep.subr.bf16.mxu0 %v7919_v9  ;;  %v8115_v13 = vpack.c.bf16 %v13856_v40, %v13855_v29  ;;  %v7925_v58 = vpack.c.bf16 %v13858_v14, %v13857_v50  ;;  %v13863_v42 = vld [vmem:[#allocation60_spill] sm:$0xff]  ;;  %v13864_v0 = vld [vmem:[#allocation71_spill] sm:$0xff]  ;;  %v13868_v17 = vld [vmem:[#allocation21_spill] sm:$0xff] }
 0x190   : > { %v3266_v2 = vand.u32 4294901760, %v3265_v10  ;;  %v3278_v19 = vand.u32 4294901760, %v3277_v57  ;;  %v7927_v31 = vpack.c.bf16 %v13860_v5, %v13859_v18  ;;  %v8117_v53 = vpack.c.bf16 %v13863_v42, %v13862_v8  ;;  %v13865_v55 = vld [vmem:[#allocation72_spill] sm:$0xff]  ;;  %v13866_v10 = vld [vmem:[#allocation74_spill] sm:$0xff]  ;;  %v13867_v43 = vld [vmem:[#allocation11_spill] sm:$0xff] }
 0x191   : > { %8110 = vmatpush1.bf16.msra.mxu1 %v8109_v25  ;;  %7922 = vmatpush1.bf16.msra.mxu0 %v7921_v20  ;;  %v8119_v61 = vpack.c.bf16 %v13865_v55, %v13864_v0  ;;  %v7929_v57 = vpack.c.bf16 %v13867_v43, %v13866_v10  ;;  %v13869_v34 = vld [vmem:[#allocation22_spill] sm:$0xff]  ;;  %v13870_v22 = vld [vmem:[#allocation17_spill] sm:$0xff]  ;;  %v13871_v9 = vld [vmem:[#allocation20_spill] sm:$0xff] }
 0x192   : > { %v8113_v45 = vpack.c.bf16 %v3278_v19, %v3266_v2  ;;  %8112 = vmatprep.subr.bf16.mxu1 %v8111_v59  ;;  %7924 = vmatprep.subr.bf16.mxu0 %v7923_v12  ;;  %v7931_v30 = vpack.c.bf16 %v13869_v34, %v13868_v17  ;;  %v8121_v25 = vpack.c.bf16 %v13871_v9, %v13870_v22  ;;  %v13872_v2 = vld [vmem:[#allocation23_spill] sm:$0xff]  ;;  %v13873_v19 = vld [vmem:[#allocation25_spill] sm:$0xff]  ;;  %v13874_v20 = vld [vmem:[#allocation26_spill] sm:$0xff] }
 0x193   : > { %v8123_v59 = vpack.c.bf16 %v13873_v19, %v13872_v2  ;;  %v13875_v12 = vld [vmem:[#allocation27_spill] sm:$0xff]  ;;  %v13881_v22 = vld [vmem:[#allocation50_spill] sm:$0xff]  ;;  %v13883_v17 = vld [vmem:[#allocation12_spill] sm:$0xff] }
 0x194   : > { %2459 = vmatmul.mubr.f32.vlgmr.msra.gmra.mrb[2].mxu0 %v13861_v46  ;;  %v13880_v9 = vld [vmem:[#allocation43_spill] sm:$0xff] }
 0x195   : > { %8114 = vmatpush1.bf16.msra.mxu1 %v8113_v45  ;;  %7926 = vmatpush1.bf16.msra.mxu0 %v7925_v58  ;;  %v7933_v45 = vpack.c.bf16 %v13875_v12, %v13874_v20  ;;  %v13877_v58 = vld [vmem:[#allocation40_spill] sm:$0xff]  ;;  %v7939_v12 = vpack.c.bf16 %v13803_v48, %v13791_v36 }
 0x196   : > { %8116 = vmatprep.subr.bf16.mxu1 %v8115_v13  ;;  %7928 = vmatprep.subr.bf16.mxu0 %v7927_v31  ;;  %v13876_v13 = vld [vmem:[#allocation38_spill] sm:$0xff] }
 0x197   : > { %2593 = vmatprep.mubr.f32.mxu0 %v13434_v7  ;;  %v7935_v31 = vpack.c.bf16 %v13877_v58, %v13876_v13 }
 0x198   : > { %3314 = vmatmul.mubr.f32.vlgmr.msra.gmra.mrb[2].mxu1 %v13861_v46  ;;  %v13878_v46 = vld [vmem:[#allocation30_spill] sm:$0xff] }
 0x199   : > { %8118 = vmatpush1.bf16.msra.mxu1 %v8117_v53  ;;  %3448 = vmatprep.mubr.f32.mxu1 %v13434_v7  ;;  %v13879_v53 = vld [vmem:[#allocation34_spill] sm:$0xff] }
 0x19a   : > { %8120 = vmatprep.subr.bf16.mxu1 %v8119_v61  ;;  %7930 = vmatpush1.bf16.msra.mxu0 %v7929_v57  ;;  %v8125_v34 = vpack.c.bf16 %v13879_v53, %v13878_v46  ;;  %v8127_v61 = vpack.c.bf16 %v13881_v22, %v13880_v9  ;;  %v13882_v57 = vld [vmem:[#allocation58_spill] sm:$0xff] }
 0x19b   : > { %7932 = vmatprep.subr.bf16.mxu0 %v7931_v30  ;;  %v7937_v43 = vpack.c.bf16 %v13883_v17, %v13882_v57  ;;  %v13884_v30 = vld [vmem:[#allocation39_spill] sm:$0xff] }
 0x19c   : > { %v8129_v58 = vpack.c.bf16 %v13771_v23, %v13884_v30 }
 0x19d   : > { %8122 = vmatpush1.bf16.msra.mxu1 %v8121_v25  ;;  %v8131_v25 = vpack.c.bf16 %v10360_v44, %v10357_v52  ;;  %v7947_v52 = vpack.c.bf16 %v13835_v60, %v13833_v3  ;;  %v13885_v44 = vld [vmem:[#allocation86_spill] sm:$0xff]  ;;  %v13899_v3 = vld [vmem:[#allocation28_spill] sm:$0xff]  ;;  %v13900_v60 = vld [vmem:[#allocation31_spill] sm:$0xff] }
 0x19e   : > { %8124 = vmatprep.subr.bf16.mxu1 %v8123_v59  ;;  %7934 = vmatpush1.bf16.msra.mxu0 %v7933_v45  ;;  %v7941_v59 = vpack.c.bf16 %v10366_v38, %v10362_v63  ;;  %v7943_v45 = vpack.c.bf16 %v13734_v51, %v13733_v11  ;;  %v13886_v63 = vld [vmem:[#allocation87_spill] sm:$0xff]  ;;  %v13887_v38 = vld [vmem:[#allocation92_spill] sm:$0xff]  ;;  %v8143_v11 = vpack.c.bf16 %v10468_v62, %v10466_v47  ;;  %v13892_v62 = vld [vmem:[#allocation61_spill] sm:$0xff] }
 0x19f   : > { %7936 = vmatprep.subr.bf16.mxu0 %v7935_v31  ;;  %v8133_v31 = vpack.c.bf16 %v10373_v21, %v10371_v15  ;;  %v8137_v51 = vpack.c.bf16 %v13886_v63, %v13885_v44  ;;  %v8139_v15 = vpack.c.bf16 %v13755_v32, %v13887_v38  ;;  %v7949_v21 = vpack.c.bf16 %v13840_v4, %v13756_v26  ;;  %v13893_v47 = vld [vmem:[#allocation49_spill] sm:$0xff]  ;;  %v13897_v32 = vld [vmem:[#allocation15_spill] sm:$0xff] }
 0x1a0   : > { %v8145_v26 = vpack.c.bf16 %v13851_v35, %v10504_v37  ;;  %v13896_v37 = vld [vmem:[#allocation19_spill] sm:$0xff]  ;;  %v13901_v4 = vld [vmem:[#allocation29_spill] sm:$0xff]  ;;  %v13902_v35 = vld [vmem:[#allocation46_spill] sm:$0xff] }
 0x1a1   : > { %8126 = vmatpush1.bf16.msra.mxu1 %v8125_v34  ;;  %v8135_v34 = vpack.c.bf16 %v13735_v16, %v10386_v56  ;;  %v7951_v16 = vpack.c.bf16 %v10462_v33, %v13779_v39  ;;  %v8141_v56 = vpack.c.bf16 %v13759_v24, %v13758_v1  ;;  %v13888_v39 = vld [vmem:[#allocation32_spill] sm:$0xff]  ;;  %v13889_v33 = vld [vmem:[#allocation77_spill] sm:$0xff]  ;;  %v13914_v63 = vld [vmem:[#allocation91_spill] sm:$0xff] }
 0x1a2   : > { %8128 = vmatprep.subr.bf16.mxu1 %v8127_v61  ;;  %7938 = vmatpush1.bf16.msra.mxu0 %v7937_v43  ;;  %v7945_v43 = vpack.c.bf16 %v13827_v28, %v13825_v49  ;;  %v7953_v49 = vpack.c.bf16 %v10496_v41, %v10482_v54  ;;  %v13890_v1 = vld [vmem:[#allocation41_spill] sm:$0xff]  ;;  %v13895_v41 = vld [vmem:[#allocation75_spill] sm:$0xff]  ;;  %v13898_v28 = vld [vmem:[#allocation24_spill] sm:$0xff] }
 0x1a3   : > { %7940 = vmatprep.subr.bf16.mxu0 %v7939_v12  ;;  %v13891_v24 = vld [vmem:[#allocation45_spill] sm:$0xff]  ;;  %v13903_v12 = vld [vmem:[#allocation52_spill] sm:$0xff]  ;;  %v13916_v38 = vld [vmem:[#allocation55_spill] sm:$0xff] }
 0x1a4   : > { %v13894_v54 = vld [vmem:[#allocation69_spill] sm:$0xff] }
 0x1a5   : > { %8130 = vmatpush1.bf16.msra.mxu1 %v8129_v58  ;;  %v13904_v58 = vld [vmem:[#allocation53_spill] sm:$0xff] }
 0x1a6   : > { %8132 = vmatprep.subr.bf16.mxu1 %v8131_v25  ;;  %7942 = vmatpush1.bf16.msra.mxu0 %v7941_v59  ;;  %v13905_v61 = vld [vmem:[#allocation13_spill] sm:$0xff]  ;;  %v13906_v25 = vld [vmem:[#allocation14_spill] sm:$0xff]  ;;  %v13907_v59 = vld [vmem:[#allocation59_spill] sm:$0xff] }
 0x1a7   : > { %7944 = vmatprep.subr.bf16.mxu0 %v7943_v45  ;;  %v13908_v45 = vld [vmem:[#allocation18_spill] sm:$0xff]  ;;  %v13913_v44 = vld [vmem:[#allocation85_spill] sm:$0xff] }
 0x1a9   : > { %8134 = vmatpush1.bf16.msra.mxu1 %v8133_v31  ;;  %v13909_v31 = vld [vmem:[#allocation16_spill] sm:$0xff] }
 0x1aa   : > { %8136 = vmatprep.subr.bf16.mxu1 %v8135_v34  ;;  %7946 = vmatpush1.bf16.msra.mxu0 %v7945_v43  ;;  %v13910_v34 = vld [vmem:[#allocation80_spill] sm:$0xff]  ;;  %v13911_v43 = vld [vmem:[#allocation82_spill] sm:$0xff] }
 0x1ab   : > { %7948 = vmatprep.subr.bf16.mxu0 %v7947_v52  ;;  %v13912_v52 = vld [vmem:[#allocation88_spill] sm:$0xff] }
 0x1ad   : > { %8138 = vmatpush1.bf16.msra.mxu1 %v8137_v51  ;;  %v13915_v51 = vld [vmem:[#allocation94_spill] sm:$0xff] }
 0x1ae   : > { %8140 = vmatprep.subr.bf16.mxu1 %v8139_v15  ;;  %7950 = vmatpush1.bf16.msra.mxu0 %v7949_v21  ;;  %v13917_v15 = vand.u32 4294901760, %v13853_v6  ;;  %v13918_v21 = vand.u32 4294901760, %v13854_v27  ;;  %v13926_v6 = vand.u32 4294901760, %v13859_v18  ;;  %v13927_v27 = vand.u32 4294901760, %v13860_v5  ;;  %v13935_v5 = vld [vmem:[#allocation11_spill] sm:$0xff] }
 0x1af   : > { %7952 = vmatprep.subr.bf16.mxu0 %v7951_v16  ;;  %v13934_v18 = vand.u32 4294901760, %v13866_v10  ;;  %v13945_v10 = vand.u32 4294901760, %v13872_v2 }
 0x1b0   : > { %v7987_v16 = vpack.c.bf16 %v13918_v21, %v13917_v15  ;;  %v7991_v15 = vpack.c.bf16 %v13927_v27, %v13926_v6  ;;  %v13928_v21 = vld [vmem:[#allocation65_spill] sm:$0xff]  ;;  %v13939_v27 = vld [vmem:[#allocation22_spill] sm:$0xff] }
 0x1b1   : > { %8142 = vmatpush1.bf16.msra.mxu1 %v8141_v56  ;;  %v13919_v56 = vld [vmem:[#allocation97_spill] sm:$0xff] }
 0x1b2   : > { %8144 = vmatprep.subr.bf16.mxu1 %v8143_v11  ;;  %7954 = vmatpush1.bf16.msra.mxu0 %v7953_v49  ;;  %v13920_v11 = vld [vmem:[#allocation62_spill] sm:$0xff]  ;;  %v13921_v49 = vld [vmem:[#allocation63_spill] sm:$0xff] }
 0x1b3   : > { %7956 = vmatprep.subr.bf16.mxu0 %v13888_v39 }
 0x1b5   : > { %8146 = vmatpush1.bf16.msra.mxu1 %v8145_v26  ;;  %2596 = vmatmul.mubr.f32.vlgmr.msra.gmra.mrb[2].mxu0 %v13889_v33  ;;  %v13922_v26 = vand.u32 4294901760, %v13855_v29  ;;  %v13930_v29 = vand.u32 4294901760, %v13862_v8  ;;  %v13940_v8 = vand.u32 4294901760, %v13939_v27 }
 0x1b6   : > { %8148 = vmatprep.subr.bf16.mxu1 %v13890_v1  ;;  %7958 = vmatpush1.bf16.msra.mxu0 %v13891_v24 }
 0x1b7   : > { %7960 = vmatprep.subr.bf16.mxu0 %v13892_v62  ;;  %2698 = vmatprep.mubr.f32.mxu0 %v13434_v7 }
 0x1b8   : > { %3451 = vmatmul.mubr.f32.vlgmr.msra.gmra.mrb[2].mxu1 %v13889_v33  ;;  %v13923_v33 = vand.u32 4294901760, %v13856_v40  ;;  %v13931_v40 = vand.u32 4294901760, %v13863_v42  ;;  %v13941_v42 = vld [vmem:[#allocation17_spill] sm:$0xff] }
 0x1b9   : > { %8150 = vmatpush1.bf16.msra.mxu1 %v13893_v47  ;;  %3553 = vmatprep.mubr.f32.mxu1 %v13434_v7 }
 0x1ba   : > { %8152 = vmatprep.subr.bf16.mxu1 %v13894_v54  ;;  %7962 = vmatpush1.bf16.msra.mxu0 %v13895_v41 }
 0x1bb   : > { %7964 = vmatprep.subr.bf16.mxu0 %v13896_v37 }
 0x1bd   : > { %8154 = vmatpush1.bf16.msra.mxu1 %v13897_v32 }
 0x1be   : > { %8156 = vmatprep.subr.bf16.mxu1 %v13898_v28  ;;  %7966 = vmatpush1.bf16.msra.mxu0 %v13899_v3 }
 0x1bf   : > { %7968 = vmatprep.subr.bf16.mxu0 %v13900_v60 }
 0x1c1   : > { %8158 = vmatpush1.bf16.msra.mxu1 %v13901_v4 }
 0x1c2   : > { %8160 = vmatprep.subr.bf16.mxu1 %v13902_v35  ;;  %7970 = vmatpush1.bf16.msra.mxu0 %v13903_v12 }
 0x1c3   : > { %7972 = vmatprep.subr.bf16.mxu0 %v13904_v58 }
 0x1c5   : > { %8162 = vmatpush1.bf16.msra.mxu1 %v13905_v61 }
 0x1c6   : > { %8164 = vmatprep.subr.bf16.mxu1 %v13906_v25  ;;  %7974 = vmatpush1.bf16.msra.mxu0 %v13907_v59 }
 0x1c7   : > { %7976 = vmatprep.subr.bf16.mxu0 %v13908_v45 }
 0x1c9   : > { %8166 = vmatpush1.bf16.msra.mxu1 %v13909_v31 }
 0x1ca   : > { %8168 = vmatprep.subr.bf16.mxu1 %v13910_v34  ;;  %7978 = vmatpush1.bf16.msra.mxu0 %v13911_v43 }
 0x1cb   : > { %7980 = vmatprep.subr.bf16.mxu0 %v13912_v52 }
 0x1cd   : > { %8170 = vmatpush1.bf16.msra.mxu1 %v13913_v44 }
 0x1ce   : > { %8172 = vmatprep.subr.bf16.mxu1 %v13914_v63  ;;  %7982 = vmatpush1.bf16.msra.mxu0 %v13915_v51  ;;  %v8179_v63 = vpack.c.bf16 %v13923_v33, %v13922_v26  ;;  %v13924_v51 = vand.u32 4294901760, %v13857_v50  ;;  %v8181_v33 = vpack.c.bf16 %v13931_v40, %v13930_v29  ;;  %v13932_v50 = vand.u32 4294901760, %v13864_v0  ;;  %v13937_v26 = vld [vmem:[#allocation21_spill] sm:$0xff] }
 0x1cf   : > { %7984 = vmatprep.subr.bf16.mxu0 %v13916_v38  ;;  %v13925_v38 = vand.u32 4294901760, %v13858_v14  ;;  %v13933_v14 = vand.u32 4294901760, %v13865_v55  ;;  %v13938_v6 = vand.u32 4294901760, %v13937_v26  ;;  %v13942_v0 = vand.u32 4294901760, %v13941_v42  ;;  %v13943_v55 = vld [vmem:[#allocation20_spill] sm:$0xff] }
 0x1d0   : > { %v13947_v40 = vand.u32 4294901760, %v13874_v20  ;;  %v13956_v20 = vand.u32 4294901760, %v13881_v22  ;;  %v184_v22 = vld [vmem:[#allocation5 + $0x48] sm:$0xff] }
 0x1d1   : > { %8174 = vmatpush1.bf16.msra.mxu1 %v13919_v56  ;;  %v7989_v44 = vpack.c.bf16 %v13925_v38, %v13924_v51  ;;  %v8183_v51 = vpack.c.bf16 %v13933_v14, %v13932_v50  ;;  %v13936_v38 = vand.u32 4294901760, %v13935_v5  ;;  %v13948_v50 = vld [vmem:[#allocation27_spill] sm:$0xff]  ;;  %v13951_v5 = vld [vmem:[#allocation40_spill] sm:$0xff] }
 0x1d2   : > { %8176 = vmatprep.subr.bf16.mxu1 %v13920_v11  ;;  %7986 = vmatpush1.bf16.msra.mxu0 %v13921_v49  ;;  %v13929_v11 = vld [vmem:[#allocation78_spill] sm:$0xff]  ;;  %v13949_v14 = vand.u32 4294901760, %v13948_v50 }
 0x1d3   : > { %7988 = vmatprep.subr.bf16.mxu0 %v7987_v16  ;;  %v7993_v16 = vpack.c.bf16 %v13936_v38, %v13934_v18  ;;  %v13952_v38 = vand.u32 4294901760, %v13951_v5  ;;  %v13967_v5 = vld [vmem:[#allocation35_spill] sm:$0xff] }
 0x1d4   : > { %v7997_v18 = vpack.c.bf16 %v13949_v14, %v13947_v40 }
 0x1d5   : > { %8178 = vmatpush1.bf16.msra.mxu1 %v13928_v21  ;;  %2702 = vmatmul.mubr.f32.vlgmr.msra.gmra.mrb[2].mxu0 %v13929_v11  ;;  %v7995_v21 = vpack.c.bf16 %v13940_v8, %v13938_v6  ;;  %v13959_v8 = vand.u32 4294901760, %v13791_v36  ;;  %v201_v36 = vld [vmem:[#allocation5 + $0xd0] sm:$0xff] }
 0x1d6   : > { %8180 = vmatprep.subr.bf16.mxu1 %v8179_v63  ;;  %7990 = vmatpush1.bf16.msra.mxu0 %v7989_v44  ;;  %v13944_v44 = vand.u32 4294901760, %v13943_v55  ;;  %v13963_v55 = vld [vmem:[#allocation68_spill] sm:$0xff]  ;;  %v4694_v40 = vand.u32 4294901760, %v201_v36 }
 0x1d7   : > { %7992 = vmatprep.subr.bf16.mxu0 %v7991_v15  ;;  %2868 = vmatprep.mubr.f32.mxu0 %v13434_v7  ;;  %v13946_v15 = vand.u32 4294901760, %v13873_v19  ;;  %v13955_v19 = vand.u32 4294901760, %v13880_v9 }
 0x1d8   : > { %3557 = vmatmul.mubr.f32.vlgmr.msra.gmra.mrb[2].mxu1 %v13929_v11  ;;  %v8185_v63 = vpack.c.bf16 %v13944_v44, %v13942_v0  ;;  %v13962_v0 = vand.u32 4294901760, %v13771_v23  ;;  %v13964_v44 = vld [vmem:[#allocation70_spill] sm:$0xff]  ;;  %v13966_v23 = vld [vmem:[#allocation73_spill] sm:$0xff] }
 0x1d9   : > { %8182 = vmatpush1.bf16.msra.mxu1 %v8181_v33  ;;  %3723 = vmatprep.mubr.f32.mxu1 %v13434_v7  ;;  %v8187_v29 = vpack.c.bf16 %v13946_v15, %v13945_v10  ;;  %v13950_v33 = vand.u32 4294901760, %v13876_v13  ;;  %v8191_v6 = vpack.c.bf16 %v13956_v20, %v13955_v19  ;;  %v13958_v13 = vand.u32 4294901760, %v13883_v17  ;;  %v186_v17 = vld [vmem:[#allocation5 + $0x58] sm:$0xff] }
 0x1da   : > { %8184 = vmatprep.subr.bf16.mxu1 %v8183_v51  ;;  %7994 = vmatpush1.bf16.msra.mxu0 %v7993_v16  ;;  %v13953_v51 = vand.u32 4294901760, %v13878_v46  ;;  %v13954_v16 = vand.u32 4294901760, %v13879_v53  ;;  %v13960_v46 = vand.u32 4294901760, %v13803_v48  ;;  %v13961_v53 = vand.u32 4294901760, %v13884_v30  ;;  %v183_v48 = vld [vmem:[#allocation5 + $0x40] sm:$0xff]  ;;  %v13965_v10 = vld [vmem:[#allocation36_spill] sm:$0xff] }
 0x1db   : > { %7996 = vmatprep.subr.bf16.mxu0 %v7995_v21  ;;  %v7999_v26 = vpack.c.bf16 %v13952_v38, %v13950_v33  ;;  %v13957_v21 = vand.u32 4294901760, %v13882_v57  ;;  %v199_v57 = vld [vmem:[#allocation5 + $0xc0] sm:$0xff]  ;;  %v3835_v30 = vand.u32 4294901760, %v184_v22  ;;  %v3837_v50 = vand.u32 4294901760, %v183_v48  ;;  %v200_v33 = vld [vmem:[#allocation5 + $0xc8] sm:$0xff] }
 0x1dc   : > { %v8189_v2 = vpack.c.bf16 %v13954_v16, %v13953_v51  ;;  %v8003_v42 = vpack.c.bf16 %v13960_v46, %v13959_v8  ;;  %v8193_v9 = vpack.c.bf16 %v13962_v0, %v13961_v53  ;;  %v3839_v15 = vand.u32 4294901760, %v199_v57  ;;  %v13968_v38 = vld [vmem:[#allocation81_spill] sm:$0xff]  ;;  %v229_v51 = vld [vmem:[#allocation5 + $0x1b0] sm:$0xff]  ;;  %v228_v0 = vld [vmem:[#allocation5 + $0x1a8] sm:$0xff] }
 0x1dd   : > { %8186 = vmatpush1.bf16.msra.mxu1 %v8185_v63  ;;  %v8001_v27 = vpack.c.bf16 %v13958_v13, %v13957_v21  ;;  %v198_v63 = vld [vmem:[#allocation5 + $0xb8] sm:$0xff]  ;;  %v13969_v16 = vld [vmem:[#allocation93_spill] sm:$0xff]  ;;  %v4696_v20 = vand.u32 4294901760, %v200_v33  ;;  %v213_v53 = vld [vmem:[#allocation5 + $0x130] sm:$0xff] }
 0x1de   : > { %8188 = vmatprep.subr.bf16.mxu1 %v8187_v29  ;;  %7998 = vmatpush1.bf16.msra.mxu0 %v7997_v18  ;;  %v4690_v29 = vand.u32 4294901760, %v186_v17  ;;  %v3841_v14 = vand.u32 4294901760, %v198_v63  ;;  %v185_v18 = vld [vmem:[#allocation5 + $0x50] sm:$0xff]  ;;  %v231_v21 = vld [vmem:[#allocation5 + $0x1c0] sm:$0xff] }
 0x1df   : > { %8000 = vmatprep.subr.bf16.mxu0 %v7999_v26  ;;  %v214_v26 = vld [vmem:[#allocation5 + $0x138] sm:$0xff]  ;;  %v4692_v19 = vand.u32 4294901760, %v185_v18  ;;  %v13971_v13 = vld [vmem:[#allocation101_spill] sm:$0xff]  ;;  %v4702_v11 = vand.u32 4294901760, %v231_v21 }
 0x1e0   : > { %v11135_v8 = vpack.c.bf16 %v3841_v14, %v3837_v50  ;;  %v3843_v46 = vand.u32 4294901760, %v214_v26 }
 0x1e1   : > { %8190 = vmatpush1.bf16.msra.mxu1 %v8189_v2  ;;  %v11130_v2 = vpack.c.bf16 %v3839_v15, %v3835_v30 }
 0x1e2   : > { %8192 = vmatprep.subr.bf16.mxu1 %v8191_v6  ;;  %8002 = vmatpush1.bf16.msra.mxu0 %v8001_v27  ;;  %v216_v6 = vld [vmem:[#allocation5 + $0x148] sm:$0xff]  ;;  %v11133_v27 = vpack.c.bf16 %v4694_v40, %v4690_v29  ;;  %13973 = vst [vmem:[#allocation84_spill] sm:$0xff] %v11135_v8  ;;  %v215_v8 = vld [vmem:[#allocation5 + $0x140] sm:$0xff] }
 0x1e3   : > { %8004 = vmatprep.subr.bf16.mxu0 %v8003_v42  ;;  %13970 = vst [vmem:[#allocation57_spill] sm:$0xff] %v11130_v2  ;;  %v3847_v42 = vand.u32 4294901760, %v229_v51  ;;  %v11150_v2 = vsub.f32 %v198_v63, %v3841_v14  ;;  %v13989_v63 = vld [vmem:[#allocation100_spill] sm:$0xff]  ;;  %v4700_v49 = vand.u32 4294901760, %v215_v8 }
 0x1e4   : > { %13972 = vst [vmem:[#allocation83_spill] sm:$0xff] %v11133_v27  ;;  %v230_v27 = vld [vmem:[#allocation5 + $0x1b8] sm:$0xff] }
 0x1e5   : > { %8194 = vmatpush1.bf16.msra.mxu1 %v8193_v9  ;;  %v13974_v9 = vld [vmem:[#allocation95_spill] sm:$0xff]  ;;  %13982 = vst [vmem:[#allocation37_spill] sm:$0xff] %v11150_v2  ;;  %v13990_v14 = vld [vmem:[#allocation56_spill] sm:$0xff] }
 0x1e6   : > { %8196 = vmatprep.subr.bf16.mxu1 %v13963_v55  ;;  %8006 = vmatpush1.bf16.msra.mxu0 %v13964_v44  ;;  %v13975_v55 = vld [vmem:[#allocation98_spill] sm:$0xff]  ;;  %v11139_v44 = vsub.f32 %v184_v22, %v3835_v30  ;;  %v3845_v22 = vand.u32 4294901760, %v213_v53  ;;  %v3849_v30 = vand.u32 4294901760, %v228_v0 }
 0x1e7   : > { %8008 = vmatprep.subr.bf16.mxu0 %v13965_v10  ;;  %v11141_v10 = vsub.f32 %v199_v57, %v3839_v15  ;;  %v244_v57 = vld [vmem:[#allocation5 + $0x228] sm:$0xff]  ;;  %v259_v15 = vld [vmem:[#allocation5 + $0x2a0] sm:$0xff] }
 0x1e8   : > { %13976 = vst [vmem:[#allocation89_spill] sm:$0xff] %v11139_v44 }
 0x1e9   : > { %8198 = vmatpush1.bf16.msra.mxu1 %v13966_v23  ;;  %13977 = vst [vmem:[#allocation90_spill] sm:$0xff] %v11141_v10  ;;  %v11143_v23 = vsub.f32 %v186_v17, %v4690_v29  ;;  %v13984_v17 = vld [vmem:[#allocation99_spill] sm:$0xff]  ;;  %v11155_v29 = vsub.f32 %v185_v18, %v4692_v19  ;;  %v243_v18 = vld [vmem:[#allocation5 + $0x220] sm:$0xff] }
 0x1ea   : > { %8200 = vmatprep.subr.bf16.mxu1 %v13967_v5  ;;  %8010 = vmatpush1.bf16.msra.mxu0 %v13968_v38  ;;  %v13979_v5 = vld [vmem:[#allocation54_spill] sm:$0xff]  ;;  %v11146_v38 = vsub.f32 %v201_v36, %v4694_v40  ;;  %v11157_v36 = vsub.f32 %v200_v33, %v4696_v20  ;;  %v11161_v40 = vsub.f32 %v214_v26, %v3843_v46 }
 0x1eb   : > { %8012 = vmatprep.subr.bf16.mxu0 %v13969_v16  ;;  %13978 = vst [vmem:[#allocation96_spill] sm:$0xff] %v11143_v23  ;;  %v11148_v16 = vsub.f32 %v183_v48, %v3837_v50  ;;  %13985 = vst [vmem:[#allocation44_spill] sm:$0xff] %v11155_v29  ;;  %v11159_v48 = vpack.c.bf16 %v3847_v42, %v3843_v46  ;;  %v246_v50 = vld [vmem:[#allocation5 + $0x238] sm:$0xff]  ;;  %v11172_v26 = vsub.f32 %v231_v21, %v4702_v11 }
 0x1ec   : > { %13980 = vst [vmem:[#allocation64_spill] sm:$0xff] %v11146_v38  ;;  %13986 = vst [vmem:[#allocation47_spill] sm:$0xff] %v11157_v36  ;;  %v3855_v46 = vand.u32 4294901760, %v259_v15 }
 0x1ed   : > { %8202 = vmatpush1.bf16.msra.mxu1 %v13971_v13  ;;  %13981 = vst [vmem:[#allocation33_spill] sm:$0xff] %v11148_v16  ;;  %v4698_v13 = vand.u32 4294901760, %v216_v6  ;;  %13987 = vst [vmem:[#allocation48_spill] sm:$0xff] %v11159_v48  ;;  %v11174_v48 = vpack.c.bf16 %v3849_v30, %v3845_v22 }
 0x1ee   : > { %8204 = vmatprep.subr.bf16.mxu1 %v13974_v9  ;;  %8014 = vmatpush1.bf16.msra.mxu0 %v13975_v55  ;;  %v11152_v9 = vpack.c.bf16 %v4696_v20, %v4692_v19  ;;  %13988 = vst [vmem:[#allocation66_spill] sm:$0xff] %v11161_v40  ;;  %v261_v55 = vld [vmem:[#allocation5 + $0x2b0] sm:$0xff]  ;;  %v258_v19 = vld [vmem:[#allocation5 + $0x298] sm:$0xff]  ;;  %13994 = vst [vmem:[#allocation71_spill] sm:$0xff] %v11172_v26  ;;  %v3851_v20 = vand.u32 4294901760, %v244_v57  ;;  %v11180_v40 = vsub.f32 %v228_v0, %v3849_v30 }
 0x1ef   : > { %8016 = vmatprep.subr.bf16.mxu0 %v13979_v5  ;;  %v11165_v5 = vsub.f32 %v229_v51, %v3847_v42  ;;  %v11170_v33 = vpack.c.bf16 %v4702_v11, %v4698_v13  ;;  %13995 = vst [vmem:[#allocation72_spill] sm:$0xff] %v11174_v48  ;;  %v4706_v51 = vand.u32 4294901760, %v246_v50  ;;  %v4710_v42 = vand.u32 4294901760, %v261_v55 }
 0x1f0   : > { %13983 = vst [vmem:[#allocation42_spill] sm:$0xff] %v11152_v9  ;;  %v11167_v9 = vsub.f32 %v216_v6, %v4698_v13  ;;  %v245_v6 = vld [vmem:[#allocation5 + $0x230] sm:$0xff]  ;;  %13999 = vst [vmem:[#allocation23_spill] sm:$0xff] %v11180_v40  ;;  %v3853_v11 = vand.u32 4294901760, %v243_v18  ;;  %v3857_v21 = vand.u32 4294901760, %v258_v19  ;;  %v274_v13 = vld [vmem:[#allocation5 + $0x318] sm:$0xff]  ;;  %v11190_v48 = vsub.f32 %v244_v57, %v3851_v20 }
 0x1f1   : > { %8206 = vmatpush1.bf16.msra.mxu1 %v13984_v17  ;;  %13991 = vst [vmem:[#allocation67_spill] sm:$0xff] %v11165_v5  ;;  %v4704_v17 = vand.u32 4294901760, %v230_v27  ;;  %13993 = vst [vmem:[#allocation60_spill] sm:$0xff] %v11170_v33  ;;  %v13998_v5 = vld [vmem:[#allocation76_spill] sm:$0xff]  ;;  %v289_v33 = vld [vmem:[#allocation5 + $0x390] sm:$0xff]  ;;  %v11196_v0 = vsub.f32 %v259_v15, %v3855_v46  ;;  %v4708_v30 = vand.u32 4294901760, %v245_v6  ;;  %v11205_v15 = vsub.f32 %v261_v55, %v4710_v42 }
 0x1f2   : > { %8208 = vmatprep.subr.bf16.mxu1 %v13989_v63  ;;  %8018 = vmatpush1.bf16.msra.mxu0 %v13990_v14  ;;  %13992 = vst [vmem:[#allocation51_spill] sm:$0xff] %v11167_v9  ;;  %v11176_v63 = vsub.f32 %v213_v53, %v3845_v22  ;;  %v260_v14 = vld [vmem:[#allocation5 + $0x2a8] sm:$0xff]  ;;  %14003 = vst [vmem:[#allocation30_spill] sm:$0xff] %v11190_v48  ;;  %v3859_v57 = vand.u32 4294901760, %v274_v13  ;;  %v275_v48 = vld [vmem:[#allocation5 + $0x320] sm:$0xff] }
 0x1f3   : > { %8020 = vmatprep.subr.bf16.mxu0 %v13888_v39  ;;  %v13997_v9 = vld [vmem:[#allocation102_spill] sm:$0xff]  ;;  %v11182_v39 = vsub.f32 %v215_v8, %v4700_v49  ;;  %v11186_v53 = vpack.c.bf16 %v4704_v17, %v4700_v49  ;;  %v11188_v22 = vsub.f32 %v230_v27, %v4704_v17  ;;  %v11194_v8 = vpack.c.bf16 %v3855_v46, %v3851_v20 }
 0x1f4   : > { %13996 = vst [vmem:[#allocation74_spill] sm:$0xff] %v11176_v63  ;;  %v291_v63 = vld [vmem:[#allocation5 + $0x3a0] sm:$0xff]  ;;  %14005 = vst [vmem:[#allocation43_spill] sm:$0xff] %v11196_v0  ;;  %v11199_v49 = vpack.c.bf16 %v4710_v42, %v4706_v51  ;;  %v11201_v27 = vsub.f32 %v246_v50, %v4706_v51  ;;  %v3863_v17 = vand.u32 4294901760, %v289_v33  ;;  %v11207_v20 = vpack.c.bf16 %v3857_v21, %v3853_v11 }
 0x1f5   : > { %8210 = vmatpush1.bf16.msra.mxu1 %v13997_v9  ;;  %2870 = vmatmul.mubr.f32.vlgmr.msra.gmra.mrb[2].mxu0 %v13998_v5  ;;  %14000 = vst [vmem:[#allocation25_spill] sm:$0xff] %v11182_v39  ;;  %14001 = vst [vmem:[#allocation26_spill] sm:$0xff] %v11186_v53  ;;  %v276_v9 = vld [vmem:[#allocation5 + $0x328] sm:$0xff]  ;;  %v273_v39 = vld [vmem:[#allocation5 + $0x310] sm:$0xff]  ;;  %v4718_v0 = vand.u32 4294901760, %v291_v63  ;;  %v11211_v50 = vsub.f32 %v243_v18, %v3853_v11  ;;  %v11213_v51 = vsub.f32 %v258_v19, %v3857_v21 }
 0x1f6   : > { %8212 = vmatprep.subr.bf16.mxu1 %v13890_v1  ;;  %8022 = vmatpush1.bf16.msra.mxu0 %v13891_v24  ;;  %14002 = vst [vmem:[#allocation38_spill] sm:$0xff] %v11188_v22  ;;  %14004 = vst [vmem:[#allocation34_spill] sm:$0xff] %v11194_v8  ;;  %v4712_v1 = vand.u32 4294901760, %v260_v14  ;;  %v288_v24 = vld [vmem:[#allocation5 + $0x388] sm:$0xff]  ;;  %v4714_v46 = vand.u32 4294901760, %v276_v9  ;;  %v11218_v42 = vsub.f32 %v245_v6, %v4708_v30  ;;  %v306_v19 = vld [vmem:[#allocation5 + $0x418] sm:$0xff] }
 0x1f7   : > { %8024 = vmatprep.subr.bf16.mxu0 %v13892_v62  ;;  %2972 = vmatprep.mubr.f32.mxu0 %v13434_v7  ;;  %14006 = vst [vmem:[#allocation50_spill] sm:$0xff] %v11199_v49  ;;  %14007 = vst [vmem:[#allocation58_spill] sm:$0xff] %v11201_v27  ;;  %v290_v62 = vld [vmem:[#allocation5 + $0x398] sm:$0xff]  ;;  %v3861_v27 = vand.u32 4294901760, %v273_v39  ;;  %v3865_v22 = vand.u32 4294901760, %v288_v24  ;;  %v304_v49 = vld [vmem:[#allocation5 + $0x408] sm:$0xff]  ;;  %v11226_v18 = vsub.f32 %v289_v33, %v3863_v17 }
 0x1f8   : > { %3725 = vmatmul.mubr.f32.vlgmr.msra.gmra.mrb[2].mxu1 %v13998_v5  ;;  %14008 = vst [vmem:[#allocation12_spill] sm:$0xff] %v11205_v15  ;;  %14009 = vst [vmem:[#allocation39_spill] sm:$0xff] %v11207_v20  ;;  %v11216_v55 = vpack.c.bf16 %v4712_v1, %v4708_v30  ;;  %v4716_v15 = vand.u32 4294901760, %v275_v48  ;;  %v4720_v20 = vand.u32 4294901760, %v290_v62  ;;  %v11220_v53 = vsub.f32 %v260_v14, %v4712_v1  ;;  %v321_v11 = vld [vmem:[#allocation5 + $0x490] sm:$0xff] }
 0x1f9   : > { %8214 = vmatpush1.bf16.msra.mxu1 %v13893_v47  ;;  %3827 = vmatprep.mubr.f32.mxu1 %v13434_v7  ;;  %14010 = vst [vmem:[#allocation86_spill] sm:$0xff] %v11211_v50  ;;  %14011 = vst [vmem:[#allocation87_spill] sm:$0xff] %v11213_v51  ;;  %v319_v47 = vld [vmem:[#allocation5 + $0x480] sm:$0xff]  ;;  %v11229_v21 = vpack.c.bf16 %v4718_v0, %v4714_v46  ;;  %v3867_v6 = vand.u32 4294901760, %v304_v49  ;;  %v11235_v14 = vsub.f32 %v291_v63, %v4718_v0  ;;  %v305_v1 = vld [vmem:[#allocation5 + $0x410] sm:$0xff] }
 0x1fa   : > { %8216 = vmatprep.subr.bf16.mxu1 %v13894_v54  ;;  %8026 = vmatpush1.bf16.msra.mxu0 %v13895_v41  ;;  %14012 = vst [vmem:[#allocation92_spill] sm:$0xff] %v11216_v55  ;;  %14013 = vst [vmem:[#allocation32_spill] sm:$0xff] %v11218_v42  ;;  %v11222_v54 = vpack.c.bf16 %v3863_v17, %v3859_v57  ;;  %v11224_v41 = vsub.f32 %v274_v13, %v3859_v57  ;;  %v3871_v30 = vand.u32 4294901760, %v319_v47  ;;  %v303_v55 = vld [vmem:[#allocation5 + $0x400] sm:$0xff]  ;;  %v318_v42 = vld [vmem:[#allocation5 + $0x478] sm:$0xff] }
 0x1fb   : > { %8028 = vmatprep.subr.bf16.mxu0 %v13896_v37  ;;  %14014 = vst [vmem:[#allocation41_spill] sm:$0xff] %v11220_v53  ;;  %14017 = vst [vmem:[#allocation49_spill] sm:$0xff] %v11226_v18  ;;  %v11231_v37 = vsub.f32 %v276_v9, %v4714_v46  ;;  %v11237_v33 = vpack.c.bf16 %v3865_v22, %v3861_v27  ;;  %v11239_v13 = vsub.f32 %v273_v39, %v3861_v27  ;;  %v336_v39 = vld [vmem:[#allocation5 + $0x508] sm:$0xff]  ;;  %v351_v27 = vld [vmem:[#allocation5 + $0x580] sm:$0xff] }
 0x1fc   : > { %14015 = vst [vmem:[#allocation45_spill] sm:$0xff] %v11222_v54  ;;  %14016 = vst [vmem:[#allocation61_spill] sm:$0xff] %v11224_v41  ;;  %v11242_v9 = vsub.f32 %v288_v24, %v3865_v22  ;;  %v11244_v57 = vpack.c.bf16 %v4720_v20, %v4716_v15  ;;  %v4722_v17 = vand.u32 4294901760, %v306_v19  ;;  %v4726_v46 = vand.u32 4294901760, %v321_v11 }
 0x1fd   : > { %8218 = vmatpush1.bf16.msra.mxu1 %v13897_v32  ;;  %14018 = vst [vmem:[#allocation69_spill] sm:$0xff] %v11229_v21  ;;  %14019 = vst [vmem:[#allocation75_spill] sm:$0xff] %v11231_v37  ;;  %v320_v32 = vld [vmem:[#allocation5 + $0x488] sm:$0xff]  ;;  %v334_v37 = vld [vmem:[#allocation5 + $0x4f8] sm:$0xff]  ;;  %v11246_v21 = vsub.f32 %v275_v48, %v4716_v15  ;;  %v3869_v63 = vand.u32 4294901760, %v303_v55  ;;  %v3873_v0 = vand.u32 4294901760, %v318_v42  ;;  %v11257_v48 = vsub.f32 %v319_v47, %v3871_v30 }
 0x1fe   : > { %8220 = vmatprep.subr.bf16.mxu1 %v13898_v28  ;;  %8030 = vmatpush1.bf16.msra.mxu0 %v13899_v3  ;;  %14020 = vst [vmem:[#allocation19_spill] sm:$0xff] %v11237_v33  ;;  %14021 = vst [vmem:[#allocation15_spill] sm:$0xff] %v11239_v13  ;;  %v349_v28 = vld [vmem:[#allocation5 + $0x570] sm:$0xff]  ;;  %v11248_v3 = vsub.f32 %v290_v62, %v4720_v20  ;;  %v11251_v13 = vpack.c.bf16 %v3871_v30, %v3867_v6  ;;  %v4724_v22 = vand.u32 4294901760, %v305_v1  ;;  %v364_v30 = vld [vmem:[#allocation5 + $0x5e8] sm:$0xff] }
 0x1ff   : > { %8032 = vmatprep.subr.bf16.mxu0 %v13900_v60  ;;  %14022 = vst [vmem:[#allocation24_spill] sm:$0xff] %v11242_v9  ;;  %14023 = vst [vmem:[#allocation28_spill] sm:$0xff] %v11244_v57  ;;  %v11253_v60 = vsub.f32 %v304_v49, %v3867_v6  ;;  %v4728_v24 = vand.u32 4294901760, %v320_v32  ;;  %v11259_v62 = vsub.f32 %v306_v19, %v4722_v17  ;;  %v3875_v15 = vand.u32 4294901760, %v334_v37  ;;  %v335_v9 = vld [vmem:[#allocation5 + $0x500] sm:$0xff] }
 0x200   : > { %14024 = vst [vmem:[#allocation31_spill] sm:$0xff] %v11246_v21  ;;  %14025 = vst [vmem:[#allocation29_spill] sm:$0xff] %v11248_v3  ;;  %v3879_v20 = vand.u32 4294901760, %v349_v28  ;;  %v333_v3 = vld [vmem:[#allocation5 + $0x4f0] sm:$0xff]  ;;  %v348_v21 = vld [vmem:[#allocation5 + $0x568] sm:$0xff]  ;;  %v11264_v49 = vsub.f32 %v321_v11, %v4726_v46  ;;  %v4730_v6 = vand.u32 4294901760, %v336_v39  ;;  %v11266_v57 = vpack.c.bf16 %v3873_v0, %v3869_v63 }
 0x201   : > { %8222 = vmatpush1.bf16.msra.mxu1 %v13901_v4  ;;  %14026 = vst [vmem:[#allocation46_spill] sm:$0xff] %v11251_v13  ;;  %14027 = vst [vmem:[#allocation52_spill] sm:$0xff] %v11253_v60  ;;  %v11262_v4 = vpack.c.bf16 %v4726_v46, %v4722_v17  ;;  %v4734_v60 = vand.u32 4294901760, %v351_v27  ;;  %v11270_v47 = vsub.f32 %v318_v42, %v3873_v0  ;;  %v3877_v17 = vand.u32 4294901760, %v333_v3  ;;  %v363_v0 = vld [vmem:[#allocation5 + $0x5e0] sm:$0xff] }
 0x202   : > { %8224 = vmatprep.subr.bf16.mxu1 %v13902_v35  ;;  %8034 = vmatpush1.bf16.msra.mxu0 %v13903_v12  ;;  %14028 = vst [vmem:[#allocation53_spill] sm:$0xff] %v11257_v48  ;;  %14029 = vst [vmem:[#allocation13_spill] sm:$0xff] %v11259_v62  ;;  %v350_v35 = vld [vmem:[#allocation5 + $0x578] sm:$0xff]  ;;  %v11268_v12 = vsub.f32 %v303_v55, %v3869_v63  ;;  %v11272_v19 = vsub.f32 %v305_v1, %v4724_v22  ;;  %v379_v62 = vld [vmem:[#allocation5 + $0x660] sm:$0xff]  ;;  %v3881_v46 = vand.u32 4294901760, %v348_v21 }
 0x203   : > { %8036 = vmatprep.subr.bf16.mxu0 %v13904_v58  ;;  %14030 = vst [vmem:[#allocation14_spill] sm:$0xff] %v11262_v4  ;;  %14031 = vst [vmem:[#allocation59_spill] sm:$0xff] %v11264_v49  ;;  %v11275_v58 = vpack.c.bf16 %v4728_v24, %v4724_v22  ;;  %v11277_v11 = vsub.f32 %v320_v32, %v4728_v24  ;;  %v366_v49 = vld [vmem:[#allocation5 + $0x5f8] sm:$0xff]  ;;  %v381_v48 = vld [vmem:[#allocation5 + $0x670] sm:$0xff]  ;;  %v11281_v55 = vpack.c.bf16 %v3879_v20, %v3875_v15 }
 0x204   : > { %14032 = vst [vmem:[#allocation18_spill] sm:$0xff] %v11266_v57  ;;  %14033 = vst [vmem:[#allocation16_spill] sm:$0xff] %v11268_v12  ;;  %v11283_v42 = vsub.f32 %v334_v37, %v3875_v15  ;;  %v4732_v1 = vand.u32 4294901760, %v335_v9  ;;  %v4736_v63 = vand.u32 4294901760, %v350_v35  ;;  %v11286_v32 = vsub.f32 %v349_v28, %v3879_v20 }
 0x205   : > { %14034 = vst [vmem:[#allocation80_spill] sm:$0xff] %v11270_v47  ;;  %14035 = vst [vmem:[#allocation82_spill] sm:$0xff] %v11272_v19  ;;  %8226 = vmatpush1.bf16.msra.mxu1 %v13905_v61  ;;  %v378_v61 = vld [vmem:[#allocation5 + $0x658] sm:$0xff]  ;;  %v11288_v22 = vpack.c.bf16 %v4734_v60, %v4730_v6  ;;  %v3883_v24 = vand.u32 4294901760, %v364_v30  ;;  %v365_v19 = vld [vmem:[#allocation5 + $0x5f0] sm:$0xff]  ;;  %v11290_v47 = vsub.f32 %v336_v39, %v4730_v6  ;;  %v4738_v37 = vand.u32 4294901760, %v366_v49 }
 0x206   : > { %14036 = vst [vmem:[#allocation88_spill] sm:$0xff] %v11275_v58  ;;  %14037 = vst [vmem:[#allocation97_spill] sm:$0xff] %v11277_v11  ;;  %8228 = vmatprep.subr.bf16.mxu1 %v13906_v25  ;;  %8038 = vmatpush1.bf16.msra.mxu0 %v13907_v59  ;;  %v3887_v11 = vand.u32 4294901760, %v379_v62  ;;  %v380_v25 = vld [vmem:[#allocation5 + $0x668] sm:$0xff]  ;;  %v11292_v59 = vsub.f32 %v351_v27, %v4734_v60  ;;  %v4742_v15 = vand.u32 4294901760, %v381_v48  ;;  %v3889_v28 = vand.u32 4294901760, %v378_v61 }
 0x207   : > { %14038 = vst [vmem:[#allocation11_spill] sm:$0xff] %v11281_v55  ;;  %14039 = vst [vmem:[#allocation21_spill] sm:$0xff] %v11283_v42  ;;  %8040 = vmatprep.subr.bf16.mxu0 %v13908_v45  ;;  %v11295_v42 = vpack.c.bf16 %v3881_v46, %v3877_v17  ;;  %v11297_v12 = vsub.f32 %v333_v3, %v3877_v17  ;;  %v3885_v45 = vand.u32 4294901760, %v363_v0  ;;  %v4740_v27 = vand.u32 4294901760, %v365_v19 }
 0x208   : > { %14040 = vst [vmem:[#allocation22_spill] sm:$0xff] %v11286_v32  ;;  %14041 = vst [vmem:[#allocation17_spill] sm:$0xff] %v11288_v22  ;;  %v11301_v20 = vsub.f32 %v348_v21, %v3881_v46  ;;  %v11303_v39 = vpack.c.bf16 %v4736_v63, %v4732_v1  ;;  %v4744_v60 = vand.u32 4294901760, %v380_v25  ;;  %v11306_v6 = vsub.f32 %v335_v9, %v4732_v1 }
 0x209   : > { %14042 = vst [vmem:[#allocation20_spill] sm:$0xff] %v11292_v59  ;;  %8230 = vmatpush1.bf16.msra.mxu1 %v13909_v31  ;;  %14043 = vst [vmem:[#allocation27_spill] sm:$0xff] %v11295_v42  ;;  %v11308_v31 = vsub.f32 %v350_v35, %v4736_v63  ;;  %v11310_v3 = vpack.c.bf16 %v3887_v11, %v3883_v24  ;;  %v11312_v17 = vsub.f32 %v364_v30, %v3883_v24  ;;  %v396_v59 = vld [vmem:[#allocation5 + $0x6e8] sm:$0xff]  ;;  %v14059_v63 = vld [vmem:[#allocation91_spill] sm:$0xff] }
 0x20a   : > { %14044 = vst [vmem:[#allocation40_spill] sm:$0xff] %v11297_v12  ;;  %8232 = vmatprep.subr.bf16.mxu1 %v13910_v34  ;;  %8042 = vmatpush1.bf16.msra.mxu0 %v13911_v43  ;;  %14045 = vst [vmem:[#allocation68_spill] sm:$0xff] %v11301_v20  ;;  %v394_v12 = vld [vmem:[#allocation5 + $0x6d8] sm:$0xff]  ;;  %v409_v34 = vld [vmem:[#allocation5 + $0x750] sm:$0xff]  ;;  %v11314_v43 = vsub.f32 %v379_v62, %v3887_v11  ;;  %v11316_v21 = vpack.c.bf16 %v4742_v15, %v4738_v37 }
 0x20b   : > { %14046 = vst [vmem:[#allocation70_spill] sm:$0xff] %v11303_v39  ;;  %8044 = vmatprep.subr.bf16.mxu0 %v13912_v52  ;;  %14047 = vst [vmem:[#allocation36_spill] sm:$0xff] %v11306_v6  ;;  %v11318_v46 = vsub.f32 %v366_v49, %v4738_v37  ;;  %v11320_v20 = vsub.f32 %v381_v48, %v4742_v15  ;;  %v14054_v52 = vld [vmem:[#allocation85_spill] sm:$0xff]  ;;  %v11323_v9 = vpack.c.bf16 %v3889_v28, %v3885_v45  ;;  %v14060_v62 = vld [vmem:[#allocation94_spill] sm:$0xff] }
 0x20c   : > { %14048 = vst [vmem:[#allocation73_spill] sm:$0xff] %v11308_v31  ;;  %14049 = vst [vmem:[#allocation35_spill] sm:$0xff] %v11310_v3  ;;  %v11325_v35 = vsub.f32 %v363_v0, %v3885_v45  ;;  %v11327_v1 = vsub.f32 %v378_v61, %v3889_v28  ;;  %v11329_v30 = vsub.f32 %v365_v19, %v4740_v27  ;;  %v3891_v49 = vand.u32 4294901760, %v394_v12  ;;  %v411_v48 = vld [vmem:[#allocation5 + $0x760] sm:$0xff]  ;;  %v11335_v15 = vld [vmem:[#allocation5 + $0x6d0] sm:$0xff] }
 0x20d   : > { %14050 = vst [vmem:[#allocation81_spill] sm:$0xff] %v11314_v43  ;;  %14051 = vst [vmem:[#allocation93_spill] sm:$0xff] %v11316_v21  ;;  %8234 = vmatpush1.bf16.msra.mxu1 %v14054_v52  ;;  %v11333_v11 = vpack.c.bf16 %v4744_v60, %v4740_v27  ;;  %v3895_v24 = vand.u32 4294901760, %v409_v34  ;;  %v4746_v37 = vand.u32 4294901760, %v396_v59  ;;  %v14062_v52 = vld [vmem:[#allocation55_spill] sm:$0xff]  ;;  %v11338_v0 = vld [vmem:[#allocation5 + $0x748] sm:$0xff] }
 0x20e   : > { %14052 = vst [vmem:[#allocation101_spill] sm:$0xff] %v11318_v46  ;;  %14053 = vst [vmem:[#allocation95_spill] sm:$0xff] %v11320_v20  ;;  %8236 = vmatprep.subr.bf16.mxu1 %v14059_v63  ;;  %8046 = vmatpush1.bf16.msra.mxu0 %v14060_v62  ;;  %v4750_v61 = vand.u32 4294901760, %v411_v48  ;;  %v3893_v19 = vand.u32 4294901760, %v11335_v15  ;;  %v14065_v45 = vld [vmem:[#allocation62_spill] sm:$0xff]  ;;  %v14066_v28 = vld [vmem:[#allocation63_spill] sm:$0xff] }
 0x20f   : > { %14055 = vst [vmem:[#allocation98_spill] sm:$0xff] %v11323_v9  ;;  %14056 = vst [vmem:[#allocation54_spill] sm:$0xff] %v11325_v35  ;;  %8048 = vmatprep.subr.bf16.mxu0 %v14062_v52  ;;  %v11349_v52 = vsub.f32 %v380_v25, %v4744_v60  ;;  %v11356_v27 = vpack.c.bf16 %v3895_v24, %v3891_v49  ;;  %v11358_v63 = vsub.f32 %v409_v34, %v3895_v24  ;;  %v14070_v25 = vld [vmem:[#allocation57_spill] sm:$0xff]  ;;  %v14088_v20 = vld [vmem:[#allocation48_spill] sm:$0xff] }
 0x210   : > { %14057 = vst [vmem:[#allocation99_spill] sm:$0xff] %v11327_v1  ;;  %14058 = vst [vmem:[#allocation100_spill] sm:$0xff] %v11329_v30  ;;  %v11351_v1 = vsub.f32 %v394_v12, %v3891_v49  ;;  %v11360_v62 = vsub.f32 %v396_v59, %v4746_v37  ;;  %v3897_v30 = vand.u32 4294901760, %v11338_v0  ;;  %v410_v12 = vld [vmem:[#allocation5 + $0x758] sm:$0xff]  ;;  %v14071_v60 = vand.u32 4294901760, %v11139_v44 }
 0x211   : > { %14061 = vst [vmem:[#allocation56_spill] sm:$0xff] %v11333_v11  ;;  %8238 = vmatpush1.bf16.msra.mxu1 %v13919_v56  ;;  %14063 = vst [vmem:[#allocation102_spill] sm:$0xff] %v11349_v52  ;;  %v395_v56 = vld [vmem:[#allocation5 + $0x6e0] sm:$0xff]  ;;  %v14073_v49 = vand.u32 4294901760, %v11143_v23  ;;  %v14074_v59 = vand.u32 4294901760, %v11146_v38 }
 0x212   : > { %14064 = vst [vmem:[#allocation85_spill] sm:$0xff] %v11351_v1  ;;  %8240 = vmatprep.subr.bf16.mxu1 %v14065_v45  ;;  %8050 = vmatpush1.bf16.msra.mxu0 %v14066_v28  ;;  %14067 = vst [vmem:[#allocation91_spill] sm:$0xff] %v11356_v27  ;;  %v3946_v52 = vsub.f32 %v11139_v44, %v14071_v60  ;;  %v14072_v45 = vand.u32 4294901760, %v11141_v10  ;;  %v14077_v44 = vand.u32 4294901760, %v11155_v29  ;;  %v14082_v1 = vld [vmem:[#allocation67_spill] sm:$0xff] }
 0x213   : > { %14068 = vst [vmem:[#allocation94_spill] sm:$0xff] %v11358_v63  ;;  %14069 = vst [vmem:[#allocation55_spill] sm:$0xff] %v11360_v62  ;;  %8244 = vmatprep.subr.bf16.mxu0 %v14070_v25  ;;  %v4801_v34 = vsub.f32 %v11143_v23, %v14073_v49  ;;  %v4813_v24 = vsub.f32 %v11146_v38, %v14074_v59  ;;  %v14075_v62 = vand.u32 4294901760, %v11148_v16  ;;  %v14076_v63 = vand.u32 4294901760, %v11150_v2  ;;  %v14079_v23 = vld [vmem:[#allocation65_spill] sm:$0xff] }
 0x214   : > { %v3958_v28 = vsub.f32 %v11141_v10, %v14072_v45  ;;  %v4807_v45 = vsub.f32 %v11155_v29, %v14077_v44  ;;  %v14078_v10 = vand.u32 4294901760, %v11157_v36  ;;  %v11390_v59 = vpack.c.bf16 %v4750_v61, %v4746_v37 }
 0x215   : > { %v3952_v25 = vsub.f32 %v11148_v16, %v14075_v62  ;;  %v3964_v60 = vsub.f32 %v11150_v2, %v14076_v63  ;;  %8242 = vmatpush1.bf16.msra.mxu1 %v14079_v23  ;;  %2974 = vmatmul.mubr.f32.vlgmr.msra.gmra.mrb[2].mxu0 %v13998_v5  ;;  %v4748_v38 = vand.u32 4294901760, %v395_v56  ;;  %v14081_v62 = vld [vmem:[#allocation66_spill] sm:$0xff]  ;;  %v14083_v63 = vld [vmem:[#allocation83_spill] sm:$0xff]  ;;  %v14084_v2 = vld [vmem:[#allocation84_spill] sm:$0xff]  ;;  %v11396_v44 = vsub.f32 %v411_v48, %v4750_v61 }
 0x216   : > { %v4819_v49 = vsub.f32 %v11157_v36, %v14078_v10  ;;  %14080 = vst [vmem:[#allocation62_spill] sm:$0xff] %v11390_v59  ;;  %8436 = vmatprep.subr.bf16.mxu1 %v14083_v63  ;;  %8246 = vmatpush1.bf16.msra.mxu0 %v14084_v2  ;;  %v11398_v29 = vpack.c.bf16 %v3897_v30, %v3893_v19  ;;  %v4752_v10 = vand.u32 4294901760, %v410_v12  ;;  %v14087_v36 = vld [vmem:[#allocation51_spill] sm:$0xff]  ;;  %v3947_v37 = vand.u32 4294901760, %v3946_v52  ;;  %v14089_v61 = vld [vmem:[#allocation42_spill] sm:$0xff] }
 0x217   : > { %14085 = vst [vmem:[#allocation63_spill] sm:$0xff] %v11396_v44  ;;  %8248 = vmatprep.subr.bf16.mxu0 %v14088_v20  ;;  %3931 = vmatprep.mubr.f32.mxu0 %v13434_v7  ;;  %v3959_v46 = vand.u32 4294901760, %v3958_v28  ;;  %v4802_v16 = vand.u32 4294901760, %v4801_v34  ;;  %v4814_v43 = vand.u32 4294901760, %v4813_v24  ;;  %v3953_v35 = vand.u32 4294901760, %v3952_v25  ;;  %v14092_v25 = vld [vmem:[#allocation74_spill] sm:$0xff] }
 0x218   : > { %14086 = vst [vmem:[#allocation65_spill] sm:$0xff] %v11398_v29  ;;  %3829 = vmatmul.mubr.f32.vlgmr.msra.gmra.mrb[2].mxu1 %v13998_v5  ;;  %v3965_v63 = vand.u32 4294901760, %v3964_v60  ;;  %v4808_v2 = vand.u32 4294901760, %v4807_v45  ;;  %v4820_v48 = vand.u32 4294901760, %v4819_v49  ;;  %v14090_v23 = vand.u32 4294901760, %v14081_v62  ;;  %v14093_v60 = vld [vmem:[#allocation60_spill] sm:$0xff] }
 0x219   : > { %8438 = vmatpush1.bf16.msra.mxu1 %v14089_v61  ;;  %4786 = vmatprep.mubr.f32.mxu1 %v13434_v7  ;;  %v14091_v52 = vand.u32 4294901760, %v14082_v1  ;;  %v14094_v45 = vld [vmem:[#allocation72_spill] sm:$0xff]  ;;  %v11421_v49 = vsub.f32 %v11335_v15, %v3893_v19  ;;  %v14096_v61 = vand.u32 4294901760, %v14087_v36  ;;  %v11432_v24 = vsub.f32 %v11338_v0, %v3897_v30  ;;  %v14108_v30 = vld [vmem:[#allocation43_spill] sm:$0xff] }
 0x21a   : > { %v11409_v20 = vsub.f32 %v14081_v62, %v14090_v23  ;;  %8440 = vmatprep.subr.bf16.mxu1 %v14093_v60  ;;  %8250 = vmatpush1.bf16.msra.mxu0 %v14094_v45  ;;  %v11434_v34 = vpack.c.bf16 %v4752_v10, %v4748_v38  ;;  %v11436_v45 = vsub.f32 %v395_v56, %v4748_v38  ;;  %v14100_v0 = vand.u32 4294901760, %v11172_v26 }
 0x21b   : > { %v11414_v28 = vsub.f32 %v14082_v1, %v14091_v52  ;;  %14095 = vst [vmem:[#allocation103_spill] sm:$0xff] %v11421_v49  ;;  %v11426_v23 = vsub.f32 %v14087_v36, %v14096_v61  ;;  %v14097_v52 = vld [vmem:[#allocation25_spill] sm:$0xff]  ;;  %8252 = vmatprep.subr.bf16.mxu0 %v11194_v8  ;;  %v11438_v15 = vsub.f32 %v410_v12, %v4752_v10  ;;  %v14099_v1 = vld [vmem:[#allocation26_spill] sm:$0xff]  ;;  %v14104_v56 = vand.u32 4294901760, %v11180_v40 }
 0x21c   : > { %14098 = vst [vmem:[#allocation104_spill] sm:$0xff] %v11434_v34  ;;  %v11440_v19 = vpack.c.bf16 %v3959_v46, %v3947_v37  ;;  %v11442_v60 = vpack.c.bf16 %v4814_v43, %v4802_v16  ;;  %v11444_v61 = vpack.c.bf16 %v3965_v63, %v3953_v35  ;;  %v11446_v5 = vpack.c.bf16 %v4820_v48, %v4808_v2  ;;  %v14102_v43 = vld [vmem:[#allocation50_spill] sm:$0xff]  ;;  %v14103_v2 = vld [vmem:[#allocation39_spill] sm:$0xff]  ;;  %v14112_v48 = vld [vmem:[#allocation92_spill] sm:$0xff] }
 0x21d   : > { %8442 = vmatpush1.bf16.msra.mxu1 %v14099_v1  ;;  %v11454_v38 = vsub.f32 %v11172_v26, %v14100_v0  ;;  %v14101_v46 = vand.u32 4294901760, %v14092_v25  ;;  %v11467_v12 = vsub.f32 %v11180_v40, %v14104_v56  ;;  %v14105_v63 = vand.u32 4294901760, %v14097_v52  ;;  %v14106_v37 = vld [vmem:[#allocation38_spill] sm:$0xff]  ;;  %v14113_v26 = vld [vmem:[#allocation69_spill] sm:$0xff]  ;;  %v14115_v56 = vld [vmem:[#allocation75_spill] sm:$0xff] }
 0x21e   : > { %8444 = vmatprep.subr.bf16.mxu1 %v14102_v43  ;;  %8254 = vmatpush1.bf16.msra.mxu0 %v14103_v2  ;;  %v14107_v0 = vld [vmem:[#allocation30_spill] sm:$0xff]  ;;  %v14110_v43 = vld [vmem:[#allocation12_spill] sm:$0xff]  ;;  %v14117_v8 = vand.u32 4294901760, %v14108_v30 }
 0x21f   : > { %v11459_v16 = vsub.f32 %v14092_v25, %v14101_v46  ;;  %v11472_v10 = vsub.f32 %v14097_v52, %v14105_v63  ;;  %8256 = vmatprep.subr.bf16.mxu0 %v11222_v54  ;;  %v14109_v35 = vld [vmem:[#allocation58_spill] sm:$0xff]  ;;  %v14111_v25 = vld [vmem:[#allocation32_spill] sm:$0xff]  ;;  %v4838_v54 = vand.u32 4294901760, %v11454_v38  ;;  %v3989_v40 = vand.u32 4294901760, %v11467_v12 }
 0x220   : > { %v14114_v63 = vand.u32 4294901760, %v14106_v37  ;;  %v14118_v12 = vand.u32 4294901760, %v14109_v35  ;;  %v14120_v38 = vand.u32 4294901760, %v11211_v50 }
 0x221   : > { %8446 = vmatpush1.bf16.msra.mxu1 %v14112_v48  ;;  %v3977_v46 = vand.u32 4294901760, %v11459_v16  ;;  %v14116_v16 = vand.u32 4294901760, %v14107_v0  ;;  %v14121_v48 = vand.u32 4294901760, %v11213_v51 }
 0x222   : > { %8448 = vmatprep.subr.bf16.mxu1 %v14113_v26  ;;  %8258 = vmatpush1.bf16.msra.mxu0 %v11237_v33  ;;  %v4843_v52 = vsub.f32 %v14106_v37, %v14114_v63  ;;  %v4006_v33 = vsub.f32 %v14108_v30, %v14117_v8  ;;  %v4849_v26 = vsub.f32 %v14109_v35, %v14118_v12  ;;  %v14119_v63 = vand.u32 4294901760, %v14110_v43  ;;  %v14124_v35 = vld [vmem:[#allocation28_spill] sm:$0xff] }
 0x223   : > { %8260 = vmatprep.subr.bf16.mxu0 %v11251_v13  ;;  %v3994_v2 = vsub.f32 %v14107_v0, %v14116_v16  ;;  %v4000_v13 = vsub.f32 %v11211_v50, %v14120_v38  ;;  %v4012_v16 = vsub.f32 %v11213_v51, %v14121_v48  ;;  %v14122_v37 = vand.u32 4294901760, %v14111_v25  ;;  %v14127_v51 = vld [vmem:[#allocation15_spill] sm:$0xff] }
 0x224   : > { %v4861_v1 = vsub.f32 %v14110_v43, %v14119_v63  ;;  %v14123_v30 = vand.u32 4294901760, %v11220_v53  ;;  %v4832_v63 = vand.u32 4294901760, %v11472_v10  ;;  %v14125_v43 = vand.u32 4294901760, %v11224_v41 }
 0x225   : > { %v4855_v8 = vsub.f32 %v14111_v25, %v14122_v37  ;;  %8450 = vmatpush1.bf16.msra.mxu1 %v14124_v35  ;;  %v14126_v50 = vand.u32 4294901760, %v11226_v18  ;;  %v14128_v37 = vand.u32 4294901760, %v14115_v56  ;;  %v14129_v35 = vand.u32 4294901760, %v11235_v14 }
 0x226   : > { %v4867_v12 = vsub.f32 %v11220_v53, %v14123_v30  ;;  %v4018_v38 = vsub.f32 %v11224_v41, %v14125_v43  ;;  %8452 = vmatprep.subr.bf16.mxu1 %v11262_v4  ;;  %8262 = vmatpush1.bf16.msra.mxu0 %v11266_v57  ;;  %v4844_v30 = vand.u32 4294901760, %v4843_v52  ;;  %v14130_v53 = vld [vmem:[#allocation24_spill] sm:$0xff]  ;;  %v4007_v0 = vand.u32 4294901760, %v4006_v33  ;;  %v1265_v41 = vpop.f32.mrb[0].mxu0 }
 0x227   : > { %v4030_v48 = vsub.f32 %v11226_v18, %v14126_v50  ;;  %v4873_v10 = vsub.f32 %v14115_v56, %v14128_v37  ;;  %v4885_v43 = vsub.f32 %v11235_v14, %v14129_v35  ;;  %8264 = vmatprep.subr.bf16.mxu0 %v11281_v55  ;;  %v3995_v50 = vand.u32 4294901760, %v3994_v2  ;;  %7041 = vst [vmem:[%s11545_s17] sm:$0xff] %v1265_v41  ;;  %v1267_v35 = vpop.f32.mrb[1].mxu0 }
 0x228   : > { %v4850_v18 = vand.u32 4294901760, %v4849_v26  ;;  %v4862_v4 = vand.u32 4294901760, %v4861_v1  ;;  %v4001_v57 = vand.u32 4294901760, %v4000_v13  ;;  %v4013_v36 = vand.u32 4294901760, %v4012_v16  ;;  %v14132_v13 = vld [vmem:[#allocation31_spill] sm:$0xff]  ;;  %7042 = vst [vmem:[%s11545_s17 + $0x8] sm:$0xff] %v1267_v35 }
 0x229   : > { %v4856_v52 = vand.u32 4294901760, %v4855_v8  ;;  %v4868_v62 = vand.u32 4294901760, %v4867_v12  ;;  %8454 = vmatpush1.bf16.msra.mxu1 %v11275_v58  ;;  %v4019_v37 = vand.u32 4294901760, %v4018_v38  ;;  %v4031_v25 = vand.u32 4294901760, %v4030_v48  ;;  %v14134_v12 = vld [vmem:[#allocation29_spill] sm:$0xff]  ;;  %v2120_v48 = vpop.f32.mrb[0].mxu1 }
 0x22a   : > { %v14131_v33 = vand.u32 4294901760, %v14127_v51  ;;  %8456 = vmatprep.subr.bf16.mxu1 %v11288_v22  ;;  %8266 = vmatpush1.bf16.msra.mxu0 %v11295_v42  ;;  %v4874_v2 = vand.u32 4294901760, %v4873_v10  ;;  %v4886_v16 = vand.u32 4294901760, %v4885_v43  ;;  %v14133_v41 = vand.u32 4294901760, %v14130_v53  ;;  %7043 = vst [vmem:[%s11545_s17 + $0x10] sm:$0xff] %v2120_v48 }
 0x22b   : > { %8268 = vmatprep.subr.bf16.mxu0 %v11310_v3  ;;  %v14136_v35 = vand.u32 4294901760, %v11414_v28  ;;  %v14137_v22 = vand.u32 4294901760, %v11426_v23  ;;  %v11568_v10 = vpack.c.bf16 %v3989_v40, %v3977_v46  ;;  %v11570_v43 = vpack.c.bf16 %v4844_v30, %v4832_v63  ;;  %v14139_v23 = vld [vmem:[#allocation52_spill] sm:$0xff]  ;;  %v14143_v30 = vld [vmem:[#allocation59_spill] sm:$0xff] }
 0x22c   : > { %v4024_v26 = vsub.f32 %v14127_v51, %v14131_v33  ;;  %v4036_v8 = vsub.f32 %v14130_v53, %v14133_v41  ;;  %v14135_v33 = vand.u32 4294901760, %v11409_v20  ;;  %v2122_v41 = vpop.f32.mrb[1].mxu1  ;;  %v11573_v58 = vpack.c.bf16 %v4007_v0, %v3995_v50  ;;  %v14142_v0 = vld [vmem:[#allocation13_spill] sm:$0xff]  ;;  %v14149_v63 = vld [vmem:[#allocation20_spill] sm:$0xff] }
 0x22d   : > { %v11566_v42 = vpack.c.bf16 %v4838_v54, %v14137_v22  ;;  %v11575_v38 = vpack.c.bf16 %v4862_v4, %v4850_v18  ;;  %v11577_v3 = vpack.c.bf16 %v4013_v36, %v4001_v57  ;;  %v11579_v20 = vpack.c.bf16 %v4868_v62, %v4856_v52  ;;  %7044 = vst [vmem:[%s11545_s17 + $0x18] sm:$0xff] %v2122_v41  ;;  %v14141_v62 = vld [vmem:[#allocation53_spill] sm:$0xff]  ;;  %v14144_v52 = vld [vmem:[#allocation16_spill] sm:$0xff] }
 0x22e   : > { %v8279_v1 = vpack.c.bf16 %v14136_v35, %v14135_v33  ;;  %8458 = vmatpush1.bf16.msra.mxu1 %v11303_v39  ;;  %v11583_v28 = vpack.c.bf16 %v4031_v25, %v4019_v37  ;;  %v4025_v54 = vand.u32 4294901760, %v4024_v26  ;;  %v14138_v40 = vand.u32 4294901760, %v14132_v13  ;;  %8270 = vmatpush1.bf16.msra.mxu0 %v11323_v9  ;;  %v14145_v26 = vld [vmem:[#allocation80_spill] sm:$0xff]  ;;  %v14146_v33 = vld [vmem:[#allocation82_spill] sm:$0xff] }
 0x22f   : > { %v13181_v46 = vand.u32 4294901760, %v14139_v23  ;;  %8460 = vmatprep.subr.bf16.mxu1 %v11316_v21  ;;  %v11591_v36 = vpack.c.bf16 %v4886_v16, %v4874_v2  ;;  %v4037_v18 = vand.u32 4294901760, %v4036_v8  ;;  %v14140_v57 = vand.u32 4294901760, %v14134_v12  ;;  %8272 = vmatprep.subr.bf16.mxu0 %v11356_v27  ;;  %v14147_v16 = vld [vmem:[#allocation97_spill] sm:$0xff]  ;;  %v14163_v21 = vld [vmem:[#allocation40_spill] sm:$0xff] }
 0x230   : > { %v4879_v22 = vsub.f32 %v14132_v13, %v14138_v40  ;;  %v13186_v25 = vand.u32 4294901760, %v14141_v62  ;;  %v13189_v35 = vand.u32 4294901760, %v11436_v45  ;;  %v14154_v41 = vand.u32 4294901760, %v14144_v52 }
 0x231   : > { %v4891_v4 = vsub.f32 %v14134_v12, %v14140_v57  ;;  %v4042_v40 = vsub.f32 %v14139_v23, %v13181_v46  ;;  %v14148_v57 = vld [vmem:[#allocation21_spill] sm:$0xff]  ;;  %v14150_v46 = vand.u32 4294901760, %v11438_v15  ;;  %v11626_v48 = vpack.c.bf16 %v4037_v18, %v4025_v54 }
 0x232   : > { %8462 = vmatpush1.bf16.msra.mxu1 %v11333_v11  ;;  %8274 = vmatpush1.bf16.msra.mxu0 %v11398_v29  ;;  %v4880_v8 = vand.u32 4294901760, %v4879_v22  ;;  %v4054_v2 = vsub.f32 %v14141_v62, %v13186_v25  ;;  %v14152_v29 = vand.u32 4294901760, %v14142_v0  ;;  %v4048_v11 = vsub.f32 %v14144_v52, %v14154_v41 }
 0x233   : > { %8464 = vmatprep.subr.bf16.mxu1 %v11390_v59  ;;  %v11623_v50 = vpack.c.bf16 %v14150_v46, %v13189_v35  ;;  %8276 = vmatprep.subr.bf16.mxu0 %v11440_v19  ;;  %v4892_v37 = vand.u32 4294901760, %v4891_v4  ;;  %v14153_v59 = vand.u32 4294901760, %v14143_v30  ;;  %v14155_v46 = vand.u32 4294901760, %v14145_v26  ;;  %v14158_v4 = vld [vmem:[#allocation79_spill] sm:$0xff] }
 0x234   : > { %v4897_v22 = vsub.f32 %v14142_v0, %v14152_v29  ;;  %v14156_v19 = vand.u32 4294901760, %v14146_v33  ;;  %v14157_v18 = vand.u32 4294901760, %v14147_v16  ;;  %v14161_v27 = vand.u32 4294901760, %v11290_v47 }
 0x235   : > { %14151 = vst [vmem:[#allocation75_spill] sm:$0xff] %v11623_v50  ;;  %v4909_v25 = vsub.f32 %v14143_v30, %v14153_v59  ;;  %v4060_v35 = vsub.f32 %v14145_v26, %v14155_v46  ;;  %3937 = vmatmul.mubr.f32.vlgmr.msra.gmra.mrb[4].mxu0 %v14158_v4  ;;  %v14159_v59 = vand.u32 4294901760, %v14148_v57  ;;  %v14160_v50 = vand.u32 4294901760, %v11286_v32 }
 0x236   : > { %v4903_v54 = vsub.f32 %v14146_v33, %v14156_v19  ;;  %v4915_v29 = vsub.f32 %v14147_v16, %v14157_v18  ;;  %8466 = vmatpush1.bf16.msra.mxu1 %v11434_v34  ;;  %v4921_v19 = vsub.f32 %v11290_v47, %v14161_v27  ;;  %8278 = vmatpush1.bf16.msra.mxu0 %v11444_v61  ;;  %v4043_v18 = vand.u32 4294901760, %v4042_v40 }
 0x237   : > { %v4066_v41 = vsub.f32 %v14148_v57, %v14159_v59  ;;  %v4078_v46 = vsub.f32 %v11286_v32, %v14160_v50  ;;  %8468 = vmatprep.subr.bf16.mxu1 %v11442_v60  ;;  %v14162_v34 = vand.u32 4294901760, %v14149_v63  ;;  %v14164_v59 = vld [vmem:[#allocation68_spill] sm:$0xff]  ;;  %8280 = vmatprep.subr.bf16.mxu0 %v8279_v1  ;;  %v11664_v16 = vpack.c.bf16 %v4892_v37, %v4880_v8 }
 0x238   : > { %v4055_v50 = vand.u32 4294901760, %v4054_v2  ;;  %v4898_v33 = vand.u32 4294901760, %v4897_v22  ;;  %v4910_v32 = vand.u32 4294901760, %v4909_v25  ;;  %4167 = vmatprep.mubr.f32.mxu0 %v13434_v7  ;;  %v4049_v27 = vand.u32 4294901760, %v4048_v11 }
 0x239   : > { %v4933_v9 = vsub.f32 %v14149_v63, %v14162_v34  ;;  %4792 = vmatmul.mubr.f32.vlgmr.msra.gmra.mrb[4].mxu1 %v14158_v4  ;;  %v4061_v60 = vand.u32 4294901760, %v4060_v35  ;;  %v4904_v61 = vand.u32 4294901760, %v4903_v54  ;;  %v13206_v40 = vand.u32 4294901760, %v11306_v6 }
 0x23a   : > { %8470 = vmatpush1.bf16.msra.mxu1 %v11446_v5  ;;  %v4916_v34 = vand.u32 4294901760, %v4915_v29  ;;  %v4067_v39 = vand.u32 4294901760, %v4066_v41  ;;  %v4079_v55 = vand.u32 4294901760, %v4078_v46  ;;  %v4922_v1 = vand.u32 4294901760, %v4921_v19  ;;  %5022 = vmatprep.mubr.f32.mxu1 %v13434_v7  ;;  %v14168_v41 = vld [vmem:[#allocation101_spill] sm:$0xff]  ;;  %v14169_v19 = vld [vmem:[#allocation95_spill] sm:$0xff] }
 0x23b   : > { %8472 = vmatprep.subr.bf16.mxu1 %v11566_v42  ;;  %8282 = vmatpush1.bf16.msra.mxu0 %v11568_v10  ;;  %v4934_v25 = vand.u32 4294901760, %v4933_v9  ;;  %v14165_v37 = vand.u32 4294901760, %v14163_v21  ;;  %v14166_v2 = vand.u32 4294901760, %v14164_v59  ;;  %v8291_v35 = vpack.c.bf16 %v4055_v50, %v4043_v18  ;;  %v14167_v42 = vld [vmem:[#allocation81_spill] sm:$0xff] }
 0x23c   : > { %8284 = vmatprep.subr.bf16.mxu0 %v11573_v58  ;;  %v8483_v22 = vpack.c.bf16 %v4910_v32, %v4898_v33  ;;  %v13208_v54 = vand.u32 4294901760, %v11312_v17  ;;  %v13207_v29 = vand.u32 4294901760, %v14167_v42  ;;  %v8293_v10 = vpack.c.bf16 %v4061_v60, %v4049_v27  ;;  %v14170_v58 = vld [vmem:[#allocation54_spill] sm:$0xff]  ;;  %v14171_v32 = vld [vmem:[#allocation99_spill] sm:$0xff] }
 0x23d   : > { %v4072_v11 = vsub.f32 %v14163_v21, %v14165_v37  ;;  %v4084_v8 = vsub.f32 %v14164_v59, %v14166_v2  ;;  %v4927_v9 = vsub.f32 %v11306_v6, %v13206_v40  ;;  %v13209_v37 = vand.u32 4294901760, %v14169_v19 }
 0x23e   : > { %8474 = vmatpush1.bf16.msra.mxu1 %v11570_v43  ;;  %v8485_v2 = vpack.c.bf16 %v4916_v34, %v4904_v61  ;;  %v8295_v5 = vpack.c.bf16 %v4079_v55, %v4067_v39  ;;  %v13210_v18 = vand.u32 4294901760, %v14170_v58  ;;  %v13212_v33 = vand.u32 4294901760, %v14171_v32  ;;  %v14178_v61 = vld [vmem:[#allocation55_spill] sm:$0xff] }
 0x23f   : > { %8476 = vmatprep.subr.bf16.mxu1 %v11575_v38  ;;  %8286 = vmatpush1.bf16.msra.mxu0 %v11577_v3  ;;  %v8487_v50 = vpack.c.bf16 %v4934_v25, %v4922_v1  ;;  %v4073_v27 = vand.u32 4294901760, %v4072_v11  ;;  %v4085_v60 = vand.u32 4294901760, %v4084_v8  ;;  %v14172_v40 = vand.u32 4294901760, %v11308_v31  ;;  %v14173_v38 = vld [vmem:[#allocation85_spill] sm:$0xff]  ;;  %v14174_v3 = vld [vmem:[#allocation94_spill] sm:$0xff] }
 0x240   : > { %8288 = vmatprep.subr.bf16.mxu0 %v11583_v28  ;;  %v4090_v55 = vsub.f32 %v11312_v17, %v13208_v54  ;;  %v4102_v39 = vsub.f32 %v14167_v42, %v13207_v29  ;;  %v4928_v34 = vand.u32 4294901760, %v4927_v9  ;;  %v14175_v1 = vand.u32 4294901760, %v14168_v41  ;;  %v14177_v29 = vld [vmem:[#allocation102_spill] sm:$0xff] }
 0x241   : > { %v4939_v46 = vsub.f32 %v11308_v31, %v14172_v40  ;;  %v4957_v28 = vsub.f32 %v14169_v19, %v13209_v37  ;;  %v14176_v40 = vld [vmem:[#allocation100_spill] sm:$0xff]  ;;  %v4096_v8 = vsub.f32 %v14170_v58, %v13210_v18  ;;  %v4108_v9 = vsub.f32 %v14171_v32, %v13212_v33 }
 0x242   : > { %v4945_v25 = vsub.f32 %v14168_v41, %v14175_v1  ;;  %8478 = vmatpush1.bf16.msra.mxu1 %v11579_v20  ;;  %v8297_v37 = vpack.c.bf16 %v4085_v60, %v4073_v27  ;;  %v4091_v18 = vand.u32 4294901760, %v4090_v55  ;;  %v4103_v4 = vand.u32 4294901760, %v4102_v39 }
 0x243   : > { %8480 = vmatprep.subr.bf16.mxu1 %v11591_v36  ;;  %8290 = vmatpush1.bf16.msra.mxu0 %v11626_v48  ;;  %v14179_v33 = vand.u32 4294901760, %v14173_v38  ;;  %v14180_v1 = vand.u32 4294901760, %v14174_v3  ;;  %v4940_v32 = vand.u32 4294901760, %v4939_v46  ;;  %v4958_v27 = vand.u32 4294901760, %v4957_v28 }
 0x244   : > { %8292 = vmatprep.subr.bf16.mxu0 %v8291_v35  ;;  %v4946_v48 = vand.u32 4294901760, %v4945_v25  ;;  %v14181_v60 = vand.u32 4294901760, %v14176_v40  ;;  %v4097_v35 = vand.u32 4294901760, %v4096_v8  ;;  %v4109_v55 = vand.u32 4294901760, %v4108_v9 }
 0x245   : > { %v4114_v54 = vsub.f32 %v14173_v38, %v14179_v33  ;;  %v4126_v36 = vsub.f32 %v14174_v3, %v14180_v1  ;;  %v14182_v39 = vand.u32 4294901760, %v14177_v29  ;;  %v14183_v33 = vand.u32 4294901760, %v14178_v61 }
 0x246   : > { %v4951_v20 = vsub.f32 %v14176_v40, %v14181_v60  ;;  %8482 = vmatpush1.bf16.msra.mxu1 %v11664_v16  ;;  %v14184_v46 = vand.u32 4294901760, %v11396_v44  ;;  %v14185_v28 = vand.u32 4294901760, %v11421_v49  ;;  %v14186_v8 = vand.u32 4294901760, %v11432_v24 }
 0x247   : > { %v4963_v43 = vsub.f32 %v14177_v29, %v14182_v39  ;;  %v4969_v11 = vsub.f32 %v14178_v61, %v14183_v33  ;;  %8484 = vmatprep.subr.bf16.mxu1 %v8483_v22  ;;  %8294 = vmatpush1.bf16.msra.mxu0 %v8293_v10  ;;  %v8299_v1 = vpack.c.bf16 %v4103_v4, %v4091_v18  ;;  %v4115_v60 = vand.u32 4294901760, %v4114_v54 }
 0x248   : > { %v4981_v25 = vsub.f32 %v11396_v44, %v14184_v46  ;;  %v4120_v16 = vsub.f32 %v11421_v49, %v14185_v28  ;;  %v4132_v9 = vsub.f32 %v11432_v24, %v14186_v8  ;;  %8296 = vmatprep.subr.bf16.mxu0 %v8295_v5  ;;  %v4127_v39 = vand.u32 4294901760, %v4126_v36  ;;  %v14197_v8 = vld [vmem:[#allocation76_spill] sm:$0xff] }
 0x249   : > { %v8489_v29 = vpack.c.bf16 %v4940_v32, %v4928_v34  ;;  %v8491_v33 = vpack.c.bf16 %v4958_v27, %v4946_v48  ;;  %v4952_v22 = vand.u32 4294901760, %v4951_v20  ;;  %v8301_v10 = vpack.c.bf16 %v4109_v55, %v4097_v35  ;;  %v14189_v48 = vld [vmem:[#allocation89_spill] sm:$0xff]  ;;  %v14190_v27 = vld [vmem:[#allocation90_spill] sm:$0xff] }
 0x24a   : > { %8486 = vmatpush1.bf16.msra.mxu1 %v8485_v2  ;;  %v4964_v61 = vand.u32 4294901760, %v4963_v43  ;;  %v14187_v46 = vand.u32 4294901760, %v11436_v45  ;;  %v14188_v28 = vand.u32 4294901760, %v11438_v15  ;;  %v4970_v5 = vand.u32 4294901760, %v4969_v11  ;;  %v14192_v11 = vld [vmem:[#allocation64_spill] sm:$0xff] }
 0x24b   : > { %8488 = vmatprep.subr.bf16.mxu1 %v8487_v50  ;;  %8298 = vmatpush1.bf16.msra.mxu0 %v8297_v37  ;;  %v4982_v4 = vand.u32 4294901760, %v4981_v25  ;;  %v4121_v54 = vand.u32 4294901760, %v4120_v16  ;;  %v4133_v18 = vand.u32 4294901760, %v4132_v9  ;;  %v8303_v32 = vpack.c.bf16 %v4127_v39, %v4115_v60  ;;  %v14191_v50 = vld [vmem:[#allocation96_spill] sm:$0xff]  ;;  %v14193_v25 = vld [vmem:[#allocation33_spill] sm:$0xff]  ;;  %v14200_v39 = vld [vmem:[#allocation51_spill] sm:$0xff] }
 0x24c   : > { %v4975_v44 = vsub.f32 %v11436_v45, %v14187_v46  ;;  %v4987_v49 = vsub.f32 %v11438_v15, %v14188_v28  ;;  %8300 = vmatprep.subr.bf16.mxu0 %v8299_v1  ;;  %v8493_v2 = vpack.c.bf16 %v4964_v61, %v4952_v22  ;;  %v8307_v35 = vpack.c.bf16 %v14190_v27, %v14189_v48  ;;  %v14198_v9 = vld [vmem:[#allocation44_spill] sm:$0xff]  ;;  %v14199_v1 = vld [vmem:[#allocation47_spill] sm:$0xff] }
 0x24d   : > { %v8495_v20 = vpack.c.bf16 %v4982_v4, %v4970_v5  ;;  %v8305_v36 = vpack.c.bf16 %v4133_v18, %v4121_v54  ;;  %v8499_v55 = vpack.c.bf16 %v14192_v11, %v14191_v50  ;;  %v8501_v60 = vpack.c.bf16 %v14199_v1, %v14198_v9  ;;  %v14203_v46 = vld [vmem:[#allocation23_spill] sm:$0xff]  ;;  %v14204_v5 = vld [vmem:[#allocation30_spill] sm:$0xff]  ;;  %v14206_v18 = vld [vmem:[#allocation25_spill] sm:$0xff] }
 0x24e   : > { %8490 = vmatpush1.bf16.msra.mxu1 %v8489_v29  ;;  %v4976_v34 = vand.u32 4294901760, %v4975_v44  ;;  %v4988_v43 = vand.u32 4294901760, %v4987_v49  ;;  %v14194_v29 = vld [vmem:[#allocation37_spill] sm:$0xff]  ;;  %v14195_v44 = vld [vmem:[#allocation66_spill] sm:$0xff]  ;;  %v14196_v49 = vld [vmem:[#allocation67_spill] sm:$0xff] }
 0x24f   : > { %8492 = vmatprep.subr.bf16.mxu1 %v8491_v33  ;;  %8302 = vmatpush1.bf16.msra.mxu0 %v8301_v10  ;;  %v8309_v61 = vpack.c.bf16 %v14194_v29, %v14193_v25  ;;  %v8311_v16 = vpack.c.bf16 %v14196_v49, %v14195_v44  ;;  %v14201_v33 = vld [vmem:[#allocation71_spill] sm:$0xff]  ;;  %v14202_v10 = vld [vmem:[#allocation74_spill] sm:$0xff] }
 0x250   : > { %8304 = vmatprep.subr.bf16.mxu0 %v8303_v32  ;;  %v8497_v37 = vpack.c.bf16 %v4988_v43, %v4976_v34  ;;  %v8503_v22 = vpack.c.bf16 %v14201_v33, %v14200_v39  ;;  %v8313_v28 = vpack.c.bf16 %v14203_v46, %v14202_v10  ;;  %v14205_v4 = vld [vmem:[#allocation43_spill] sm:$0xff]  ;;  %v14207_v32 = vld [vmem:[#allocation38_spill] sm:$0xff]  ;;  %v14209_v43 = vld [vmem:[#allocation12_spill] sm:$0xff] }
 0x251   : > { %v8315_v54 = vpack.c.bf16 %v14205_v4, %v14204_v5  ;;  %v14208_v34 = vld [vmem:[#allocation58_spill] sm:$0xff] }
 0x252   : > { %8494 = vmatpush1.bf16.msra.mxu1 %v8493_v2  ;;  %v8505_v2 = vpack.c.bf16 %v14207_v32, %v14206_v18 }
 0x253   : > { %8496 = vmatprep.subr.bf16.mxu1 %v8495_v20  ;;  %8306 = vmatpush1.bf16.msra.mxu0 %v8305_v36  ;;  %v8507_v20 = vpack.c.bf16 %v14209_v43, %v14208_v34  ;;  %v14210_v36 = vld [vmem:[#allocation86_spill] sm:$0xff] }
 0x254   : > { %8308 = vmatprep.subr.bf16.mxu0 %v8307_v35  ;;  %v14211_v35 = vld [vmem:[#allocation87_spill] sm:$0xff] }
 0x256   : > { %8498 = vmatpush1.bf16.msra.mxu1 %v8497_v37  ;;  %4169 = vmatmul.mubr.f32.vlgmr.msra.gmra.mrb[4].mxu0 %v14197_v8  ;;  %v8317_v37 = vpack.c.bf16 %v14211_v35, %v14210_v36  ;;  %v8323_v35 = vpack.c.bf16 %v14141_v62, %v14139_v23 }
 0x257   : > { %8500 = vmatprep.subr.bf16.mxu1 %v8499_v55  ;;  %8310 = vmatpush1.bf16.msra.mxu0 %v8309_v61  ;;  %v14212_v55 = vld [vmem:[#allocation61_spill] sm:$0xff] }
 0x258   : > { %8312 = vmatprep.subr.bf16.mxu0 %v8311_v16  ;;  %4303 = vmatprep.mubr.f32.mxu0 %v13434_v7  ;;  %v14213_v61 = vld [vmem:[#allocation49_spill] sm:$0xff] }
 0x259   : > { %5024 = vmatmul.mubr.f32.vlgmr.msra.gmra.mrb[4].mxu1 %v14197_v8  ;;  %v8319_v16 = vpack.c.bf16 %v14213_v61, %v14212_v55  ;;  %v14214_v8 = vld [vmem:[#allocation32_spill] sm:$0xff] }
 0x25a   : > { %8502 = vmatpush1.bf16.msra.mxu1 %v8501_v60  ;;  %5158 = vmatprep.mubr.f32.mxu1 %v13434_v7  ;;  %v14215_v60 = vld [vmem:[#allocation41_spill] sm:$0xff] }
 0x25b   : > { %8504 = vmatprep.subr.bf16.mxu1 %v8503_v22  ;;  %8314 = vmatpush1.bf16.msra.mxu0 %v8313_v28  ;;  %v8509_v4 = vpack.c.bf16 %v14215_v60, %v14214_v8  ;;  %v8511_v22 = vpack.c.bf16 %v11235_v14, %v14115_v56  ;;  %v8321_v28 = vpack.c.bf16 %v14130_v53, %v14127_v51  ;;  %v14218_v51 = vld [vmem:[#allocation97_spill] sm:$0xff] }
 0x25c   : > { %8316 = vmatprep.subr.bf16.mxu0 %v8315_v54  ;;  %v8513_v54 = vpack.c.bf16 %v14134_v12, %v14132_v13 }
 0x25e   : > { %8506 = vmatpush1.bf16.msra.mxu1 %v8505_v2  ;;  %v8515_v2 = vpack.c.bf16 %v14143_v30, %v14142_v0 }
 0x25f   : > { %8508 = vmatprep.subr.bf16.mxu1 %v8507_v20  ;;  %8318 = vmatpush1.bf16.msra.mxu0 %v8317_v37  ;;  %v8325_v20 = vpack.c.bf16 %v14145_v26, %v14144_v52  ;;  %v14216_v37 = vld [vmem:[#allocation22_spill] sm:$0xff] }
 0x260   : > { %8320 = vmatprep.subr.bf16.mxu0 %v8319_v16  ;;  %v8327_v53 = vpack.c.bf16 %v14216_v37, %v14148_v57  ;;  %v14217_v16 = vld [vmem:[#allocation82_spill] sm:$0xff] }
 0x261   : > { %v8517_v62 = vpack.c.bf16 %v14218_v51, %v14217_v16 }
 0x262   : > { %8510 = vmatpush1.bf16.msra.mxu1 %v8509_v4  ;;  %v8519_v4 = vpack.c.bf16 %v14149_v63, %v11290_v47 }
 0x263   : > { %8512 = vmatprep.subr.bf16.mxu1 %v8511_v22  ;;  %8322 = vmatpush1.bf16.msra.mxu0 %v8321_v28  ;;  %v8329_v22 = vpack.c.bf16 %v14164_v59, %v14163_v21  ;;  %v8331_v28 = vpack.c.bf16 %v14167_v42, %v11312_v17  ;;  %v8335_v59 = vpack.c.bf16 %v14174_v3, %v14173_v38  ;;  %v14224_v3 = vld [vmem:[#allocation57_spill] sm:$0xff] }
 0x264   : > { %8324 = vmatprep.subr.bf16.mxu0 %v8323_v35  ;;  %v8521_v35 = vpack.c.bf16 %v11308_v31, %v11306_v6  ;;  %v14222_v31 = vld [vmem:[#allocation63_spill] sm:$0xff] }
 0x266   : > { %8514 = vmatpush1.bf16.msra.mxu1 %v8513_v54  ;;  %v8523_v54 = vpack.c.bf16 %v14169_v19, %v14168_v41 }
 0x267   : > { %8516 = vmatprep.subr.bf16.mxu1 %v8515_v2  ;;  %8326 = vmatpush1.bf16.msra.mxu0 %v8325_v20  ;;  %v14219_v2 = vld [vmem:[#allocation99_spill] sm:$0xff] }
 0x268   : > { %8328 = vmatprep.subr.bf16.mxu0 %v8327_v53  ;;  %v8333_v20 = vpack.c.bf16 %v14219_v2, %v14170_v58  ;;  %v14220_v53 = vld [vmem:[#allocation102_spill] sm:$0xff] }
 0x269   : > { %v8525_v42 = vpack.c.bf16 %v14220_v53, %v14176_v40 }
 0x26a   : > { %8518 = vmatpush1.bf16.msra.mxu1 %v8517_v62  ;;  %v14221_v62 = vld [vmem:[#allocation55_spill] sm:$0xff] }
 0x26b   : > { %8520 = vmatprep.subr.bf16.mxu1 %v8519_v4  ;;  %8330 = vmatpush1.bf16.msra.mxu0 %v8329_v22  ;;  %v8527_v4 = vpack.c.bf16 %v14222_v31, %v14221_v62  ;;  %v14223_v22 = vld [vmem:[#allocation103_spill] sm:$0xff]  ;;  %v14228_v31 = vld [vmem:[#allocation48_spill] sm:$0xff] }
 0x26c   : > { %8332 = vmatprep.subr.bf16.mxu0 %v8331_v28  ;;  %v8337_v6 = vpack.c.bf16 %v11432_v24, %v14223_v22  ;;  %v8529_v28 = vpack.c.bf16 %v11438_v15, %v11436_v45  ;;  %v14231_v45 = vld [vmem:[#allocation72_spill] sm:$0xff]  ;;  %v14232_v15 = vld [vmem:[#allocation34_spill] sm:$0xff] }
 0x26e   : > { %8522 = vmatpush1.bf16.msra.mxu1 %v8521_v35  ;;  %v14225_v35 = vld [vmem:[#allocation77_spill] sm:$0xff] }
 0x26f   : > { %8524 = vmatprep.subr.bf16.mxu1 %v8523_v54  ;;  %8334 = vmatpush1.bf16.msra.mxu0 %v8333_v20  ;;  %v14226_v54 = vld [vmem:[#allocation83_spill] sm:$0xff]  ;;  %v14227_v20 = vld [vmem:[#allocation84_spill] sm:$0xff] }
 0x270   : > { %8336 = vmatprep.subr.bf16.mxu0 %v8335_v59  ;;  %v14229_v59 = vld [vmem:[#allocation42_spill] sm:$0xff] }
 0x272   : > { %8526 = vmatpush1.bf16.msra.mxu1 %v8525_v42  ;;  %v14233_v42 = vld [vmem:[#allocation26_spill] sm:$0xff] }
 0x273   : > { %8528 = vmatprep.subr.bf16.mxu1 %v8527_v4  ;;  %8338 = vmatpush1.bf16.msra.mxu0 %v8337_v6  ;;  %v14230_v6 = vld [vmem:[#allocation60_spill] sm:$0xff]  ;;  %v14234_v4 = vld [vmem:[#allocation50_spill] sm:$0xff] }
 0x274   : > { %8340 = vmatprep.subr.bf16.mxu0 %v14224_v3 }
 0x276   : > { %8530 = vmatpush1.bf16.msra.mxu1 %v8529_v28  ;;  %4306 = vmatmul.mubr.f32.vlgmr.msra.gmra.mrb[4].mxu0 %v14225_v35  ;;  %v14235_v28 = vld [vmem:[#allocation39_spill] sm:$0xff] }
 0x277   : > { %8532 = vmatprep.subr.bf16.mxu1 %v14226_v54  ;;  %8342 = vmatpush1.bf16.msra.mxu0 %v14227_v20  ;;  %v14237_v20 = vld [vmem:[#allocation92_spill] sm:$0xff]  ;;  %v14240_v54 = vld [vmem:[#allocation46_spill] sm:$0xff] }
 0x278   : > { %8344 = vmatprep.subr.bf16.mxu0 %v14228_v31  ;;  %4408 = vmatprep.mubr.f32.mxu0 %v13434_v7  ;;  %v14236_v31 = vld [vmem:[#allocation45_spill] sm:$0xff] }
 0x279   : > { %5161 = vmatmul.mubr.f32.vlgmr.msra.gmra.mrb[4].mxu1 %v14225_v35  ;;  %v14238_v35 = vld [vmem:[#allocation69_spill] sm:$0xff] }
 0x27a   : > { %8534 = vmatpush1.bf16.msra.mxu1 %v14229_v59  ;;  %5263 = vmatprep.mubr.f32.mxu1 %v13434_v7  ;;  %v14239_v59 = vld [vmem:[#allocation19_spill] sm:$0xff] }
 0x27b   : > { %8536 = vmatprep.subr.bf16.mxu1 %v14230_v6  ;;  %8346 = vmatpush1.bf16.msra.mxu0 %v14231_v45  ;;  %v14241_v6 = vld [vmem:[#allocation28_spill] sm:$0xff]  ;;  %v14242_v45 = vld [vmem:[#allocation14_spill] sm:$0xff] }
 0x27c   : > { %8348 = vmatprep.subr.bf16.mxu0 %v14232_v15  ;;  %v14243_v15 = vld [vmem:[#allocation18_spill] sm:$0xff] }
 0x27e   : > { %8538 = vmatpush1.bf16.msra.mxu1 %v14233_v42  ;;  %v14244_v42 = vld [vmem:[#allocation11_spill] sm:$0xff] }
 0x27f   : > { %8540 = vmatprep.subr.bf16.mxu1 %v14234_v4  ;;  %8350 = vmatpush1.bf16.msra.mxu0 %v14235_v28  ;;  %v14245_v4 = vld [vmem:[#allocation88_spill] sm:$0xff]  ;;  %v14246_v28 = vld [vmem:[#allocation17_spill] sm:$0xff] }
 0x280   : > { %8352 = vmatprep.subr.bf16.mxu0 %v14236_v31  ;;  %v14247_v31 = vld [vmem:[#allocation27_spill] sm:$0xff] }
 0x282   : > { %8542 = vmatpush1.bf16.msra.mxu1 %v14237_v20  ;;  %v14248_v20 = vld [vmem:[#allocation35_spill] sm:$0xff] }
 0x283   : > { %8544 = vmatprep.subr.bf16.mxu1 %v14238_v35  ;;  %8354 = vmatpush1.bf16.msra.mxu0 %v14239_v59  ;;  %v14249_v35 = vld [vmem:[#allocation70_spill] sm:$0xff]  ;;  %v14250_v59 = vld [vmem:[#allocation93_spill] sm:$0xff] }
 0x284   : > { %8356 = vmatprep.subr.bf16.mxu0 %v14240_v54  ;;  %v14251_v54 = vld [vmem:[#allocation98_spill] sm:$0xff] }
 0x286   : > { %8546 = vmatpush1.bf16.msra.mxu1 %v14241_v6  ;;  %v14252_v6 = vld [vmem:[#allocation91_spill] sm:$0xff] }
 0x287   : > { %8548 = vmatprep.subr.bf16.mxu1 %v14242_v45  ;;  %8358 = vmatpush1.bf16.msra.mxu0 %v14243_v15  ;;  %v14253_v15 = vand.u32 4294901760, %v14189_v48  ;;  %v14262_v48 = vand.u32 4294901760, %v14195_v44  ;;  %v14270_v44 = vand.u32 4294901760, %v14202_v10  ;;  %v14278_v10 = vand.u32 4294901760, %v14209_v43 }
 0x288   : > { %8360 = vmatprep.subr.bf16.mxu0 %v14244_v42  ;;  %v14254_v42 = vand.u32 4294901760, %v14190_v27  ;;  %v14263_v27 = vand.u32 4294901760, %v14196_v49  ;;  %v14271_v49 = vand.u32 4294901760, %v14203_v46  ;;  %v14286_v43 = vand.u32 4294901760, %v14115_v56 }
 0x28a   : > { %8550 = vmatpush1.bf16.msra.mxu1 %v14245_v4  ;;  %v8371_v45 = vpack.c.bf16 %v14254_v42, %v14253_v15  ;;  %v14255_v4 = vld [vmem:[#allocation56_spill] sm:$0xff]  ;;  %v8375_v15 = vpack.c.bf16 %v14263_v27, %v14262_v48 }
 0x28b   : > { %8552 = vmatprep.subr.bf16.mxu1 %v14246_v28  ;;  %8362 = vmatpush1.bf16.msra.mxu0 %v14247_v31  ;;  %v14256_v28 = vld [vmem:[#allocation62_spill] sm:$0xff]  ;;  %v14257_v31 = vld [vmem:[#allocation65_spill] sm:$0xff]  ;;  %v14264_v42 = vld [vmem:[#allocation104_spill] sm:$0xff] }
 0x28c   : > { %8364 = vmatprep.subr.bf16.mxu0 %v14248_v20  ;;  %v14258_v20 = vand.u32 4294901760, %v14191_v50  ;;  %v14266_v50 = vand.u32 4294901760, %v14198_v9 }
 0x28e   : > { %8554 = vmatpush1.bf16.msra.mxu1 %v14249_v35  ;;  %v14259_v35 = vand.u32 4294901760, %v14192_v11  ;;  %v14267_v11 = vand.u32 4294901760, %v14199_v1  ;;  %v14276_v1 = vand.u32 4294901760, %v14207_v32  ;;  %v14283_v32 = vand.u32 4294901760, %v14213_v61 }
 0x28f   : > { %8556 = vmatprep.subr.bf16.mxu1 %v14250_v59  ;;  %8366 = vmatpush1.bf16.msra.mxu0 %v14251_v54  ;;  %v14260_v54 = vand.u32 4294901760, %v14193_v25  ;;  %v14268_v25 = vand.u32 4294901760, %v14200_v39  ;;  %v14292_v61 = vand.u32 4294901760, %v14139_v23  ;;  %v14300_v23 = vand.u32 4294901760, %v14145_v26 }
 0x290   : > { %8368 = vmatprep.subr.bf16.mxu0 %v14252_v6  ;;  %v8563_v59 = vpack.c.bf16 %v14259_v35, %v14258_v20  ;;  %v14261_v6 = vand.u32 4294901760, %v14194_v29  ;;  %v8565_v35 = vpack.c.bf16 %v14267_v11, %v14266_v50  ;;  %v14269_v29 = vand.u32 4294901760, %v14201_v33 }
 0x291   : > { %v8377_v20 = vpack.c.bf16 %v14271_v49, %v14270_v44  ;;  %v14277_v33 = vand.u32 4294901760, %v14208_v34  ;;  %v14284_v11 = vand.u32 4294901760, %v14214_v8  ;;  %v14290_v44 = vld [vmem:[#allocation24_spill] sm:$0xff] }
 0x292   : > { %8558 = vmatpush1.bf16.msra.mxu1 %v14255_v4  ;;  %v8373_v3 = vpack.c.bf16 %v14261_v6, %v14260_v54  ;;  %v8567_v54 = vpack.c.bf16 %v14269_v29, %v14268_v25  ;;  %v14272_v6 = vand.u32 4294901760, %v14204_v5  ;;  %v14279_v5 = vand.u32 4294901760, %v14210_v36  ;;  %v14288_v29 = vld [vmem:[#allocation15_spill] sm:$0xff] }
 0x293   : > { %8560 = vmatprep.subr.bf16.mxu1 %v14256_v28  ;;  %8370 = vmatpush1.bf16.msra.mxu0 %v14257_v31  ;;  %v14265_v28 = vld [vmem:[#allocation78_spill] sm:$0xff]  ;;  %v8571_v46 = vpack.c.bf16 %v14278_v10, %v14277_v33  ;;  %v14287_v36 = vand.u32 4294901760, %v11235_v14  ;;  %v14297_v14 = vand.u32 4294901760, %v14142_v0  ;;  %v14304_v10 = vand.u32 4294901760, %v14218_v51  ;;  %v14313_v51 = vld [vmem:[#allocation36_spill] sm:$0xff] }
 0x294   : > { %8372 = vmatprep.subr.bf16.mxu0 %v8371_v45  ;;  %v14273_v45 = vld [vmem:[#allocation43_spill] sm:$0xff] }
 0x295   : > { %v14274_v9 = vand.u32 4294901760, %v14273_v45  ;;  %v8575_v25 = vpack.c.bf16 %v14287_v36, %v14286_v43  ;;  %v14296_v45 = vand.u32 4294901760, %v14134_v12  ;;  %v14303_v12 = vand.u32 4294901760, %v14217_v16  ;;  %v14322_v36 = vld [vmem:[#allocation94_spill] sm:$0xff] }
 0x296   : > { %8562 = vmatpush1.bf16.msra.mxu1 %v14264_v42  ;;  %4412 = vmatmul.mubr.f32.vlgmr.msra.gmra.mrb[4].mxu0 %v14265_v28  ;;  %v14321_v43 = vand.u32 4294901760, %v14173_v38  ;;  %v14330_v38 = vand.u32 4294901760, %v11432_v24  ;;  %v14337_v24 = vld [vmem:[#allocation42_spill] sm:$0xff] }
 0x297   : > { %8564 = vmatprep.subr.bf16.mxu1 %v8563_v59  ;;  %8374 = vmatpush1.bf16.msra.mxu0 %v8373_v3  ;;  %v8379_v48 = vpack.c.bf16 %v14274_v9, %v14272_v6  ;;  %v14275_v3 = vand.u32 4294901760, %v14206_v18  ;;  %v14280_v59 = vld [vmem:[#allocation87_spill] sm:$0xff]  ;;  %v14282_v18 = vand.u32 4294901760, %v14212_v55  ;;  %v14291_v55 = vand.u32 4294901760, %v14290_v44 }
 0x298   : > { %8376 = vmatprep.subr.bf16.mxu0 %v8375_v15  ;;  %4578 = vmatprep.mubr.f32.mxu0 %v13434_v7  ;;  %v14281_v27 = vand.u32 4294901760, %v14280_v59  ;;  %v14298_v9 = vand.u32 4294901760, %v14143_v30  ;;  %v8581_v0 = vpack.c.bf16 %v14304_v10, %v14303_v12  ;;  %v14305_v30 = vand.u32 4294901760, %v11290_v47 }
 0x299   : > { %5267 = vmatmul.mubr.f32.vlgmr.msra.gmra.mrb[4].mxu1 %v14265_v28  ;;  %v8569_v39 = vpack.c.bf16 %v14276_v1, %v14275_v3  ;;  %v8383_v50 = vpack.c.bf16 %v14283_v32, %v14282_v18  ;;  %v14299_v3 = vand.u32 4294901760, %v14144_v52  ;;  %v14306_v52 = vand.u32 4294901760, %v14149_v63  ;;  %v14315_v32 = vld [vmem:[#allocation73_spill] sm:$0xff]  ;;  %v353_v28 = vld [vmem:[#allocation5 + $0x590] sm:$0xff] }
 0x29a   : > { %8566 = vmatpush1.bf16.msra.mxu1 %v8565_v35  ;;  %5433 = vmatprep.mubr.f32.mxu1 %v13434_v7  ;;  %v8381_v15 = vpack.c.bf16 %v14281_v27, %v14279_v5  ;;  %v14285_v35 = vand.u32 4294901760, %v14215_v60  ;;  %v14295_v60 = vand.u32 4294901760, %v14132_v13  ;;  %v14302_v13 = vand.u32 4294901760, %v14216_v37  ;;  %v14308_v5 = vld [vmem:[#allocation68_spill] sm:$0xff]  ;;  %v14311_v27 = vld [vmem:[#allocation81_spill] sm:$0xff] }
 0x29b   : > { %8568 = vmatprep.subr.bf16.mxu1 %v8567_v54  ;;  %8378 = vmatpush1.bf16.msra.mxu0 %v8377_v20  ;;  %v14289_v54 = vand.u32 4294901760, %v14288_v29  ;;  %v14293_v20 = vld [vmem:[#allocation53_spill] sm:$0xff]  ;;  %v8389_v1 = vpack.c.bf16 %v14300_v23, %v14299_v3  ;;  %v8583_v26 = vpack.c.bf16 %v14306_v52, %v14305_v30  ;;  %v14310_v37 = vand.u32 4294901760, %v11312_v17  ;;  %v14341_v3 = vld [vmem:[#allocation26_spill] sm:$0xff]  ;;  %v14345_v52 = vld [vmem:[#allocation92_spill] sm:$0xff] }
 0x29c   : > { %8380 = vmatprep.subr.bf16.mxu0 %v8379_v48  ;;  %v8573_v34 = vpack.c.bf16 %v14285_v35, %v14284_v11  ;;  %v14294_v8 = vand.u32 4294901760, %v14293_v20  ;;  %v8577_v56 = vpack.c.bf16 %v14296_v45, %v14295_v60  ;;  %v8579_v48 = vpack.c.bf16 %v14298_v9, %v14297_v14  ;;  %v14333_v20 = vld [vmem:[#allocation76_spill] sm:$0xff]  ;;  %v14340_v45 = vld [vmem:[#allocation34_spill] sm:$0xff]  ;;  %v203_v14 = vld [vmem:[#allocation5 + $0xe0] sm:$0xff] }
 0x29d   : > { %v8385_v49 = vpack.c.bf16 %v14291_v55, %v14289_v54  ;;  %v14312_v16 = vand.u32 4294901760, %v14311_v27  ;;  %v14314_v18 = vand.u32 4294901760, %v14313_v51  ;;  %v14317_v63 = vand.u32 4294901760, %v14168_v41  ;;  %v14339_v60 = vld [vmem:[#allocation72_spill] sm:$0xff]  ;;  %v187_v9 = vld [vmem:[#allocation5 + $0x60] sm:$0xff]  ;;  %v14342_v23 = vld [vmem:[#allocation50_spill] sm:$0xff] }
 0x29e   : > { %8570 = vmatpush1.bf16.msra.mxu1 %v8569_v39  ;;  %v8387_v6 = vpack.c.bf16 %v14294_v8, %v14292_v61  ;;  %v14301_v39 = vand.u32 4294901760, %v14148_v57  ;;  %v14309_v57 = vand.u32 4294901760, %v14308_v5  ;;  %v14319_v35 = vand.u32 4294901760, %v14170_v58  ;;  %v14327_v58 = vld [vmem:[#allocation63_spill] sm:$0xff]  ;;  %v204_v30 = vld [vmem:[#allocation5 + $0xe8] sm:$0xff]  ;;  %v234_v51 = vld [vmem:[#allocation5 + $0x1d8] sm:$0xff] }
 0x29f   : > { %8572 = vmatprep.subr.bf16.mxu1 %v8571_v46  ;;  %8382 = vmatpush1.bf16.msra.mxu0 %v8381_v15  ;;  %v14307_v46 = vand.u32 4294901760, %v14163_v21  ;;  %v8395_v15 = vpack.c.bf16 %v14312_v16, %v14310_v37  ;;  %v14318_v21 = vand.u32 4294901760, %v14169_v19  ;;  %v14320_v17 = vand.u32 4294901760, %v14219_v2  ;;  %v14334_v8 = vld [vmem:[#allocation83_spill] sm:$0xff]  ;;  %v232_v16 = vld [vmem:[#allocation5 + $0x1c8] sm:$0xff] }
 0x2a0   : > { %8384 = vmatprep.subr.bf16.mxu0 %v8383_v50  ;;  %v8391_v33 = vpack.c.bf16 %v14302_v13, %v14301_v39  ;;  %v14316_v50 = vand.u32 4294901760, %v14315_v32  ;;  %v14324_v54 = vand.u32 4294901760, %v14176_v40  ;;  %v14325_v44 = vand.u32 4294901760, %v14220_v53  ;;  %v14331_v40 = vld [vmem:[#allocation57_spill] sm:$0xff]  ;;  %v14332_v53 = vld [vmem:[#allocation75_spill] sm:$0xff] }
 0x2a1   : > { %v8393_v59 = vpack.c.bf16 %v14309_v57, %v14307_v46  ;;  %v8587_v11 = vpack.c.bf16 %v14318_v21, %v14317_v63  ;;  %v14326_v19 = vand.u32 4294901760, %v14221_v62  ;;  %v14328_v55 = vand.u32 4294901760, %v14327_v58  ;;  %v14335_v62 = vld [vmem:[#allocation84_spill] sm:$0xff]  ;;  %v14344_v39 = vld [vmem:[#allocation45_spill] sm:$0xff]  ;;  %v233_v46 = vld [vmem:[#allocation5 + $0x1d0] sm:$0xff] }
 0x2a2   : > { %8574 = vmatpush1.bf16.msra.mxu1 %v8573_v34  ;;  %v8585_v47 = vpack.c.bf16 %v14316_v50, %v14314_v18  ;;  %v8397_v34 = vpack.c.bf16 %v14320_v17, %v14319_v35  ;;  %v8589_v41 = vpack.c.bf16 %v14325_v44, %v14324_v54  ;;  %v5547_v12 = vand.u32 4294901760, %v187_v9  ;;  %v217_v5 = vld [vmem:[#allocation5 + $0x150] sm:$0xff]  ;;  %v14346_v57 = vld [vmem:[#allocation69_spill] sm:$0xff]  ;;  %v14348_v18 = vld [vmem:[#allocation46_spill] sm:$0xff] }
 0x2a3   : > { %8576 = vmatprep.subr.bf16.mxu1 %v8575_v25  ;;  %8386 = vmatpush1.bf16.msra.mxu0 %v8385_v49  ;;  %v14323_v25 = vand.u32 4294901760, %v14322_v36  ;;  %v8591_v2 = vpack.c.bf16 %v14328_v55, %v14326_v19  ;;  %v14329_v49 = vand.u32 4294901760, %v14223_v22  ;;  %v14338_v22 = vld [vmem:[#allocation60_spill] sm:$0xff]  ;;  %v6404_v27 = vand.u32 4294901760, %v204_v30  ;;  %v248_v17 = vld [vmem:[#allocation5 + $0x248] sm:$0xff]  ;;  %v247_v44 = vld [vmem:[#allocation5 + $0x240] sm:$0xff] }
 0x2a4   : > { %8388 = vmatprep.subr.bf16.mxu0 %v8387_v6  ;;  %v14336_v6 = vld [vmem:[#allocation48_spill] sm:$0xff]  ;;  %v12018_v21 = vsub.f32 %v187_v9, %v5547_v12  ;;  %v5557_v35 = vand.u32 4294901760, %v233_v46  ;;  %v5555_v36 = vand.u32 4294901760, %v217_v5  ;;  %v6410_v54 = vand.u32 4294901760, %v234_v51  ;;  %v14352_v19 = vld [vmem:[#allocation14_spill] sm:$0xff] }
 0x2a5   : > { %v8399_v29 = vpack.c.bf16 %v14323_v25, %v14321_v43  ;;  %v8401_v61 = vpack.c.bf16 %v14330_v38, %v14329_v49  ;;  %v14351_v43 = vld [vmem:[#allocation28_spill] sm:$0xff]  ;;  %v5559_v25 = vand.u32 4294901760, %v232_v16  ;;  %v14353_v58 = vld [vmem:[#allocation18_spill] sm:$0xff]  ;;  %v14356_v38 = vld [vmem:[#allocation11_spill] sm:$0xff] }
 0x2a6   : > { %8578 = vmatpush1.bf16.msra.mxu1 %v8577_v56  ;;  %v188_v56 = vld [vmem:[#allocation5 + $0x68] sm:$0xff]  ;;  %v14358_v9 = vld [vmem:[#allocation88_spill] sm:$0xff] }
 0x2a7   : > { %8580 = vmatprep.subr.bf16.mxu1 %v8579_v48  ;;  %8390 = vmatpush1.bf16.msra.mxu0 %v8389_v1  ;;  %v202_v48 = vld [vmem:[#allocation5 + $0xd8] sm:$0xff]  ;;  %v14343_v1 = vld [vmem:[#allocation39_spill] sm:$0xff]  ;;  %v5545_v13 = vand.u32 4294901760, %v188_v56 }
 0x2a8   : > { %8392 = vmatprep.subr.bf16.mxu0 %v8391_v33  ;;  %v5549_v33 = vand.u32 4294901760, %v203_v14  ;;  %v5551_v10 = vand.u32 4294901760, %v202_v48 }
 0x2a9   : > { %v12012_v50 = vsub.f32 %v188_v56, %v5545_v13  ;;  %v278_v56 = vld [vmem:[#allocation5 + $0x338] sm:$0xff] }
 0x2aa   : > { %8582 = vmatpush1.bf16.msra.mxu1 %v8581_v0  ;;  %v189_v0 = vld [vmem:[#allocation5 + $0x70] sm:$0xff]  ;;  %v12010_v32 = vpack.c.bf16 %v5549_v33, %v5545_v13  ;;  %v12016_v63 = vsub.f32 %v203_v14, %v5549_v33  ;;  %v12023_v55 = vsub.f32 %v202_v48, %v5551_v10  ;;  %v12039_v48 = vpack.c.bf16 %v5559_v25, %v5555_v36  ;;  %v292_v13 = vld [vmem:[#allocation5 + $0x3a8] sm:$0xff]  ;;  %v14362_v33 = vld [vmem:[#allocation17_spill] sm:$0xff] }
 0x2ab   : > { %8584 = vmatprep.subr.bf16.mxu1 %v8583_v26  ;;  %8394 = vmatpush1.bf16.msra.mxu0 %v8393_v59  ;;  %v218_v26 = vld [vmem:[#allocation5 + $0x158] sm:$0xff]  ;;  %v14347_v59 = vld [vmem:[#allocation19_spill] sm:$0xff]  ;;  %v6401_v37 = vand.u32 4294901760, %v189_v0 }
 0x2ac   : > { %8396 = vmatprep.subr.bf16.mxu0 %v8395_v15  ;;  %v219_v15 = vld [vmem:[#allocation5 + $0x160] sm:$0xff]  ;;  %14349 = vst [vmem:[#allocation31_spill] sm:$0xff] %v12010_v32  ;;  %14354 = vst [vmem:[#allocation52_spill] sm:$0xff] %v12023_v55  ;;  %v293_v14 = vld [vmem:[#allocation5 + $0x3b0] sm:$0xff] }
 0x2ad   : > { %v12027_v49 = vsub.f32 %v189_v0, %v6401_v37  ;;  %14359 = vst [vmem:[#allocation16_spill] sm:$0xff] %v12039_v48  ;;  %v12051_v0 = vsub.f32 %v234_v51, %v6410_v54 }
 0x2ae   : > { %8586 = vmatpush1.bf16.msra.mxu1 %v8585_v47  ;;  %v12014_v47 = vpack.c.bf16 %v5551_v10, %v5547_v12  ;;  %v14363_v12 = vld [vmem:[#allocation27_spill] sm:$0xff] }
 0x2af   : > { %8588 = vmatprep.subr.bf16.mxu1 %v8587_v11  ;;  %8398 = vmatpush1.bf16.msra.mxu0 %v8397_v34  ;;  %v5553_v11 = vand.u32 4294901760, %v218_v26  ;;  %v263_v34 = vld [vmem:[#allocation5 + $0x2c0] sm:$0xff]  ;;  %14365 = vst [vmem:[#allocation40_spill] sm:$0xff] %v12051_v0 }
 0x2b0   : > { %8400 = vmatprep.subr.bf16.mxu0 %v8399_v29  ;;  %14350 = vst [vmem:[#allocation29_spill] sm:$0xff] %v12014_v47  ;;  %v6407_v29 = vand.u32 4294901760, %v219_v15 }
 0x2b2   : > { %8590 = vmatpush1.bf16.msra.mxu1 %v8589_v41  ;;  %v262_v41 = vld [vmem:[#allocation5 + $0x2b8] sm:$0xff]  ;;  %v12049_v10 = vsub.f32 %v219_v15, %v6407_v29 }
 0x2b3   : > { %8592 = vmatprep.subr.bf16.mxu1 %v8591_v2  ;;  %8402 = vmatpush1.bf16.msra.mxu0 %v8401_v61  ;;  %v12025_v2 = vpack.c.bf16 %v6404_v27, %v6401_v37  ;;  %v12030_v61 = vsub.f32 %v204_v30, %v6404_v27  ;;  %v5569_v37 = vand.u32 4294901760, %v278_v56  ;;  %v5573_v27 = vand.u32 4294901760, %v293_v14 }
 0x2b4   : > { %8404 = vmatprep.subr.bf16.mxu0 %v14331_v40  ;;  %v12032_v40 = vsub.f32 %v218_v26, %v5553_v11  ;;  %14364 = vst [vmem:[#allocation20_spill] sm:$0xff] %v12049_v10  ;;  %v279_v26 = vld [vmem:[#allocation5 + $0x340] sm:$0xff] }
 0x2b5   : > { %14355 = vst [vmem:[#allocation13_spill] sm:$0xff] %v12025_v2 }
 0x2b6   : > { %8594 = vmatpush1.bf16.msra.mxu1 %v14332_v53  ;;  %4580 = vmatmul.mubr.f32.vlgmr.msra.gmra.mrb[4].mxu0 %v14333_v20  ;;  %v5561_v53 = vand.u32 4294901760, %v248_v17 }
 0x2b7   : > { %8596 = vmatprep.subr.bf16.mxu1 %v14334_v8  ;;  %8406 = vmatpush1.bf16.msra.mxu0 %v14335_v62  ;;  %v5565_v8 = vand.u32 4294901760, %v263_v34  ;;  %v249_v62 = vld [vmem:[#allocation5 + $0x250] sm:$0xff] }
 0x2b8   : > { %8408 = vmatprep.subr.bf16.mxu0 %v14336_v6  ;;  %4682 = vmatprep.mubr.f32.mxu0 %v13434_v7  ;;  %v264_v6 = vld [vmem:[#allocation5 + $0x2c8] sm:$0xff]  ;;  %v6413_v30 = vand.u32 4294901760, %v249_v62 }
 0x2b9   : > { %5435 = vmatmul.mubr.f32.vlgmr.msra.gmra.mrb[4].mxu1 %v14333_v20 }
 0x2ba   : > { %8598 = vmatpush1.bf16.msra.mxu1 %v14337_v24  ;;  %5537 = vmatprep.mubr.f32.mxu1 %v13434_v7  ;;  %v12034_v24 = vpack.c.bf16 %v5557_v35, %v5553_v11  ;;  %v12058_v11 = vsub.f32 %v263_v34, %v5565_v8 }
 0x2bb   : > { %8600 = vmatprep.subr.bf16.mxu1 %v14338_v22  ;;  %8410 = vmatpush1.bf16.msra.mxu0 %v14339_v60  ;;  %v12036_v22 = vsub.f32 %v233_v46, %v5557_v35  ;;  %v5563_v60 = vand.u32 4294901760, %v247_v44  ;;  %v294_v46 = vld [vmem:[#allocation5 + $0x3b8] sm:$0xff]  ;;  %v5575_v35 = vand.u32 4294901760, %v292_v13 }
 0x2bc   : > { %8412 = vmatprep.subr.bf16.mxu0 %v14340_v45  ;;  %14357 = vst [vmem:[#allocation59_spill] sm:$0xff] %v12034_v24  ;;  %v5567_v45 = vand.u32 4294901760, %v262_v41  ;;  %14369 = vst [vmem:[#allocation54_spill] sm:$0xff] %v12058_v11 }
 0x2be   : > { %8602 = vmatpush1.bf16.msra.mxu1 %v14341_v3  ;;  %v12041_v3 = vsub.f32 %v217_v5, %v5555_v36  ;;  %v14366_v5 = vld [vmem:[#allocation35_spill] sm:$0xff]  ;;  %v12060_v15 = vpack.c.bf16 %v5567_v45, %v5563_v60  ;;  %v12063_v36 = vsub.f32 %v247_v44, %v5563_v60  ;;  %v12076_v60 = vpack.c.bf16 %v5573_v27, %v5569_v37 }
 0x2bf   : > { %8604 = vmatprep.subr.bf16.mxu1 %v14342_v23  ;;  %8414 = vmatpush1.bf16.msra.mxu0 %v14343_v1  ;;  %v12043_v23 = vsub.f32 %v232_v16, %v5559_v25  ;;  %v12045_v1 = vpack.c.bf16 %v6410_v54, %v6407_v29  ;;  %v308_v16 = vld [vmem:[#allocation5 + $0x428] sm:$0xff]  ;;  %v12065_v25 = vsub.f32 %v262_v41, %v5567_v45  ;;  %v6419_v29 = vand.u32 4294901760, %v279_v26  ;;  %v14377_v44 = vld [vmem:[#allocation91_spill] sm:$0xff] }
 0x2c0   : > { %8416 = vmatprep.subr.bf16.mxu0 %v14344_v39  ;;  %v277_v39 = vld [vmem:[#allocation5 + $0x330] sm:$0xff]  ;;  %14370 = vst [vmem:[#allocation85_spill] sm:$0xff] %v12060_v15  ;;  %v6422_v54 = vand.u32 4294901760, %v294_v46  ;;  %14379 = vst [vmem:[#allocation64_spill] sm:$0xff] %v12076_v60  ;;  %v12078_v45 = vsub.f32 %v278_v56, %v5569_v37  ;;  %v352_v37 = vld [vmem:[#allocation5 + $0x588] sm:$0xff] }
 0x2c1   : > { %14360 = vst [vmem:[#allocation80_spill] sm:$0xff] %v12043_v23  ;;  %14361 = vst [vmem:[#allocation21_spill] sm:$0xff] %v12045_v1  ;;  %v5571_v51 = vand.u32 4294901760, %v277_v39  ;;  %v337_v56 = vld [vmem:[#allocation5 + $0x510] sm:$0xff] }
 0x2c2   : > { %8606 = vmatpush1.bf16.msra.mxu1 %v14345_v52  ;;  %v6416_v52 = vand.u32 4294901760, %v264_v6  ;;  %14372 = vst [vmem:[#allocation100_spill] sm:$0xff] %v12065_v25  ;;  %14380 = vst [vmem:[#allocation33_spill] sm:$0xff] %v12078_v45  ;;  %v368_v45 = vld [vmem:[#allocation5 + $0x608] sm:$0xff] }
 0x2c3   : > { %8608 = vmatprep.subr.bf16.mxu1 %v14346_v57  ;;  %8418 = vmatpush1.bf16.msra.mxu0 %v14347_v59  ;;  %v12054_v57 = vpack.c.bf16 %v5565_v8, %v5561_v53  ;;  %v12056_v59 = vsub.f32 %v248_v17, %v5561_v53  ;;  %v307_v17 = vld [vmem:[#allocation5 + $0x420] sm:$0xff]  ;;  %v12071_v53 = vsub.f32 %v249_v62, %v6413_v30  ;;  %v5577_v8 = vand.u32 4294901760, %v308_v16 }
 0x2c4   : > { %8420 = vmatprep.subr.bf16.mxu0 %v14348_v18  ;;  %v323_v18 = vld [vmem:[#allocation5 + $0x4a0] sm:$0xff]  ;;  %v12069_v34 = vpack.c.bf16 %v6416_v52, %v6413_v30  ;;  %v12074_v41 = vsub.f32 %v264_v6, %v6416_v52  ;;  %v5579_v62 = vand.u32 4294901760, %v307_v17  ;;  %v12089_v6 = vpack.c.bf16 %v6422_v54, %v6419_v29 }
 0x2c5   : > { %14367 = vst [vmem:[#allocation101_spill] sm:$0xff] %v12054_v57  ;;  %14368 = vst [vmem:[#allocation95_spill] sm:$0xff] %v12056_v59 }
 0x2c6   : > { %8610 = vmatpush1.bf16.msra.mxu1 %v14351_v43  ;;  %v14371_v43 = vld [vmem:[#allocation70_spill] sm:$0xff]  ;;  %14375 = vst [vmem:[#allocation89_spill] sm:$0xff] %v12069_v34  ;;  %14376 = vst [vmem:[#allocation90_spill] sm:$0xff] %v12071_v53  ;;  %v12087_v53 = vsub.f32 %v292_v13, %v5575_v35  ;;  %v12100_v13 = vsub.f32 %v308_v16, %v5577_v8 }
 0x2c7   : > { %8612 = vmatprep.subr.bf16.mxu1 %v14352_v19  ;;  %8422 = vmatpush1.bf16.msra.mxu0 %v14353_v58  ;;  %v322_v19 = vld [vmem:[#allocation5 + $0x498] sm:$0xff]  ;;  %v14373_v58 = vld [vmem:[#allocation93_spill] sm:$0xff]  ;;  %14378 = vst [vmem:[#allocation96_spill] sm:$0xff] %v12074_v41  ;;  %14385 = vst [vmem:[#allocation47_spill] sm:$0xff] %v12089_v6 }
 0x2c8   : > { %8424 = vmatprep.subr.bf16.mxu0 %v14356_v38  ;;  %v14374_v38 = vld [vmem:[#allocation98_spill] sm:$0xff]  ;;  %v5583_v30 = vand.u32 4294901760, %v322_v19  ;;  %14384 = vst [vmem:[#allocation44_spill] sm:$0xff] %v12087_v53 }
 0x2ca   : > { %8614 = vmatpush1.bf16.msra.mxu1 %v14358_v9  ;;  %v5581_v9 = vand.u32 4294901760, %v323_v18  ;;  %v12104_v41 = vpack.c.bf16 %v5583_v30, %v5579_v62 }
 0x2cb   : > { %8616 = vmatprep.subr.bf16.mxu1 %v14362_v33  ;;  %8426 = vmatpush1.bf16.msra.mxu0 %v14363_v12  ;;  %v309_v33 = vld [vmem:[#allocation5 + $0x430] sm:$0xff]  ;;  %v324_v12 = vld [vmem:[#allocation5 + $0x4a8] sm:$0xff] }
 0x2cc   : > { %8428 = vmatprep.subr.bf16.mxu0 %v14366_v5  ;;  %v12080_v5 = vsub.f32 %v293_v14, %v5573_v27  ;;  %v6425_v52 = vand.u32 4294901760, %v309_v33  ;;  %v14386_v14 = vld [vmem:[#allocation62_spill] sm:$0xff]  ;;  %v12095_v27 = vsub.f32 %v294_v46, %v6422_v54  ;;  %14391 = vst [vmem:[#allocation30_spill] sm:$0xff] %v12104_v41  ;;  %v5591_v46 = vand.u32 4294901760, %v352_v37 }
 0x2ce   : > { %8618 = vmatpush1.bf16.msra.mxu1 %v14371_v43  ;;  %14381 = vst [vmem:[#allocation37_spill] sm:$0xff] %v12080_v5  ;;  %v12082_v43 = vpack.c.bf16 %v5575_v35, %v5571_v51  ;;  %14388 = vst [vmem:[#allocation71_spill] sm:$0xff] %v12095_v27  ;;  %v12102_v35 = vsub.f32 %v323_v18, %v5581_v9  ;;  %v5589_v5 = vand.u32 4294901760, %v353_v28 }
 0x2cf   : > { %8620 = vmatprep.subr.bf16.mxu1 %v14373_v58  ;;  %8430 = vmatpush1.bf16.msra.mxu0 %v14374_v38  ;;  %v12084_v58 = vsub.f32 %v277_v39, %v5571_v51  ;;  %v338_v38 = vld [vmem:[#allocation5 + $0x518] sm:$0xff]  ;;  %v12093_v39 = vsub.f32 %v279_v26, %v6419_v29  ;;  %v12097_v51 = vpack.c.bf16 %v5581_v9, %v5577_v8  ;;  %v5587_v26 = vand.u32 4294901760, %v337_v56 }
 0x2d0   : > { %8432 = vmatprep.subr.bf16.mxu0 %v14377_v44  ;;  %14382 = vst [vmem:[#allocation66_spill] sm:$0xff] %v12082_v43  ;;  %v6428_v44 = vand.u32 4294901760, %v324_v12  ;;  %14390 = vst [vmem:[#allocation23_spill] sm:$0xff] %v12102_v35  ;;  %v5585_v53 = vand.u32 4294901760, %v338_v38  ;;  %v12110_v29 = vsub.f32 %v322_v19, %v5583_v30  ;;  %v13242_v8 = vmov 0.0|0.0   ;;  %v384_v35 = vld [vmem:[#allocation5 + $0x688] sm:$0xff] }
 0x2d1   : > { %14383 = vst [vmem:[#allocation67_spill] sm:$0xff] %v12084_v58  ;;  %14387 = vst [vmem:[#allocation51_spill] sm:$0xff] %v12093_v39  ;;  %v339_v58 = vld [vmem:[#allocation5 + $0x520] sm:$0xff]  ;;  %v12116_v9 = vsub.f32 %v309_v33, %v6425_v52  ;;  %v12127_v33 = vsub.f32 %v353_v28, %v5589_v5  ;;  %v14404_v28 = vmov 0.0|0.0  }
 0x2d2   : > { %8622 = vmatpush1.bf16.msra.mxu1 %v14255_v4  ;;  %14389 = vst [vmem:[#allocation74_spill] sm:$0xff] %v12097_v51  ;;  %v354_v4 = vld [vmem:[#allocation5 + $0x598] sm:$0xff]  ;;  %14393 = vst [vmem:[#allocation38_spill] sm:$0xff] %v12110_v29  ;;  %v12112_v16 = vpack.c.bf16 %v6428_v44, %v6425_v52  ;;  %v6431_v18 = vand.u32 4294901760, %v339_v58  ;;  %v12121_v19 = vpack.c.bf16 %v5589_v5, %v5585_v53  ;;  %v369_v29 = vld [vmem:[#allocation5 + $0x610] sm:$0xff] }
 0x2d3   : > { %8624 = vmatprep.subr.bf16.mxu1 %v14386_v14  ;;  %8434 = vmatpush1.bf16.msra.mxu0 %v14257_v31  ;;  %v383_v14 = vld [vmem:[#allocation5 + $0x680] sm:$0xff]  ;;  %v12106_v31 = vsub.f32 %v307_v17, %v5579_v62  ;;  %v6434_v54 = vand.u32 4294901760, %v354_v4  ;;  %14395 = vst [vmem:[#allocation12_spill] sm:$0xff] %v12116_v9  ;;  %v5593_v17 = vand.u32 4294901760, %v368_v45  ;;  %v12123_v30 = vsub.f32 %v338_v38, %v5585_v53 }
 0x2d4   : > { %8628 = vmatprep.subr.bf16.mxu0 %v12010_v32  ;;  %14394 = vst [vmem:[#allocation58_spill] sm:$0xff] %v12112_v16  ;;  %v5597_v62 = vand.u32 4294901760, %v383_v14  ;;  %v367_v32 = vld [vmem:[#allocation5 + $0x600] sm:$0xff]  ;;  %14397 = vst [vmem:[#allocation61_spill] sm:$0xff] %v12121_v19  ;;  %v12129_v52 = vpack.c.bf16 %v5591_v46, %v5587_v26  ;;  %v12138_v38 = vsub.f32 %v339_v58, %v6431_v18 }
 0x2d5   : > { %14392 = vst [vmem:[#allocation25_spill] sm:$0xff] %v12106_v31  ;;  %v382_v31 = vld [vmem:[#allocation5 + $0x678] sm:$0xff]  ;;  %14398 = vst [vmem:[#allocation49_spill] sm:$0xff] %v12127_v33  ;;  %v12136_v53 = vpack.c.bf16 %v6434_v54, %v6431_v18  ;;  %v12144_v5 = vsub.f32 %v354_v4, %v6434_v54  ;;  %v12149_v58 = vsub.f32 %v368_v45, %v5593_v17 }
 0x2d6   : > { %8626 = vmatpush1.bf16.msra.mxu1 %v14264_v42  ;;  %4684 = vmatmul.mubr.f32.vlgmr.msra.gmra.mrb[4].mxu0 %v14333_v20  ;;  %v12119_v42 = vsub.f32 %v324_v12, %v6428_v44  ;;  %14399 = vst [vmem:[#allocation32_spill] sm:$0xff] %v12129_v52  ;;  %v398_v12 = vld [vmem:[#allocation5 + $0x6f8] sm:$0xff]  ;;  %v413_v44 = vld [vmem:[#allocation5 + $0x770] sm:$0xff]  ;;  %14403 = vst [vmem:[#allocation97_spill] sm:$0xff] %v12138_v38  ;;  %v12151_v18 = vsub.f32 %v383_v14, %v5597_v62 }
 0x2d7   : > { %8819 = vmatprep.subr.bf16.mxu1 %v13242_v8  ;;  %8630 = vmatpush1.bf16.msra.mxu0 %v12014_v47  ;;  %v12131_v8 = vsub.f32 %v337_v56, %v5587_v26  ;;  %v12133_v47 = vsub.f32 %v352_v37, %v5591_v46  ;;  %14402 = vst [vmem:[#allocation82_spill] sm:$0xff] %v12136_v53  ;;  %14405 = vst [vmem:[#allocation99_spill] sm:$0xff] %v12144_v5  ;;  %v6437_v37 = vand.u32 4294901760, %v369_v29  ;;  %v397_v46 = vld [vmem:[#allocation5 + $0x6f0] sm:$0xff] }
 0x2d8   : > { %8632 = vmatprep.subr.bf16.mxu0 %v12034_v24  ;;  %14396 = vst [vmem:[#allocation86_spill] sm:$0xff] %v12119_v42  ;;  %5641 = vmatprep.mubr.f32.mxu0 %v13434_v7  ;;  %v5595_v24 = vand.u32 4294901760, %v367_v32  ;;  %v5599_v42 = vand.u32 4294901760, %v382_v31  ;;  %v12146_v56 = vpack.c.bf16 %v5597_v62, %v5593_v17  ;;  %v6440_v26 = vand.u32 4294901760, %v384_v35 }
 0x2d9   : > { %5539 = vmatmul.mubr.f32.vlgmr.msra.gmra.mrb[4].mxu1 %v14333_v20  ;;  %14400 = vst [vmem:[#allocation41_spill] sm:$0xff] %v12131_v8  ;;  %14401 = vst [vmem:[#allocation22_spill] sm:$0xff] %v12133_v47  ;;  %v5601_v20 = vand.u32 4294901760, %v398_v12  ;;  %v5605_v38 = vand.u32 4294901760, %v413_v44  ;;  %v399_v8 = vld [vmem:[#allocation5 + $0x700] sm:$0xff]  ;;  %v5603_v45 = vand.u32 4294901760, %v397_v46 }
 0x2da   : > { %8821 = vmatpush3.bf16.msra.mxu1 %v12025_v2  ;;  %7297 = vmatprep.mubr.msk.f32.mxu1 %vm9243_vm0, %v13434_v7  ;;  %14406 = vst [vmem:[#allocation102_spill] sm:$0xff] %v12146_v56  ;;  %v412_v2 = vld [vmem:[#allocation5 + $0x768] sm:$0xff]  ;;  %v12153_v47 = vsub.f32 %v367_v32, %v5595_v24  ;;  %v12159_v5 = vpack.c.bf16 %v5599_v42, %v5595_v24  ;;  %v6443_v54 = vand.u32 4294901760, %v399_v8  ;;  %v14411_v62 = vand.u32 4294901760, %v12016_v63 }
 0x2db   : > { %8822 = vmatprep.subr.bf16.mxu1 %v14404_v28  ;;  %8634 = vmatpush1.bf16.msra.mxu0 %v12039_v48  ;;  %v5607_v14 = vand.u32 4294901760, %v412_v2  ;;  %v12165_v32 = vpack.c.bf16 %v6440_v26, %v6437_v37  ;;  %v12171_v24 = vsub.f32 %v369_v29, %v6437_v37  ;;  %v12177_v4 = vsub.f32 %v398_v12, %v5601_v20 }
 0x2dc   : > { %8636 = vmatprep.subr.bf16.mxu0 %v12054_v57  ;;  %14407 = vst [vmem:[#allocation55_spill] sm:$0xff] %v12159_v5  ;;  %v12161_v57 = vsub.f32 %v382_v31, %v5599_v42  ;;  %v12173_v31 = vsub.f32 %v384_v35, %v6440_v26  ;;  %v12175_v42 = vpack.c.bf16 %v5605_v38, %v5601_v20 }
 0x2dd   : > { %14408 = vst [vmem:[#allocation103_spill] sm:$0xff] %v12165_v32  ;;  %v5668_v48 = vsub.f32 %v12016_v63, %v14411_v62  ;;  %v12189_v35 = vsub.f32 %v413_v44, %v5605_v38  ;;  %v12191_v37 = vpack.c.bf16 %v5607_v14, %v5603_v45  ;;  %v12193_v20 = vsub.f32 %v397_v46, %v5603_v45 }
 0x2de   : > { %8824 = vmatpush3.bf16.msra.mxu1 %v12045_v1  ;;  %14409 = vst [vmem:[#allocation56_spill] sm:$0xff] %v12175_v42  ;;  %v14410_v1 = vand.u32 4294901760, %v12012_v50  ;;  %v12195_v12 = vsub.f32 %v412_v2, %v5607_v14  ;;  %v14416_v44 = vand.u32 4294901760, %v12030_v61  ;;  %v12209_v46 = vsub.f32 %v399_v8, %v6443_v54 }
 0x2df   : > { %8825 = vmatprep.subr.bf16.mxu1 %v14404_v28  ;;  %8638 = vmatpush1.bf16.msra.mxu0 %v12060_v15  ;;  %v414_v15 = vld [vmem:[#allocation5 + $0x778] sm:$0xff]  ;;  %14413 = vst [vmem:[#allocation65_spill] sm:$0xff] %v12191_v37  ;;  %v13276_v45 = vand.u32 4294901760, %v12032_v40  ;;  %v14418_v8 = vand.u32 4294901760, %v12036_v22 }
 0x2e0   : > { %8640 = vmatprep.subr.bf16.mxu0 %v12076_v60  ;;  %v5656_v17 = vsub.f32 %v12012_v50, %v14410_v1  ;;  %v14412_v60 = vand.u32 4294901760, %v12018_v21  ;;  %v14414_v1 = vand.u32 4294901760, %v12023_v55  ;;  %v6502_v38 = vsub.f32 %v12030_v61, %v14416_v44 }
 0x2e1   : > { %v6446_v2 = vand.u32 4294901760, %v414_v15  ;;  %v5692_v44 = vsub.f32 %v12036_v22, %v14418_v8 }
 0x2e2   : > { %v5662_v29 = vsub.f32 %v12018_v21, %v14412_v60  ;;  %8827 = vmatpush3.bf16.msra.mxu1 %v12069_v34  ;;  %v5674_v26 = vsub.f32 %v12023_v55, %v14414_v1  ;;  %v14415_v60 = vand.u32 4294901760, %v12027_v49  ;;  %v5669_v34 = vand.u32 4294901760, %v5668_v48 }
 0x2e3   : > { %8828 = vmatprep.subr.bf16.mxu1 %v14404_v28  ;;  %8642 = vmatpush1.bf16.msra.mxu0 %v12082_v43  ;;  %v5657_v43 = vand.u32 4294901760, %v5656_v17  ;;  %v12223_v14 = vpack.c.bf16 %v6446_v2, %v6443_v54  ;;  %v14419_v55 = vand.u32 4294901760, %v12041_v3 }
 0x2e4   : > { %v6495_v62 = vsub.f32 %v12027_v49, %v14415_v60  ;;  %8644 = vmatprep.subr.bf16.mxu0 %v12097_v51  ;;  %v5663_v1 = vand.u32 4294901760, %v5662_v29  ;;  %v5675_v17 = vand.u32 4294901760, %v5674_v26  ;;  %v6503_v29 = vand.u32 4294901760, %v6502_v38 }
 0x2e5   : > { %14417 = vst [vmem:[#allocation104_spill] sm:$0xff] %v12223_v14  ;;  %v5680_v51 = vsub.f32 %v12032_v40, %v13276_v45  ;;  %v8659_v38 = vpack.c.bf16 %v5669_v34, %v5657_v43  ;;  %v5686_v54 = vsub.f32 %v12041_v3, %v14419_v55  ;;  %v14421_v60 = vand.u32 4294901760, %v12049_v10 }
 0x2e6   : > { %8830 = vmatpush3.bf16.msra.mxu1 %v12089_v6  ;;  %v6496_v48 = vand.u32 4294901760, %v6495_v62  ;;  %v12232_v62 = vsub.f32 %v414_v15, %v6446_v2  ;;  %v14422_v34 = vand.u32 4294901760, %v12051_v0  ;;  %v14423_v55 = vand.u32 4294901760, %v12056_v59 }
 0x2e7   : > { %8831 = vmatprep.subr.bf16.mxu1 %v14404_v28  ;;  %8646 = vmatpush1.bf16.msra.mxu0 %v12104_v41  ;;  %v14420_v41 = vand.u32 4294901760, %v12043_v23  ;;  %v6509_v15 = vsub.f32 %v12049_v10, %v14421_v60  ;;  %v14424_v60 = vand.u32 4294901760, %v12058_v11  ;;  %v14428_v10 = vand.u32 4294901760, %v12065_v25 }
 0x2e8   : > { %8648 = vmatprep.subr.bf16.mxu0 %v12121_v19  ;;  %v2975_v26 = vpop.f32.mrb[2].mxu0  ;;  %v6516_v43 = vsub.f32 %v12051_v0, %v14422_v34  ;;  %v5704_v2 = vsub.f32 %v12056_v59, %v14423_v55  ;;  %v5681_v55 = vand.u32 4294901760, %v5680_v51  ;;  %v14426_v0 = vand.u32 4294901760, %v12063_v36  ;;  %v14430_v59 = vld [vmem:[#allocation37_spill] sm:$0xff] }
 0x2e9   : > { %7045 = vst [vmem:[%s11545_s17 + $0x20] sm:$0xff] %v2975_v26  ;;  %v2977_v45 = vpop.f32.mrb[3].mxu0  ;;  %v5698_v8 = vsub.f32 %v12043_v23, %v14420_v41  ;;  %v12255_v26 = vpack.c.bf16 %v5675_v17, %v5663_v1  ;;  %v12257_v41 = vpack.c.bf16 %v6503_v29, %v6496_v48  ;;  %v5716_v19 = vsub.f32 %v12058_v11, %v14424_v60  ;;  %v14427_v1 = vld [vmem:[#allocation96_spill] sm:$0xff]  ;;  %v14429_v11 = vld [vmem:[#allocation33_spill] sm:$0xff]  ;;  %v14432_v17 = vld [vmem:[#allocation67_spill] sm:$0xff] }
 0x2ea   : > { %8833 = vmatpush3.bf16.msra.mxu1 %v12112_v16  ;;  %7046 = vst [vmem:[%s11545_s17 + $0x28] sm:$0xff] %v2977_v45  ;;  %v14425_v16 = vld [vmem:[#allocation90_spill] sm:$0xff]  ;;  %v5693_v45 = vand.u32 4294901760, %v5692_v44  ;;  %v5687_v29 = vand.u32 4294901760, %v5686_v54  ;;  %v5722_v60 = vsub.f32 %v12065_v25, %v14428_v10  ;;  %v6510_v44 = vand.u32 4294901760, %v6509_v15  ;;  %v14433_v25 = vld [vmem:[#allocation44_spill] sm:$0xff] }
 0x2eb   : > { %8834 = vmatprep.subr.bf16.mxu1 %v14404_v28  ;;  %8650 = vmatpush1.bf16.msra.mxu0 %v12129_v52  ;;  %v3830_v6 = vpop.f32.mrb[2].mxu1  ;;  %v5710_v52 = vsub.f32 %v12063_v36, %v14426_v0  ;;  %v5699_v51 = vand.u32 4294901760, %v5698_v8  ;;  %v5705_v0 = vand.u32 4294901760, %v5704_v2  ;;  %v14431_v54 = vand.u32 4294901760, %v14425_v16 }
 0x2ec   : > { %8652 = vmatprep.subr.bf16.mxu0 %v12146_v56  ;;  %7047 = vst [vmem:[%s11545_s17 + $0x30] sm:$0xff] %v3830_v6  ;;  %v3832_v48 = vpop.f32.mrb[3].mxu1  ;;  %v6517_v56 = vand.u32 4294901760, %v6516_v43  ;;  %v5717_v6 = vand.u32 4294901760, %v5716_v19  ;;  %v14434_v8 = vand.u32 4294901760, %v14427_v1  ;;  %v5723_v19 = vand.u32 4294901760, %v5722_v60 }
 0x2ed   : > { %7048 = vst [vmem:[%s11545_s17 + $0x38] sm:$0xff] %v3832_v48  ;;  %v6523_v10 = vsub.f32 %v14425_v16, %v14431_v54  ;;  %v5711_v48 = vand.u32 4294901760, %v5710_v52  ;;  %v14436_v34 = vand.u32 4294901760, %v14430_v59  ;;  %v8663_v52 = vpack.c.bf16 %v5693_v45, %v5681_v55 }
 0x2ee   : > { %8836 = vmatpush3.bf16.msra.mxu1 %v12136_v53  ;;  %v6530_v15 = vsub.f32 %v14427_v1, %v14434_v8  ;;  %v8665_v53 = vpack.c.bf16 %v5699_v51, %v5687_v29  ;;  %v8847_v8 = vpack.c.bf16 %v6517_v56, %v6510_v44  ;;  %v14437_v1 = vld [vmem:[#allocation23_spill] sm:$0xff]  ;;  %v8667_v60 = vpack.c.bf16 %v5717_v6, %v5705_v0  ;;  %v14442_v44 = vld [vmem:[#allocation25_spill] sm:$0xff] }
 0x2ef   : > { %8837 = vmatprep.subr.bf16.mxu1 %v14404_v28  ;;  %8654 = vmatpush1.bf16.msra.mxu0 %v12159_v5  ;;  %v14435_v5 = vand.u32 4294901760, %v14429_v11  ;;  %v5740_v23 = vsub.f32 %v14430_v59, %v14436_v34  ;;  %v6524_v2 = vand.u32 4294901760, %v6523_v10  ;;  %v14439_v34 = vand.u32 4294901760, %v14433_v25 }
 0x2f0   : > { %8656 = vmatprep.subr.bf16.mxu0 %v12175_v42  ;;  %v6531_v55 = vand.u32 4294901760, %v6530_v15  ;;  %v14440_v56 = vand.u32 4294901760, %v12093_v39  ;;  %v14441_v29 = vand.u32 4294901760, %v12095_v27  ;;  %v8669_v6 = vpack.c.bf16 %v5723_v19, %v5711_v48 }
 0x2f1   : > { %v5728_v54 = vsub.f32 %v14429_v11, %v14435_v5  ;;  %v14438_v5 = vand.u32 4294901760, %v14432_v17  ;;  %v5746_v42 = vsub.f32 %v14433_v25, %v14439_v34  ;;  %v5741_v43 = vand.u32 4294901760, %v5740_v23 }
 0x2f2   : > { %8839 = vmatpush3.bf16.msra.mxu1 %v12165_v32  ;;  %v6537_v45 = vsub.f32 %v12093_v39, %v14440_v56  ;;  %v6544_v51 = vsub.f32 %v12095_v27, %v14441_v29  ;;  %v14445_v15 = vand.u32 4294901760, %v14437_v1  ;;  %v14446_v56 = vld [vmem:[#allocation38_spill] sm:$0xff]  ;;  %v14448_v32 = vand.u32 4294901760, %v14442_v44 }
 0x2f3   : > { %8840 = vmatprep.subr.bf16.mxu1 %v14404_v28  ;;  %8658 = vmatpush1.bf16.msra.mxu0 %v12191_v37  ;;  %v5734_v16 = vsub.f32 %v14432_v17, %v14438_v5  ;;  %v5729_v10 = vand.u32 4294901760, %v5728_v54  ;;  %v14443_v5 = vand.u32 4294901760, %v12100_v13  ;;  %v5747_v19 = vand.u32 4294901760, %v5746_v42  ;;  %v14450_v39 = vld [vmem:[#allocation22_spill] sm:$0xff] }
 0x2f4   : > { %8660 = vmatprep.subr.bf16.mxu0 %v8659_v38  ;;  %v14444_v38 = vld [vmem:[#allocation79_spill] sm:$0xff]  ;;  %v5764_v34 = vsub.f32 %v14437_v1, %v14445_v15  ;;  %v6538_v27 = vand.u32 4294901760, %v6537_v45  ;;  %v6545_v15 = vand.u32 4294901760, %v6544_v51  ;;  %v5758_v29 = vsub.f32 %v14442_v44, %v14448_v32 }
 0x2f5   : > { %v5752_v37 = vsub.f32 %v12100_v13, %v14443_v5  ;;  %v5735_v23 = vand.u32 4294901760, %v5734_v16  ;;  %v14447_v5 = vld [vmem:[#allocation86_spill] sm:$0xff]  ;;  %v8671_v48 = vpack.c.bf16 %v5741_v43, %v5729_v10  ;;  %v14449_v16 = vld [vmem:[#allocation41_spill] sm:$0xff]  ;;  %v13323_v54 = vand.u32 4294901760, %v14450_v39 }
 0x2f6   : > { %8842 = vmatpush3.bf16.msra.mxu1 %v12223_v14  ;;  %5647 = vmatmul.mubr.f32.vlgmr.msra.gmra.mrb[6].mxu0 %v14444_v38  ;;  %v13321_v0 = vand.u32 4294901760, %v14447_v5  ;;  %v8850_v14 = vpack.c.bf16 %v6531_v55, %v6524_v2  ;;  %v13322_v42 = vand.u32 4294901760, %v14449_v16  ;;  %v14451_v2 = vand.u32 4294901760, %v14446_v56 }
 0x2f7   : > { %8843 = vmatprep.subr.bf16.mxu1 %v14404_v28  ;;  %8662 = vmatpush1.bf16.msra.mxu0 %v12255_v26  ;;  %v5753_v26 = vand.u32 4294901760, %v5752_v37  ;;  %v14452_v45 = vand.u32 4294901760, %v12123_v30  ;;  %v14453_v51 = vand.u32 4294901760, %v12127_v33  ;;  %v8673_v37 = vpack.c.bf16 %v5747_v19, %v5735_v23  ;;  %v14455_v19 = vld [vmem:[#allocation97_spill] sm:$0xff] }
 0x2f8   : > { %8664 = vmatprep.subr.bf16.mxu0 %v8663_v52  ;;  %5877 = vmatprep.mubr.f32.mxu0 %v13434_v7  ;;  %v5765_v52 = vand.u32 4294901760, %v5764_v34  ;;  %v5770_v55 = vsub.f32 %v14446_v56, %v14451_v2  ;;  %v8853_v34 = vpack.c.bf16 %v6545_v15, %v6538_v27  ;;  %v5759_v2 = vand.u32 4294901760, %v5758_v29 }
 0x2f9   : > { %7298 = vmatmul.mubr.f32.vlgmr.msra.gmra.mrb[6].mxu1 %v14444_v38  ;;  %v5776_v32 = vsub.f32 %v12123_v30, %v14452_v45  ;;  %v5788_v43 = vsub.f32 %v12127_v33, %v14453_v51  ;;  %v6558_v38 = vsub.f32 %v14447_v5, %v13321_v0  ;;  %v5794_v23 = vsub.f32 %v14450_v39, %v13323_v54 }
 0x2fa   : > { %8845 = vmatpush3.bf16.msra.mxu1 %v12257_v41  ;;  %7332 = vmatprep.mubr.msk.f32.mxu1 %vm9243_vm0, %v13434_v7  ;;  %v14454_v41 = vand.u32 4294901760, %v12116_v9  ;;  %v5771_v27 = vand.u32 4294901760, %v5770_v55  ;;  %v14457_v54 = vand.u32 4294901760, %v12149_v58  ;;  %v13327_v55 = vand.u32 4294901760, %v12189_v35 }
 0x2fb   : > { %8846 = vmatprep.subr.bf16.mxu1 %v14404_v28  ;;  %8666 = vmatpush1.bf16.msra.mxu0 %v8665_v53  ;;  %v5782_v53 = vsub.f32 %v14449_v16, %v13322_v42  ;;  %v5777_v29 = vand.u32 4294901760, %v5776_v32  ;;  %v5789_v15 = vand.u32 4294901760, %v5788_v43  ;;  %v6559_v51 = vand.u32 4294901760, %v6558_v38 }
 0x2fc   : > { %v6551_v10 = vsub.f32 %v12116_v9, %v14454_v41  ;;  %8668 = vmatprep.subr.bf16.mxu0 %v8667_v60  ;;  %v14456_v9 = vld [vmem:[#allocation99_spill] sm:$0xff]  ;;  %v8675_v60 = vpack.c.bf16 %v5765_v52, %v5753_v26  ;;  %v13325_v42 = vand.u32 4294901760, %v12153_v47  ;;  %v5800_v41 = vsub.f32 %v12149_v58, %v14457_v54 }
 0x2fd   : > { %v13324_v33 = vand.u32 4294901760, %v14456_v9  ;;  %v13326_v52 = vand.u32 4294901760, %v12177_v4  ;;  %v5795_v32 = vand.u32 4294901760, %v5794_v23  ;;  %v14459_v43 = vand.u32 4294901760, %v14455_v19 }
 0x2fe   : > { %8848 = vmatpush3.bf16.msra.mxu1 %v8847_v8  ;;  %v6552_v0 = vand.u32 4294901760, %v6551_v10  ;;  %v14458_v8 = vand.u32 4294901760, %v12151_v18  ;;  %v8677_v54 = vpack.c.bf16 %v5771_v27, %v5759_v2  ;;  %v8679_v38 = vpack.c.bf16 %v5789_v15, %v5777_v29 }
 0x2ff   : > { %8849 = vmatprep.subr.bf16.mxu1 %v14404_v28  ;;  %8670 = vmatpush1.bf16.msra.mxu0 %v8669_v6  ;;  %v5783_v6 = vand.u32 4294901760, %v5782_v53  ;;  %v6565_v10 = vsub.f32 %v14455_v19, %v14459_v43  ;;  %v5806_v53 = vsub.f32 %v12153_v47, %v13325_v42  ;;  %v14460_v23 = vand.u32 4294901760, %v12161_v57 }
 0x300   : > { %8672 = vmatprep.subr.bf16.mxu0 %v8671_v48  ;;  %v5812_v26 = vsub.f32 %v12151_v18, %v14458_v8  ;;  %v6572_v48 = vsub.f32 %v14456_v9, %v13324_v33  ;;  %v13329_v33 = vand.u32 4294901760, %v12193_v20  ;;  %v5801_v2 = vand.u32 4294901760, %v5800_v41 }
 0x301   : > { %v5818_v43 = vsub.f32 %v12161_v57, %v14460_v23  ;;  %v5824_v29 = vsub.f32 %v12177_v4, %v13326_v52  ;;  %v8856_v15 = vpack.c.bf16 %v6559_v51, %v6552_v0  ;;  %v8681_v42 = vpack.c.bf16 %v5795_v32, %v5783_v6 }
 0x302   : > { %8851 = vmatpush3.bf16.msra.mxu1 %v8850_v14  ;;  %v5813_v27 = vand.u32 4294901760, %v5812_v26  ;;  %v6566_v8 = vand.u32 4294901760, %v6565_v10  ;;  %v6573_v45 = vand.u32 4294901760, %v6572_v48  ;;  %v14461_v23 = vand.u32 4294901760, %v12171_v24 }
 0x303   : > { %8852 = vmatprep.subr.bf16.mxu1 %v14404_v28  ;;  %8674 = vmatpush1.bf16.msra.mxu0 %v8673_v37  ;;  %v5836_v37 = vsub.f32 %v12189_v35, %v13327_v55  ;;  %v14462_v41 = vand.u32 4294901760, %v12173_v31  ;;  %v13328_v26 = vand.u32 4294901760, %v12209_v46  ;;  %v5807_v0 = vand.u32 4294901760, %v5806_v53 }
 0x304   : > { %8676 = vmatprep.subr.bf16.mxu0 %v8675_v60  ;;  %v6579_v14 = vsub.f32 %v12171_v24, %v14461_v23  ;;  %v5819_v51 = vand.u32 4294901760, %v5818_v43  ;;  %v14463_v6 = vand.u32 4294901760, %v12195_v12  ;;  %v8683_v10 = vpack.c.bf16 %v5813_v27, %v5801_v2 }
 0x305   : > { %v6586_v60 = vsub.f32 %v12173_v31, %v14462_v41  ;;  %v5825_v48 = vand.u32 4294901760, %v5824_v29  ;;  %v5837_v23 = vand.u32 4294901760, %v5836_v37  ;;  %v8859_v41 = vpack.c.bf16 %v6573_v45, %v6566_v8 }
 0x306   : > { %8854 = vmatpush3.bf16.msra.mxu1 %v8853_v34  ;;  %v5830_v34 = vsub.f32 %v12193_v20, %v13329_v33  ;;  %v5842_v32 = vsub.f32 %v12195_v12, %v14463_v6  ;;  %v6580_v55 = vand.u32 4294901760, %v6579_v14  ;;  %v14464_v53 = vand.u32 4294901760, %v12232_v62  ;;  %v14492_v33 = vld [vmem:[#allocation47_spill] sm:$0xff] }
 0x307   : > { %8855 = vmatprep.subr.bf16.mxu1 %v14404_v28  ;;  %8678 = vmatpush1.bf16.msra.mxu0 %v8677_v54  ;;  %v6587_v52 = vand.u32 4294901760, %v6586_v60  ;;  %v6593_v54 = vsub.f32 %v12209_v46, %v13328_v26  ;;  %v8685_v6 = vpack.c.bf16 %v5819_v51, %v5807_v0  ;;  %v8687_v27 = vpack.c.bf16 %v5837_v23, %v5825_v48  ;;  %v14467_v51 = vld [vmem:[#allocation80_spill] sm:$0xff]  ;;  %v14491_v26 = vld [vmem:[#allocation74_spill] sm:$0xff] }
 0x308   : > { %8680 = vmatprep.subr.bf16.mxu0 %v8679_v38  ;;  %v6600_v43 = vsub.f32 %v12232_v62, %v14464_v53  ;;  %v5831_v38 = vand.u32 4294901760, %v5830_v34  ;;  %v5843_v2 = vand.u32 4294901760, %v5842_v32  ;;  %v8691_v37 = vpack.c.bf16 %v12016_v63, %v12012_v50  ;;  %v14468_v32 = vld [vmem:[#allocation95_spill] sm:$0xff]  ;;  %v14470_v23 = vld [vmem:[#allocation20_spill] sm:$0xff] }
 0x309   : > { %v8862_v45 = vpack.c.bf16 %v6587_v52, %v6580_v55  ;;  %v6594_v8 = vand.u32 4294901760, %v6593_v54  ;;  %v8695_v52 = vpack.c.bf16 %v12036_v22, %v12032_v40  ;;  %v14466_v55 = vld [vmem:[#allocation76_spill] sm:$0xff]  ;;  %v8868_v0 = vpack.c.bf16 %v12030_v61, %v12027_v49 }
 0x30a   : > { %8857 = vmatpush3.bf16.msra.mxu1 %v8856_v15  ;;  %v6601_v14 = vand.u32 4294901760, %v6600_v43  ;;  %v8689_v29 = vpack.c.bf16 %v5843_v2, %v5831_v38  ;;  %v8697_v34 = vpack.c.bf16 %v14467_v51, %v12041_v3  ;;  %v14472_v53 = vld [vmem:[#allocation100_spill] sm:$0xff]  ;;  %v14473_v38 = vld [vmem:[#allocation90_spill] sm:$0xff] }
 0x30b   : > { %8858 = vmatprep.subr.bf16.mxu1 %v14404_v28  ;;  %8682 = vmatpush1.bf16.msra.mxu0 %v8681_v42  ;;  %v14465_v42 = vld [vmem:[#allocation52_spill] sm:$0xff]  ;;  %v8701_v43 = vpack.c.bf16 %v14472_v53, %v12063_v36 }
 0x30c   : > { %8684 = vmatprep.subr.bf16.mxu0 %v8683_v10  ;;  %v8865_v15 = vpack.c.bf16 %v6601_v14, %v6594_v8  ;;  %v8693_v60 = vpack.c.bf16 %v14465_v42, %v12018_v21  ;;  %v14469_v10 = vld [vmem:[#allocation54_spill] sm:$0xff]  ;;  %v14474_v2 = vld [vmem:[#allocation96_spill] sm:$0xff]  ;;  %v8707_v8 = vpack.c.bf16 %v14437_v1, %v12100_v13  ;;  %v14475_v14 = vld [vmem:[#allocation51_spill] sm:$0xff] }
 0x30d   : > { %v8699_v48 = vpack.c.bf16 %v14469_v10, %v14468_v32 }
 0x30e   : > { %8860 = vmatpush3.bf16.msra.mxu1 %v8859_v41  ;;  %v14471_v41 = vld [vmem:[#allocation40_spill] sm:$0xff] }
 0x30f   : > { %8861 = vmatprep.subr.bf16.mxu1 %v14404_v28  ;;  %8686 = vmatpush1.bf16.msra.mxu0 %v8685_v6  ;;  %v8871_v54 = vpack.c.bf16 %v14471_v41, %v14470_v23  ;;  %v8703_v6 = vpack.c.bf16 %v14430_v59, %v14429_v11 }
 0x310   : > { %8688 = vmatprep.subr.bf16.mxu0 %v8687_v27  ;;  %v8874_v27 = vpack.c.bf16 %v14474_v2, %v14473_v38 }
 0x312   : > { %8863 = vmatpush3.bf16.msra.mxu1 %v8862_v45  ;;  %v8705_v45 = vpack.c.bf16 %v14433_v25, %v14432_v17 }
 0x313   : > { %8864 = vmatprep.subr.bf16.mxu1 %v14404_v28  ;;  %8690 = vmatpush1.bf16.msra.mxu0 %v8689_v29  ;;  %v14476_v29 = vld [vmem:[#allocation71_spill] sm:$0xff] }
 0x314   : > { %8692 = vmatprep.subr.bf16.mxu0 %v8691_v37  ;;  %v8877_v37 = vpack.c.bf16 %v14476_v29, %v14475_v14 }
 0x316   : > { %8866 = vmatpush3.bf16.msra.mxu1 %v8865_v15  ;;  %5879 = vmatmul.mubr.f32.vlgmr.msra.gmra.mrb[6].mxu0 %v14466_v55  ;;  %v8709_v15 = vpack.c.bf16 %v14446_v56, %v14442_v44 }
 0x317   : > { %8867 = vmatprep.subr.bf16.mxu1 %v14404_v28  ;;  %8694 = vmatpush1.bf16.msra.mxu0 %v8693_v60  ;;  %v14477_v60 = vld [vmem:[#allocation49_spill] sm:$0xff] }
 0x318   : > { %8696 = vmatprep.subr.bf16.mxu0 %v8695_v52  ;;  %6013 = vmatprep.mubr.f32.mxu0 %v13434_v7  ;;  %v8711_v52 = vpack.c.bf16 %v14477_v60, %v12123_v30 }
 0x319   : > { %7333 = vmatmul.mubr.f32.vlgmr.msra.gmra.mrb[6].mxu1 %v14466_v55 }
 0x31a   : > { %8869 = vmatpush3.bf16.msra.mxu1 %v8868_v0  ;;  %7367 = vmatprep.mubr.msk.f32.mxu1 %vm9243_vm0, %v13434_v7  ;;  %v14478_v0 = vld [vmem:[#allocation12_spill] sm:$0xff] }
 0x31b   : > { %8870 = vmatprep.subr.bf16.mxu1 %v14404_v28  ;;  %8698 = vmatpush1.bf16.msra.mxu0 %v8697_v34  ;;  %v8880_v34 = vpack.c.bf16 %v14447_v5, %v14478_v0 }
 0x31c   : > { %8700 = vmatprep.subr.bf16.mxu0 %v8699_v48  ;;  %v8713_v48 = vpack.c.bf16 %v14450_v39, %v14449_v16 }
 0x31e   : > { %8872 = vmatpush3.bf16.msra.mxu1 %v8871_v54  ;;  %v8715_v54 = vpack.c.bf16 %v12151_v18, %v12149_v58 }
 0x31f   : > { %8873 = vmatprep.subr.bf16.mxu1 %v14404_v28  ;;  %8702 = vmatpush1.bf16.msra.mxu0 %v8701_v43  ;;  %v8883_v43 = vpack.c.bf16 %v14456_v9, %v14455_v19 }
 0x320   : > { %8704 = vmatprep.subr.bf16.mxu0 %v8703_v6  ;;  %v8717_v6 = vpack.c.bf16 %v12161_v57, %v12153_v47 }
 0x322   : > { %8875 = vmatpush3.bf16.msra.mxu1 %v8874_v27  ;;  %v8719_v27 = vpack.c.bf16 %v12189_v35, %v12177_v4 }
 0x323   : > { %8876 = vmatprep.subr.bf16.mxu1 %v14404_v28  ;;  %8706 = vmatpush1.bf16.msra.mxu0 %v8705_v45  ;;  %v8886_v45 = vpack.c.bf16 %v12173_v31, %v12171_v24 }
 0x324   : > { %8708 = vmatprep.subr.bf16.mxu0 %v8707_v8  ;;  %v8721_v8 = vpack.c.bf16 %v12195_v12, %v12193_v20 }
 0x326   : > { %8878 = vmatpush3.bf16.msra.mxu1 %v8877_v37  ;;  %v8889_v37 = vpack.c.bf16 %v12232_v62, %v12209_v46 }
 0x327   : > { %8879 = vmatprep.subr.bf16.mxu1 %v14404_v28  ;;  %8710 = vmatpush1.bf16.msra.mxu0 %v8709_v15  ;;  %v14479_v15 = vld [vmem:[#allocation31_spill] sm:$0xff] }
 0x328   : > { %8712 = vmatprep.subr.bf16.mxu0 %v8711_v52  ;;  %v14480_v52 = vld [vmem:[#allocation77_spill] sm:$0xff] }
 0x32a   : > { %8881 = vmatpush3.bf16.msra.mxu1 %v8880_v34  ;;  %v14481_v34 = vld [vmem:[#allocation29_spill] sm:$0xff] }
 0x32b   : > { %8882 = vmatprep.subr.bf16.mxu1 %v14404_v28  ;;  %8714 = vmatpush1.bf16.msra.mxu0 %v8713_v48  ;;  %v14482_v48 = vld [vmem:[#allocation59_spill] sm:$0xff] }
 0x32c   : > { %8716 = vmatprep.subr.bf16.mxu0 %v8715_v54  ;;  %v14483_v54 = vld [vmem:[#allocation13_spill] sm:$0xff] }
 0x32e   : > { %8884 = vmatpush3.bf16.msra.mxu1 %v8883_v43  ;;  %v14484_v43 = vld [vmem:[#allocation16_spill] sm:$0xff] }
 0x32f   : > { %8885 = vmatprep.subr.bf16.mxu1 %v14404_v28  ;;  %8718 = vmatpush1.bf16.msra.mxu0 %v8717_v6  ;;  %v14485_v6 = vld [vmem:[#allocation101_spill] sm:$0xff] }
 0x330   : > { %8720 = vmatprep.subr.bf16.mxu0 %v8719_v27  ;;  %v14486_v27 = vld [vmem:[#allocation21_spill] sm:$0xff] }
 0x332   : > { %8887 = vmatpush3.bf16.msra.mxu1 %v8886_v45  ;;  %v14487_v45 = vld [vmem:[#allocation85_spill] sm:$0xff] }
 0x333   : > { %8888 = vmatprep.subr.bf16.mxu1 %v14404_v28  ;;  %8722 = vmatpush1.bf16.msra.mxu0 %v8721_v8  ;;  %v14488_v8 = vld [vmem:[#allocation64_spill] sm:$0xff] }
 0x334   : > { %8724 = vmatprep.subr.bf16.mxu0 %v14479_v15 }
 0x336   : > { %8890 = vmatpush3.bf16.msra.mxu1 %v8889_v37  ;;  %6016 = vmatmul.mubr.f32.vlgmr.msra.gmra.mrb[6].mxu0 %v14480_v52  ;;  %v14489_v37 = vld [vmem:[#allocation89_spill] sm:$0xff] }
 0x337   : > { %8891 = vmatprep.subr.bf16.mxu1 %v14404_v28  ;;  %8726 = vmatpush1.bf16.msra.mxu0 %v14481_v34 }
 0x338   : > { %8728 = vmatprep.subr.bf16.mxu0 %v14482_v48  ;;  %6118 = vmatprep.mubr.f32.mxu0 %v13434_v7  ;;  %v14509_v48 = vld [vmem:[#allocation104_spill] sm:$0xff] }
 0x339   : > { %7368 = vmatmul.mubr.f32.vlgmr.msra.gmra.mrb[6].mxu1 %v14480_v52  ;;  %v14490_v52 = vld [vmem:[#allocation66_spill] sm:$0xff] }
 0x33a   : > { %8893 = vmatpush3.bf16.msra.mxu1 %v14483_v54  ;;  %7402 = vmatprep.mubr.msk.f32.mxu1 %vm9243_vm0, %v13434_v7 }
 0x33b   : > { %8894 = vmatprep.subr.bf16.mxu1 %v14404_v28  ;;  %8730 = vmatpush1.bf16.msra.mxu0 %v14484_v43  ;;  %v14495_v43 = vld [vmem:[#allocation58_spill] sm:$0xff] }
 0x33c   : > { %8732 = vmatprep.subr.bf16.mxu0 %v14485_v6  ;;  %v14493_v6 = vld [vmem:[#allocation30_spill] sm:$0xff] }
 0x33e   : > { %8896 = vmatpush3.bf16.msra.mxu1 %v14486_v27  ;;  %v14494_v27 = vld [vmem:[#allocation61_spill] sm:$0xff] }
 0x33f   : > { %8897 = vmatprep.subr.bf16.mxu1 %v14404_v28  ;;  %8734 = vmatpush1.bf16.msra.mxu0 %v14487_v45  ;;  %v14498_v45 = vld [vmem:[#allocation82_spill] sm:$0xff] }
 0x340   : > { %8736 = vmatprep.subr.bf16.mxu0 %v14488_v8  ;;  %v14496_v8 = vld [vmem:[#allocation32_spill] sm:$0xff] }
 0x342   : > { %8899 = vmatpush3.bf16.msra.mxu1 %v14489_v37  ;;  %v14497_v37 = vld [vmem:[#allocation102_spill] sm:$0xff] }
 0x343   : > { %8900 = vmatprep.subr.bf16.mxu1 %v14404_v28  ;;  %8738 = vmatpush1.bf16.msra.mxu0 %v14490_v52 }
 0x344   : > { %8740 = vmatprep.subr.bf16.mxu0 %v14491_v26  ;;  %v14499_v26 = vld [vmem:[#allocation55_spill] sm:$0xff] }
 0x346   : > { %8902 = vmatpush3.bf16.msra.mxu1 %v14492_v33  ;;  %v14500_v33 = vld [vmem:[#allocation56_spill] sm:$0xff] }
 0x347   : > { %8903 = vmatprep.subr.bf16.mxu1 %v14404_v28  ;;  %8742 = vmatpush1.bf16.msra.mxu0 %v14493_v6  ;;  %v14501_v6 = vand.u32 4294901760, %v12012_v50 }
 0x348   : > { %8744 = vmatprep.subr.bf16.mxu0 %v14494_v27  ;;  %v14502_v27 = vand.u32 4294901760, %v12016_v63  ;;  %v14510_v63 = vld [vmem:[#allocation78_spill] sm:$0xff] }
 0x34a   : > { %8905 = vmatpush3.bf16.msra.mxu1 %v14495_v43  ;;  %v8755_v52 = vpack.c.bf16 %v14502_v27, %v14501_v6  ;;  %v14503_v43 = vld [vmem:[#allocation103_spill] sm:$0xff]  ;;  %v14511_v6 = vand.u32 4294901760, %v12027_v49  ;;  %v14512_v27 = vand.u32 4294901760, %v12030_v61  ;;  %v14517_v49 = vand.u32 4294901760, %v14470_v23 }
 0x34b   : > { %8906 = vmatprep.subr.bf16.mxu1 %v14404_v28  ;;  %8746 = vmatpush1.bf16.msra.mxu0 %v14496_v8  ;;  %v14504_v8 = vld [vmem:[#allocation65_spill] sm:$0xff]  ;;  %v14518_v61 = vand.u32 4294901760, %v14471_v41  ;;  %v14523_v41 = vand.u32 4294901760, %v14473_v38  ;;  %v14529_v38 = vand.u32 4294901760, %v14475_v14  ;;  %v14535_v14 = vand.u32 4294901760, %v14478_v0 }
 0x34c   : > { %8748 = vmatprep.subr.bf16.mxu0 %v14497_v37  ;;  %v14505_v37 = vand.u32 4294901760, %v12018_v21  ;;  %v14513_v21 = vand.u32 4294901760, %v12041_v3  ;;  %v14519_v3 = vand.u32 4294901760, %v12063_v36  ;;  %v14525_v36 = vand.u32 4294901760, %v14432_v17 }
 0x34d   : > { %v14531_v17 = vand.u32 4294901760, %v14442_v44  ;;  %v14537_v44 = vand.u32 4294901760, %v14449_v16  ;;  %v14541_v0 = vand.u32 4294901760, %v14455_v19  ;;  %v14543_v16 = vand.u32 4294901760, %v12153_v47 }
 0x34e   : > { %8908 = vmatpush3.bf16.msra.mxu1 %v14498_v45  ;;  %v14506_v45 = vand.u32 4294901760, %v14465_v42  ;;  %v14514_v42 = vand.u32 4294901760, %v14467_v51  ;;  %v14520_v51 = vand.u32 4294901760, %v14472_v53  ;;  %v14526_v53 = vand.u32 4294901760, %v14433_v25 }
 0x34f   : > { %8909 = vmatprep.subr.bf16.mxu1 %v14404_v28  ;;  %8750 = vmatpush1.bf16.msra.mxu0 %v14499_v26  ;;  %v14507_v26 = vand.u32 4294901760, %v12032_v40  ;;  %v14532_v25 = vand.u32 4294901760, %v14446_v56  ;;  %v14538_v56 = vand.u32 4294901760, %v14450_v39  ;;  %v14544_v39 = vand.u32 4294901760, %v12161_v57 }
 0x350   : > { %8752 = vmatprep.subr.bf16.mxu0 %v14500_v33  ;;  %v8757_v54 = vpack.c.bf16 %v14506_v45, %v14505_v37  ;;  %v14508_v33 = vand.u32 4294901760, %v12036_v22  ;;  %v8761_v40 = vpack.c.bf16 %v14514_v42, %v14513_v21  ;;  %v14515_v22 = vand.u32 4294901760, %v14468_v32 }
 0x351   : > { %v8765_v32 = vpack.c.bf16 %v14520_v51, %v14519_v3  ;;  %v14522_v45 = vand.u32 4294901760, %v14430_v59  ;;  %v14528_v59 = vand.u32 4294901760, %v14437_v1  ;;  %v14534_v1 = vand.u32 4294901760, %v14477_v60  ;;  %v14561_v3 = vld [vmem:[#allocation66_spill] sm:$0xff]  ;;  %v14563_v51 = vld [vmem:[#allocation47_spill] sm:$0xff] }
 0x352   : > { %8911 = vmatpush3.bf16.msra.mxu1 %v14503_v43  ;;  %v8759_v50 = vpack.c.bf16 %v14508_v33, %v14507_v26  ;;  %v14516_v33 = vand.u32 4294901760, %v14469_v10  ;;  %v14521_v10 = vand.u32 4294901760, %v14429_v11  ;;  %v14527_v11 = vand.u32 4294901760, %v12100_v13 }
 0x353   : > { %8912 = vmatprep.subr.bf16.mxu1 %v14404_v28  ;;  %8754 = vmatpush1.bf16.msra.mxu0 %v14504_v8  ;;  %v8916_v8 = vpack.c.bf16 %v14512_v27, %v14511_v6  ;;  %v8773_v6 = vpack.c.bf16 %v14532_v25, %v14531_v17  ;;  %v14533_v13 = vand.u32 4294901760, %v12123_v30  ;;  %v8777_v42 = vpack.c.bf16 %v14538_v56, %v14537_v44 }
 0x354   : > { %8756 = vmatprep.subr.bf16.mxu0 %v8755_v52  ;;  %v8763_v26 = vpack.c.bf16 %v14516_v33, %v14515_v22  ;;  %v8767_v23 = vpack.c.bf16 %v14522_v45, %v14521_v10  ;;  %v8769_v52 = vpack.c.bf16 %v14526_v53, %v14525_v36  ;;  %v14539_v30 = vand.u32 4294901760, %v12149_v58  ;;  %v14565_v10 = vld [vmem:[#allocation61_spill] sm:$0xff]  ;;  %v14566_v45 = vld [vmem:[#allocation58_spill] sm:$0xff]  ;;  %v14571_v36 = vld [vmem:[#allocation56_spill] sm:$0xff] }
 0x355   : > { %v8775_v27 = vpack.c.bf16 %v14534_v1, %v14533_v13  ;;  %v14540_v60 = vand.u32 4294901760, %v12151_v18  ;;  %v8781_v33 = vpack.c.bf16 %v14544_v39, %v14543_v16  ;;  %v14545_v58 = vand.u32 4294901760, %v12177_v4  ;;  %v14572_v53 = vld [vmem:[#allocation65_spill] sm:$0xff] }
 0x356   : > { %8914 = vmatpush3.bf16.msra.mxu1 %v14509_v48  ;;  %6122 = vmatmul.mubr.f32.vlgmr.msra.gmra.mrb[6].mxu0 %v14510_v63  ;;  %v14546_v18 = vand.u32 4294901760, %v12189_v35  ;;  %v14547_v19 = vand.u32 4294901760, %v12171_v24  ;;  %v14549_v47 = vand.u32 4294901760, %v12193_v20  ;;  %v14550_v57 = vand.u32 4294901760, %v12195_v12  ;;  %v14553_v24 = vld [vmem:[#allocation59_spill] sm:$0xff]  ;;  %v14555_v20 = vld [vmem:[#allocation16_spill] sm:$0xff] }
 0x357   : > { %8915 = vmatprep.subr.bf16.mxu1 %v14404_v28  ;;  %8758 = vmatpush1.bf16.msra.mxu0 %v8757_v54  ;;  %v8919_v54 = vpack.c.bf16 %v14518_v61, %v14517_v49  ;;  %v14551_v4 = vand.u32 4294901760, %v12209_v46  ;;  %v14552_v35 = vand.u32 4294901760, %v12232_v62  ;;  %v14556_v12 = vld [vmem:[#allocation101_spill] sm:$0xff] }
 0x358   : > { %8760 = vmatprep.subr.bf16.mxu0 %v8759_v50  ;;  %6288 = vmatprep.mubr.f32.mxu0 %v13434_v7  ;;  %v8771_v50 = vpack.c.bf16 %v14528_v59, %v14527_v11  ;;  %v8785_v61 = vpack.c.bf16 %v14550_v57, %v14549_v47  ;;  %v14557_v46 = vld [vmem:[#allocation21_spill] sm:$0xff] }
 0x359   : > { %7403 = vmatmul.mubr.f32.vlgmr.msra.gmra.mrb[6].mxu1 %v14510_v63  ;;  %v14558_v62 = vld [vmem:[#allocation85_spill] sm:$0xff] }
 0x35a   : > { %8917 = vmatpush3.bf16.msra.mxu1 %v8916_v8  ;;  %7437 = vmatprep.mubr.msk.f32.mxu1 %vm9243_vm0, %v13434_v7  ;;  %v14524_v8 = vand.u32 4294901760, %v14474_v2  ;;  %v14530_v2 = vand.u32 4294901760, %v14476_v29  ;;  %v14536_v29 = vand.u32 4294901760, %v14447_v5  ;;  %v14542_v5 = vand.u32 4294901760, %v14456_v9 }
 0x35b   : > { %8918 = vmatprep.subr.bf16.mxu1 %v14404_v28  ;;  %8762 = vmatpush1.bf16.msra.mxu0 %v8761_v40  ;;  %v8779_v40 = vpack.c.bf16 %v14540_v60, %v14539_v30  ;;  %v14548_v9 = vand.u32 4294901760, %v12173_v31  ;;  %v14554_v31 = vld [vmem:[#allocation13_spill] sm:$0xff] }
 0x35c   : > { %8764 = vmatprep.subr.bf16.mxu0 %v8763_v26  ;;  %v8922_v37 = vpack.c.bf16 %v14524_v8, %v14523_v41  ;;  %v8925_v63 = vpack.c.bf16 %v14530_v2, %v14529_v38  ;;  %v8928_v21 = vpack.c.bf16 %v14536_v29, %v14535_v14  ;;  %v8931_v22 = vpack.c.bf16 %v14542_v5, %v14541_v0  ;;  %v14568_v41 = vld [vmem:[#allocation102_spill] sm:$0xff] }
 0x35d   : > { %v8783_v26 = vpack.c.bf16 %v14546_v18, %v14545_v58  ;;  %v8934_v49 = vpack.c.bf16 %v14548_v9, %v14547_v19  ;;  %v14569_v8 = vld [vmem:[#allocation82_spill] sm:$0xff] }
 0x35e   : > { %8920 = vmatpush3.bf16.msra.mxu1 %v8919_v54  ;;  %v8937_v54 = vpack.c.bf16 %v14552_v35, %v14551_v4 }
 0x35f   : > { %8921 = vmatprep.subr.bf16.mxu1 %v14404_v28  ;;  %8766 = vmatpush1.bf16.msra.mxu0 %v8765_v32  ;;  %v14564_v32 = vld [vmem:[#allocation30_spill] sm:$0xff] }
 0x360   : > { %8768 = vmatprep.subr.bf16.mxu0 %v8767_v23  ;;  %v14567_v23 = vld [vmem:[#allocation32_spill] sm:$0xff] }
 0x362   : > { %8923 = vmatpush3.bf16.msra.mxu1 %v8922_v37  ;;  %v14570_v37 = vld [vmem:[#allocation55_spill] sm:$0xff] }
 0x363   : > { %8924 = vmatprep.subr.bf16.mxu1 %v14404_v28  ;;  %8770 = vmatpush1.bf16.msra.mxu0 %v8769_v52 }
 0x364   : > { %8772 = vmatprep.subr.bf16.mxu0 %v8771_v50 }
 0x366   : > { %8926 = vmatpush3.bf16.msra.mxu1 %v8925_v63 }
 0x367   : > { %8927 = vmatprep.subr.bf16.mxu1 %v14404_v28  ;;  %8774 = vmatpush1.bf16.msra.mxu0 %v8773_v6 }
 0x368   : > { %8776 = vmatprep.subr.bf16.mxu0 %v8775_v27 }
 0x36a   : > { %8929 = vmatpush3.bf16.msra.mxu1 %v8928_v21 }
 0x36b   : > { %8930 = vmatprep.subr.bf16.mxu1 %v14404_v28  ;;  %8778 = vmatpush1.bf16.msra.mxu0 %v8777_v42 }
 0x36c   : > { %8780 = vmatprep.subr.bf16.mxu0 %v8779_v40 }
 0x36e   : > { %8932 = vmatpush3.bf16.msra.mxu1 %v8931_v22 }
 0x36f   : > { %8933 = vmatprep.subr.bf16.mxu1 %v14404_v28  ;;  %8782 = vmatpush1.bf16.msra.mxu0 %v8781_v33 }
 0x370   : > { %8784 = vmatprep.subr.bf16.mxu0 %v8783_v26 }
 0x372   : > { %8935 = vmatpush3.bf16.msra.mxu1 %v8934_v49 }
 0x373   : > { %8936 = vmatprep.subr.bf16.mxu1 %v14404_v28  ;;  %8786 = vmatpush1.bf16.msra.mxu0 %v8785_v61 }
 0x374   : > { %8788 = vmatprep.subr.bf16.mxu0 %v14479_v15  ;;  %v14559_v15 = vld [vmem:[#allocation64_spill] sm:$0xff] }
 0x376   : > { %8938 = vmatpush3.bf16.msra.mxu1 %v8937_v54  ;;  %6290 = vmatmul.mubr.f32.vlgmr.msra.gmra.mrb[6].mxu0 %v14466_v55 }
 0x377   : > { %8939 = vmatprep.subr.bf16.mxu1 %v14404_v28  ;;  %8790 = vmatpush1.bf16.msra.mxu0 %v14481_v34  ;;  %v14560_v34 = vld [vmem:[#allocation89_spill] sm:$0xff] }
 0x378   : > { %8792 = vmatprep.subr.bf16.mxu0 %v14553_v24  ;;  %6392 = vmatprep.mubr.f32.mxu0 %v13434_v7 }
 0x379   : > { %7438 = vmatmul.mubr.f32.vlgmr.msra.gmra.mrb[6].mxu1 %v14466_v55 }
 0x37a   : > { %8941 = vmatpush3.bf16.msra.mxu1 %v14554_v31  ;;  %7472 = vmatprep.mubr.msk.f32.mxu1 %vm9243_vm0, %v13434_v7  ;;  %v14562_v7 = vld [vmem:[#allocation74_spill] sm:$0xff] }
 0x37b   : > { %8942 = vmatprep.subr.bf16.mxu1 %v14404_v28  ;;  %8794 = vmatpush1.bf16.msra.mxu0 %v14555_v20 }
 0x37c   : > { %8796 = vmatprep.subr.bf16.mxu0 %v14556_v12 }
 0x37e   : > { %8944 = vmatpush3.bf16.msra.mxu1 %v14557_v46 }
 0x37f   : > { %8945 = vmatprep.subr.bf16.mxu1 %v14404_v28  ;;  %8798 = vmatpush1.bf16.msra.mxu0 %v14558_v62 }
 0x380   : > { %8800 = vmatprep.subr.bf16.mxu0 %v14559_v15 }
 0x382   : > { %8947 = vmatpush3.bf16.msra.mxu1 %v14560_v34 }
 0x383   : > { %8948 = vmatprep.subr.bf16.mxu1 %v14404_v28  ;;  %8802 = vmatpush1.bf16.msra.mxu0 %v14561_v3 }
 0x384   : > { %8804 = vmatprep.subr.bf16.mxu0 %v14562_v7 }
 0x386   : > { %8950 = vmatpush3.bf16.msra.mxu1 %v14563_v51 }
 0x387   : > { %8951 = vmatprep.subr.bf16.mxu1 %v14404_v28  ;;  %8806 = vmatpush1.bf16.msra.mxu0 %v14564_v32 }
 0x388   : > { %8808 = vmatprep.subr.bf16.mxu0 %v14565_v10 }
 0x38a   : > { %8953 = vmatpush3.bf16.msra.mxu1 %v14566_v45 }
 0x38b   : > { %8954 = vmatprep.subr.bf16.mxu1 %v14404_v28  ;;  %8810 = vmatpush1.bf16.msra.mxu0 %v14567_v23 }
 0x38c   : > { %8812 = vmatprep.subr.bf16.mxu0 %v14568_v41 }
 0x38e   : > { %8956 = vmatpush3.bf16.msra.mxu1 %v14569_v8 }
 0x38f   : > { %8957 = vmatprep.subr.bf16.mxu1 %v14404_v28  ;;  %8814 = vmatpush1.bf16.msra.mxu0 %v14570_v37 }
 0x390   : > { %8816 = vmatprep.subr.bf16.mxu0 %v14571_v36 }
 0x392   : > { %8959 = vmatpush3.bf16.msra.mxu1 %v14503_v43 }
 0x393   : > { %8960 = vmatprep.subr.bf16.mxu1 %v14404_v28  ;;  %8818 = vmatpush1.bf16.msra.mxu0 %v14572_v53 }
 0x396   : > { %8962 = vmatpush3.bf16.msra.mxu1 %v14509_v48  ;;  %6394 = vmatmul.mubr.f32.vlgmr.msra.gmra.mrb[6].mxu0 %v14466_v55 }
 0x399   : > { %7473 = vmatmul.mubr.f32.vlgmr.msra.gmra.mrb[6].mxu1 %v14466_v55 }
 0x3a9   : > { %v4685_v52 = vpop.f32.mrb[4].mxu0 }
 0x3aa   : > { %7049 = vst [vmem:[%s11545_s17 + $0x40] sm:$0xff] %v4685_v52  ;;  %v4687_v11 = vpop.f32.mrb[5].mxu0 }
 0x3ab   : > { %7050 = vst [vmem:[%s11545_s17 + $0x48] sm:$0xff] %v4687_v11 }
 0x3ac   : > { %v5540_v59 = vpop.f32.mrb[4].mxu1 }
 0x3ad   : > { %7051 = vst [vmem:[%s11545_s17 + $0x50] sm:$0xff] %v5540_v59  ;;  %v5542_v43 = vpop.f32.mrb[5].mxu1 }
 0x3ae   : > { %7052 = vst [vmem:[%s11545_s17 + $0x58] sm:$0xff] %v5542_v43 }
 0x469   : > { %v6395_v28 = vpop.f32.mrb[6].mxu0 }
 0x46a   : > { %7053 = vst [vmem:[%s11545_s17 + $0x60] sm:$0xff] %v6395_v28  ;;  %v6397_v48 = vpop.f32.mrb[7].mxu0 }
 0x46b   : > { %7054 = vst [vmem:[%s11545_s17 + $0x68] sm:$0xff] %v6397_v48 }
 0x46c   : > { %v7037_v55 = vpop.f32.mrb[6].mxu1 }
 0x46d   : > { %7055 = vst [vmem:[%s11545_s17 + $0x70] sm:$0xff] %v7037_v55  ;;  %v7474_v50 = vpop.f32.mrb[7].mxu1 }
 0x46e   : > { %9178 = shalt.err (!%p9175_p7)
}
 0x46f   : > { %s9179_s7 = scalar_lea.hbm %s12679_s30, 1920  ;;  %s9183_s25 = scalar_lea.hbm %s12726_s2, 3840 }
 0x470   : > { %p9180_p9 = scmp.ne.s32.totalorder %s12679_s30, %s9179_s7  ;;  %p9184_p0 = scmp.lt.u32.totalorder %s12679_s30, %s12726_s2 }
 0x471   : > { %p9185_p11 = scmp.lt.u32.totalorder %s9183_s25, %s9179_s7  ;;  %p9187_p4 = scmp.lt.u32.totalorder %s9179_s7, %s12679_s30 }
 0x472   : > { %p9181_p2 = pnand %p9180_p9, %p9351_p12 }
 0x473   : > { %p9186_p1 = por %p9185_p11, %p9184_p0 }
 0x474   : > { %p9182_p5 = pneg %p9181_p2 }
 0x475   : > { %p9188_p6 = por %p9187_p4, %p9186_p1 }
 0x477   : > { %p9189_p8 = pnand %p9188_p6, %p9182_p5 }
 0x479   : > { %9192 = shalt.err (!%p9189_p8)
}
 0x47a   : > { %9051 = dma.vmem_to_hbm [thread:$0]  (%p9351_p12), %s12681_s22, 1920, %s12679_s30, %s7057_s3  }
 0x47b PF: > { %s7083_s19 = sand.u32 1, %s9223_s9   ;;  %p14573_p10 = scmp.ne.s32.totalorder %s13331_s16, 0 }
 0x47c   : > { %p14574_p13 = scmp.ge.s32.totalorder %s9235_s12, 2  ;;  %s7084_s29 = scalar_lea.sflag [#allocation4], %s7083_s19 }
 0x47e   : > { %p9062_p3 = pnand %p14574_p13, %p14573_p10 }
 0x480   : > { %9218 = dma.done.wait (!%p9062_p3), %s7084_s29, 1920  }
 0x481   : > { %9220 = vsyncadd (!%p9062_p3), %s7084_s29, 4294965376  ;;  %p16_p7 = scmp.ge.s32.totalorder %s9316_s21, 4   ;;  %s14575_s9 = smov %s9227_s10 }
 0x482   : > { %s14576_s10 = smov %s9231_s11  ;;  %s14577_s11 = smov %s9347_s8 }
 0x483   : > { %s14578_s12 = smov %s9316_s21  ;;  %18 = sbr.rel (!%p16_p7) target bundleno = 6 (0x6), region = 77 }
 0x48a   :  { %7089 = vsyncpa [#allocation3], 1 }
 0x48b   :  { %7091 = vsyncpa [#allocation3 + $0x1], 1 }
 0x48c   :  { %7092 = vsyncpa [#allocation6], 1 }
 0x48d   :  { %7093 = vsyncpa [#allocation4], 1 }
 0x48e   :  { %7095 = vsyncpa [#allocation4 + $0x1], 1 }

</bundles_post_ra>
